<compile_context>
chip_gen: v7x
topology: tpu7x:2x2x1
jax: 0.10.0
libtpu: 0.0.40
codegen_flags: <defaults>
</compile_context>

<pallas_src>
import functools

import jax
import jax.numpy as jnp
from jax.experimental import pallas as pl
from jax.experimental.pallas import tpu as pltpu


def _round_up(x, m):
    return ((x + m - 1) // m) * m


# --------------------------- fused GRU + Linear kernel ---------------------------

def make_fused_gru_kernel(num_layers: int, seq_len: int, batch_pad: int, hidden_pad: int):
    """All layers, all timesteps, and the final Linear in one kernel body."""
    T, Bp, Hp = seq_len, batch_pad, hidden_pad

    def kernel(*refs):
        # refs layout:
        #   x_ref                                  (T*Bp, Ip)  time-major, batch-padded
        #   per layer l: wih (in_p, 3Hp), whh (Hp, 3Hp),
        #                bias_fold (1, 3Hp)  [= bih + (bhh_r, bhh_z, 0)],
        #                bhh_n (1, Hp)
        #   fc_w (Hp, Op), fc_b (1, Op)
        #   out_ref (Bp, Op)
        #   seq_ref VMEM scratch (T*Bp, Hp)   inter-layer activations (never hit HBM)
        #   gi_ref  VMEM scratch (T*Bp, 3Hp)  precomputed input projections
        x_ref = refs[0]
        lrefs = refs[1:1 + 4 * num_layers]
        fc_w_ref = refs[1 + 4 * num_layers]
        fc_b_ref = refs[2 + 4 * num_layers]
        out_ref = refs[3 + 4 * num_layers]
        seq_ref = refs[4 + 4 * num_layers]
        gi_ref = refs[5 + 4 * num_layers]

        h = jnp.zeros((Bp, Hp), jnp.float32)
        for layer in range(num_layers):
            wih = lrefs[4 * layer + 0][...]          # (in_p, 3Hp), gate order [r|z|n], lane-aligned
            whh = lrefs[4 * layer + 1][...]          # (Hp, 3Hp)
            bias_fold = lrefs[4 * layer + 2][...]    # (1, 3Hp)
            # Hoisted once per layer (JAX doesn't CSE broadcast_in_dim).
            bhh_n = jnp.broadcast_to(lrefs[4 * layer + 3][...], (Bp, Hp))

            # ---- off-critical-path: input projection for ALL timesteps at once ----
            # NOTE: full read of seq_ref happens BEFORE the time loop below starts
            # overwriting it (avoids the read-after-overwrite hazard).
            x_all = x_ref[...] if layer == 0 else seq_ref[...]
            gi_ref[...] = (jnp.dot(x_all, wih, preferred_element_type=jnp.float32)
                           + bias_fold)

            # ---- serial recurrence: only h @ whh remains on the critical path ----
            h = jnp.zeros((Bp, Hp), jnp.float32)     # zero initial hidden state
            for t in range(T):                       # static unroll (T small)
                rows = pl.ds(t * Bp, Bp)             # static, sublane-aligned view
                gi = gi_ref[rows, :]                 # (Bp, 3Hp)
                gh = jnp.dot(h, whh, preferred_element_type=jnp.float32)
                r = jax.nn.sigmoid(gi[:, 0 * Hp:1 * Hp] + gh[:, 0 * Hp:1 * Hp])
                z = jax.nn.sigmoid(gi[:, 1 * Hp:2 * Hp] + gh[:, 1 * Hp:2 * Hp])
                n = jnp.tanh(gi[:, 2 * Hp:3 * Hp] + r * (gh[:, 2 * Hp:3 * Hp] + bhh_n))
                h = (1.0 - z) * n + z * h
                if layer < num_layers - 1:
                    seq_ref[rows, :] = h             # VMEM-resident inter-layer activation
            # TODO(synk): inter-layer dropout omitted (inference/eval semantics).

        # Fused final Linear on the last layer's last hidden state (lane-dense Op).
        out_ref[...] = (jnp.dot(h, fc_w_ref[...], preferred_element_type=jnp.float32)
                        + fc_b_ref[...])

    return kernel


# --------------------------- padded / packed parameters ---------------------------

def pack_params(params, input_size, hidden_size, output_size):
    """Pad & gate-align logical params to hardware tiles (lane=128, sublane=8)."""
    H = hidden_size
    Hp = _round_up(H, 128)
    Op = _round_up(output_size, 128)
    Ip = _round_up(input_size, 8)

    packed = {"layers": []}
    for li, lp in enumerate(params["gru_layers"]):
        in_l = input_size if li == 0 else H
        in_p = Ip if li == 0 else Hp
        wih = jnp.zeros((in_p, 3 * Hp), jnp.float32)
        whh = jnp.zeros((Hp, 3 * Hp), jnp.float32)
        bias_fold = jnp.zeros((1, 3 * Hp), jnp.float32)
        bhh_n = jnp.zeros((1, Hp), jnp.float32)
        for g in range(3):                            # gates [r, z, n], each at a 128-lane offset
            wih = wih.at[:in_l, g * Hp:g * Hp + H].set(lp["wih"][:, g * H:(g + 1) * H])
            whh = whh.at[:H, g * Hp:g * Hp + H].set(lp["whh"][:, g * H:(g + 1) * H])
            b = lp["bih"][0, g * H:(g + 1) * H]
            if g < 2:                                 # bhh_r / bhh_z fold into the precompute
                b = b + lp["bhh"][0, g * H:(g + 1) * H]
            bias_fold = bias_fold.at[0, g * Hp:g * Hp + H].set(b)
        bhh_n = bhh_n.at[0, :H].set(lp["bhh"][0, 2 * H:3 * H])
        packed["layers"].append(
            {"wih": wih, "whh": whh, "bias_fold": bias_fold, "bhh_n": bhh_n})

    packed["fc_w"] = jnp.zeros((Hp, Op), jnp.float32).at[:H, :output_size].set(params["fc_w"])
    packed["fc_b"] = jnp.zeros((1, Op), jnp.float32).at[0, :output_size].set(params["fc_b"][0])
    return packed


# ------------------------------- forward wrapper ---------------------------------

@functools.partial(jax.jit, static_argnames=("out_size",))
def simple_gru_forward(x_bti, packed, *, out_size):
    """Equivalent of SimpleGRU.forward: x (B, T, I) -> (B, output_size)."""
    B, T, I = x_bti.shape
    layers = packed["layers"]
    num_layers = len(layers)
    Hp = layers[0]["whh"].shape[0]
    Ip = layers[0]["wih"].shape[0]
    Op = packed["fc_w"].shape[1]
    Bp = _round_up(max(B, 8), 8)

    # Time-major, batch padded to a full sublane tile, flattened to (T*Bp, Ip)
    # so every per-step access in the kernel is an aligned static slice.
    x_tbi = jnp.transpose(x_bti.astype(jnp.float32), (1, 0, 2))            # (T, B, I)
    x_flat = (jnp.zeros((T, Bp, Ip), jnp.float32)
              .at[:, :B, :I].set(x_tbi)
              .reshape(T * Bp, Ip))

    args = [x_flat]
    for lp in layers:
        args += [lp["wih"], lp["whh"], lp["bias_fold"], lp["bhh_n"]]
    args += [packed["fc_w"], packed["fc_b"]]

    scratch = [pltpu.VMEM((T * Bp, Hp), jnp.float32),        # inter-layer activations
               pltpu.VMEM((T * Bp, 3 * Hp), jnp.float32)]    # precomputed projections

    # Explicit scoped-VMEM budget: operands + output + scratch, with headroom.
    vmem_bytes = sum(int(a.size) * a.dtype.itemsize for a in args)
    vmem_bytes += Bp * Op * 4 + T * Bp * Hp * 4 + T * Bp * 3 * Hp * 4
    vmem_limit = int(min(100 * 1024 * 1024, max(16 * 1024 * 1024, 4 * vmem_bytes)))

    kernel = make_fused_gru_kernel(num_layers, T, Bp, Hp)
    out_p = pl.pallas_call(
        kernel,
        out_shape=jax.ShapeDtypeStruct((Bp, Op), jnp.float32),   # lane-dense output
        # No grid: single invocation; every operand is a full VMEM-resident block,
        # so weights are DMA'd once and activations never round-trip to HBM.
        scratch_shapes=scratch,
        compiler_params=pltpu.CompilerParams(vmem_limit_bytes=vmem_limit),
    )(*args)
    return out_p[:B, :out_size]


# ------------------------------- parameter init ----------------------------------

def init_params(key, input_size, hidden_size, num_layers, output_size):
    """PyTorch-style init (uniform(-1/sqrt(H), 1/sqrt(H))), gate-stacked layout."""
    H = hidden_size
    k = 1.0 / jnp.sqrt(jnp.float32(H))
    params = {"gru_layers": []}
    for layer in range(num_layers):
        in_sz = input_size if layer == 0 else H
        key, k1, k2, k3, k4 = jax.random.split(key, 5)
        params["gru_layers"].append({
            # pre-transposed & gate-stacked along output dim: gate order [r, z, n]
            "wih": jax.random.uniform(k1, (in_sz, 3 * H), jnp.float32, -k, k),
            "whh": jax.random.uniform(k2, (H, 3 * H), jnp.float32, -k, k),
            "bih": jax.random.uniform(k3, (1, 3 * H), jnp.float32, -k, k),
            "bhh": jax.random.uniform(k4, (1, 3 * H), jnp.float32, -k, k),
        })
    key, k5, k6 = jax.random.split(key, 3)
    params["fc_w"] = jax.random.uniform(k5, (H, output_size), jnp.float32, -k, k)
    params["fc_b"] = jax.random.uniform(k6, (1, output_size), jnp.float32, -k, k)
    return params


# ----------------------------- pure-JAX reference ---------------------------------

def gru_reference(x_bti, params):
    x = x_bti.astype(jnp.float32)
    B, T, _ = x.shape
    h_seq = x
    for lp in params["gru_layers"]:
        H = lp["whh"].shape[0]
        h = jnp.zeros((B, H), jnp.float32)
        outs = []
        for t in range(T):
            gi = h_seq[:, t, :] @ lp["wih"] + lp["bih"]
            gh = h @ lp["whh"] + lp["bhh"]
            r = jax.nn.sigmoid(gi[:, :H] + gh[:, :H])
            z = jax.nn.sigmoid(gi[:, H:2 * H] + gh[:, H:2 * H])
            n = jnp.tanh(gi[:, 2 * H:] + r * gh[:, 2 * H:])
            h = (1.0 - z) * n + z * h
            outs.append(h)
        h_seq = jnp.stack(outs, axis=1)
    return h_seq[:, -1, :] @ params["fc_w"] + params["fc_b"]


if __name__ == "__main__":
    B, T, I, H, L, O = 2, 8, 16, 32, 2, 4

    key = jax.random.PRNGKey(0)
    key, kx = jax.random.split(key)
    x = jax.random.normal(kx, (B, T, I), dtype=jnp.float32)   # (batch, seq, input)
    params = init_params(key, input_size=I, hidden_size=H,
                         num_layers=L, output_size=O)
    packed = pack_params(params, input_size=I, hidden_size=H, output_size=O)

    out = simple_gru_forward(x, packed, out_size=O)
    jax.block_until_ready(out)
    assert out.shape == (B, O)

    ref = gru_reference(x, params)
    assert jnp.allclose(out, ref, rtol=1e-3, atol=1e-3), (out, ref)

    print("KERNEL_OK")
</pallas_src>

<mosaic_0001>
module attributes {stable_mosaic.version = 11 : i64} {
  func.func @kernel(%arg0: memref<64x16xf32, #tpu.memory_space<vmem>>, %arg1: memref<16x384xf32, #tpu.memory_space<vmem>>, %arg2: memref<128x384xf32, #tpu.memory_space<vmem>>, %arg3: memref<1x384xf32, #tpu.memory_space<vmem>>, %arg4: memref<1x128xf32, #tpu.memory_space<vmem>>, %arg5: memref<128x384xf32, #tpu.memory_space<vmem>>, %arg6: memref<128x384xf32, #tpu.memory_space<vmem>>, %arg7: memref<1x384xf32, #tpu.memory_space<vmem>>, %arg8: memref<1x128xf32, #tpu.memory_space<vmem>>, %arg9: memref<128x128xf32, #tpu.memory_space<vmem>>, %arg10: memref<1x128xf32, #tpu.memory_space<vmem>>, %arg11: memref<8x128xf32, #tpu.memory_space<vmem>>, %arg12: memref<64x128xf32, #tpu.memory_space<vmem>>, %arg13: memref<64x384xf32, #tpu.memory_space<vmem>>) attributes {dimension_semantics = [], scalar_prefetch = 0 : i64, scratch_operands = 2 : i64, tpu.core_type = #tpu.core_type<tc>} {
    %c0 = arith.constant 0 : index
    %c0_0 = arith.constant 0 : index
    %0 = vector.load %arg1[%c0, %c0_0] : memref<16x384xf32, #tpu.memory_space<vmem>>, vector<16x384xf32>
    %c0_1 = arith.constant 0 : index
    %c0_2 = arith.constant 0 : index
    %1 = vector.load %arg2[%c0_1, %c0_2] : memref<128x384xf32, #tpu.memory_space<vmem>>, vector<128x384xf32>
    %c0_3 = arith.constant 0 : index
    %c0_4 = arith.constant 0 : index
    %2 = vector.load %arg3[%c0_3, %c0_4] : memref<1x384xf32, #tpu.memory_space<vmem>>, vector<1x384xf32>
    %c0_5 = arith.constant 0 : index
    %c0_6 = arith.constant 0 : index
    %3 = vector.load %arg4[%c0_5, %c0_6] : memref<1x128xf32, #tpu.memory_space<vmem>>, vector<1x128xf32>
    %4 = vector.shape_cast %3 : vector<1x128xf32> to vector<1x128xf32>
    %5 = vector.broadcast %4 : vector<1x128xf32> to vector<8x128xf32>
    %c0_7 = arith.constant 0 : index
    %c0_8 = arith.constant 0 : index
    %6 = vector.load %arg0[%c0_7, %c0_8] : memref<64x16xf32, #tpu.memory_space<vmem>>, vector<64x16xf32>
    %cst = arith.constant dense<0.000000e+00> : vector<64x384xf32>
    %7 = tpu.matmul %6, %0, %cst {dimension_numbers = #tpu.dot_dimension_numbers<[1], [0], [0], [1], [0, 0, 1, 1], [], []>} : vector<64x16xf32>, vector<16x384xf32>, vector<64x384xf32> -> vector<64x384xf32>
    %8 = vector.broadcast %2 : vector<1x384xf32> to vector<64x384xf32>
    %9 = arith.addf %7, %8 : vector<64x384xf32>
    %c0_9 = arith.constant 0 : index
    %c0_10 = arith.constant 0 : index
    %10 = vector.load %arg13[%c0_9, %c0_10] : memref<64x384xf32, #tpu.memory_space<vmem>>, vector<64x384xf32>
    tpu.vector_store %arg13[%c0_9, %c0_10], %9 {strides = array<i32>} : memref<64x384xf32, #tpu.memory_space<vmem>>, vector<64x384xf32>,
    %cst_11 = arith.constant 0.000000e+00 : f32
    %11 = vector.broadcast %cst_11 : f32 to vector<8x128xf32>
    %c0_12 = arith.constant 0 : index
    %c0_13 = arith.constant 0 : index
    %12 = vector.load %arg13[%c0_12, %c0_13] : memref<64x384xf32, #tpu.memory_space<vmem>>, vector<8x384xf32>
    %cst_14 = arith.constant dense<0.000000e+00> : vector<8x384xf32>
    %13 = tpu.matmul %11, %1, %cst_14 {dimension_numbers = #tpu.dot_dimension_numbers<[1], [0], [0], [1], [0, 0, 1, 1], [], []>} : vector<8x128xf32>, vector<128x384xf32>, vector<8x384xf32> -> vector<8x384xf32>
    %14 = vector.extract_strided_slice %12 {offsets = [0, 0], sizes = [8, 128], strides = [1, 1]} : vector<8x384xf32> to vector<8x128xf32>
    %15 = vector.extract_strided_slice %13 {offsets = [0, 0], sizes = [8, 128], strides = [1, 1]} : vector<8x384xf32> to vector<8x128xf32>
    %16 = arith.addf %14, %15 : vector<8x128xf32>
    %17 = arith.negf %16 : vector<8x128xf32>
    %18 = math.exp %17 : vector<8x128xf32>
    %cst_15 = arith.constant 1.000000e+00 : f32
    %19 = vector.broadcast %cst_15 : f32 to vector<8x128xf32>
    %20 = arith.addf %19, %18 : vector<8x128xf32>
    %21 = arith.divf %19, %20 : vector<8x128xf32>
    %22 = vector.extract_strided_slice %12 {offsets = [0, 128], sizes = [8, 128], strides = [1, 1]} : vector<8x384xf32> to vector<8x128xf32>
    %23 = vector.extract_strided_slice %13 {offsets = [0, 128], sizes = [8, 128], strides = [1, 1]} : vector<8x384xf32> to vector<8x128xf32>
    %24 = arith.addf %22, %23 : vector<8x128xf32>
    %25 = arith.negf %24 : vector<8x128xf32>
    %26 = math.exp %25 : vector<8x128xf32>
    %cst_16 = arith.constant 1.000000e+00 : f32
    %27 = vector.broadcast %cst_16 : f32 to vector<8x128xf32>
    %28 = arith.addf %27, %26 : vector<8x128xf32>
    %29 = arith.divf %27, %28 : vector<8x128xf32>
    %30 = vector.extract_strided_slice %12 {offsets = [0, 256], sizes = [8, 128], strides = [1, 1]} : vector<8x384xf32> to vector<8x128xf32>
    %31 = vector.extract_strided_slice %13 {offsets = [0, 256], sizes = [8, 128], strides = [1, 1]} : vector<8x384xf32> to vector<8x128xf32>
    %32 = arith.addf %31, %5 : vector<8x128xf32>
    %33 = arith.mulf %21, %32 : vector<8x128xf32>
    %34 = arith.addf %30, %33 : vector<8x128xf32>
    %35 = math.tanh %34 : vector<8x128xf32>
    %cst_17 = arith.constant 1.000000e+00 : f32
    %36 = vector.broadcast %cst_17 : f32 to vector<8x128xf32>
    %37 = arith.subf %36, %29 : vector<8x128xf32>
    %38 = arith.mulf %37, %35 : vector<8x128xf32>
    %39 = arith.mulf %29, %11 : vector<8x128xf32>
    %40 = arith.addf %38, %39 : vector<8x128xf32>
    %c0_18 = arith.constant 0 : index
    %c0_19 = arith.constant 0 : index
    %41 = vector.load %arg12[%c0_18, %c0_19] : memref<64x128xf32, #tpu.memory_space<vmem>>, vector<8x128xf32>
    tpu.vector_store %arg12[%c0_18, %c0_19], %40 {strides = array<i32>} : memref<64x128xf32, #tpu.memory_space<vmem>>, vector<8x128xf32>,
    %c8 = arith.constant 8 : index
    %c0_20 = arith.constant 0 : index
    %42 = vector.load %arg13[%c8, %c0_20] : memref<64x384xf32, #tpu.memory_space<vmem>>, vector<8x384xf32>
    %cst_21 = arith.constant dense<0.000000e+00> : vector<8x384xf32>
    %43 = tpu.matmul %40, %1, %cst_21 {dimension_numbers = #tpu.dot_dimension_numbers<[1], [0], [0], [1], [0, 0, 1, 1], [], []>} : vector<8x128xf32>, vector<128x384xf32>, vector<8x384xf32> -> vector<8x384xf32>
    %44 = vector.extract_strided_slice %42 {offsets = [0, 0], sizes = [8, 128], strides = [1, 1]} : vector<8x384xf32> to vector<8x128xf32>
    %45 = vector.extract_strided_slice %43 {offsets = [0, 0], sizes = [8, 128], strides = [1, 1]} : vector<8x384xf32> to vector<8x128xf32>
    %46 = arith.addf %44, %45 : vector<8x128xf32>
    %47 = arith.negf %46 : vector<8x128xf32>
    %48 = math.exp %47 : vector<8x128xf32>
    %cst_22 = arith.constant 1.000000e+00 : f32
    %49 = vector.broadcast %cst_22 : f32 to vector<8x128xf32>
    %50 = arith.addf %49, %48 : vector<8x128xf32>
    %51 = arith.divf %49, %50 : vector<8x128xf32>
    %52 = vector.extract_strided_slice %42 {offsets = [0, 128], sizes = [8, 128], strides = [1, 1]} : vector<8x384xf32> to vector<8x128xf32>
    %53 = vector.extract_strided_slice %43 {offsets = [0, 128], sizes = [8, 128], strides = [1, 1]} : vector<8x384xf32> to vector<8x128xf32>
    %54 = arith.addf %52, %53 : vector<8x128xf32>
    %55 = arith.negf %54 : vector<8x128xf32>
    %56 = math.exp %55 : vector<8x128xf32>
    %cst_23 = arith.constant 1.000000e+00 : f32
    %57 = vector.broadcast %cst_23 : f32 to vector<8x128xf32>
    %58 = arith.addf %57, %56 : vector<8x128xf32>
    %59 = arith.divf %57, %58 : vector<8x128xf32>
    %60 = vector.extract_strided_slice %42 {offsets = [0, 256], sizes = [8, 128], strides = [1, 1]} : vector<8x384xf32> to vector<8x128xf32>
    %61 = vector.extract_strided_slice %43 {offsets = [0, 256], sizes = [8, 128], strides = [1, 1]} : vector<8x384xf32> to vector<8x128xf32>
    %62 = arith.addf %61, %5 : vector<8x128xf32>
    %63 = arith.mulf %51, %62 : vector<8x128xf32>
    %64 = arith.addf %60, %63 : vector<8x128xf32>
    %65 = math.tanh %64 : vector<8x128xf32>
    %cst_24 = arith.constant 1.000000e+00 : f32
    %66 = vector.broadcast %cst_24 : f32 to vector<8x128xf32>
    %67 = arith.subf %66, %59 : vector<8x128xf32>
    %68 = arith.mulf %67, %65 : vector<8x128xf32>
    %69 = arith.mulf %59, %40 : vector<8x128xf32>
    %70 = arith.addf %68, %69 : vector<8x128xf32>
    %c8_25 = arith.constant 8 : index
    %c0_26 = arith.constant 0 : index
    %71 = vector.load %arg12[%c8_25, %c0_26] : memref<64x128xf32, #tpu.memory_space<vmem>>, vector<8x128xf32>
    tpu.vector_store %arg12[%c8_25, %c0_26], %70 {strides = array<i32>} : memref<64x128xf32, #tpu.memory_space<vmem>>, vector<8x128xf32>,
    %c16 = arith.constant 16 : index
    %c0_27 = arith.constant 0 : index
    %72 = vector.load %arg13[%c16, %c0_27] : memref<64x384xf32, #tpu.memory_space<vmem>>, vector<8x384xf32>
    %cst_28 = arith.constant dense<0.000000e+00> : vector<8x384xf32>
    %73 = tpu.matmul %70, %1, %cst_28 {dimension_numbers = #tpu.dot_dimension_numbers<[1], [0], [0], [1], [0, 0, 1, 1], [], []>} : vector<8x128xf32>, vector<128x384xf32>, vector<8x384xf32> -> vector<8x384xf32>
    %74 = vector.extract_strided_slice %72 {offsets = [0, 0], sizes = [8, 128], strides = [1, 1]} : vector<8x384xf32> to vector<8x128xf32>
    %75 = vector.extract_strided_slice %73 {offsets = [0, 0], sizes = [8, 128], strides = [1, 1]} : vector<8x384xf32> to vector<8x128xf32>
    %76 = arith.addf %74, %75 : vector<8x128xf32>
    %77 = arith.negf %76 : vector<8x128xf32>
    %78 = math.exp %77 : vector<8x128xf32>
    %cst_29 = arith.constant 1.000000e+00 : f32
    %79 = vector.broadcast %cst_29 : f32 to vector<8x128xf32>
    %80 = arith.addf %79, %78 : vector<8x128xf32>
    %81 = arith.divf %79, %80 : vector<8x128xf32>
    %82 = vector.extract_strided_slice %72 {offsets = [0, 128], sizes = [8, 128], strides = [1, 1]} : vector<8x384xf32> to vector<8x128xf32>
    %83 = vector.extract_strided_slice %73 {offsets = [0, 128], sizes = [8, 128], strides = [1, 1]} : vector<8x384xf32> to vector<8x128xf32>
    %84 = arith.addf %82, %83 : vector<8x128xf32>
    %85 = arith.negf %84 : vector<8x128xf32>
    %86 = math.exp %85 : vector<8x128xf32>
    %cst_30 = arith.constant 1.000000e+00 : f32
    %87 = vector.broadcast %cst_30 : f32 to vector<8x128xf32>
    %88 = arith.addf %87, %86 : vector<8x128xf32>
    %89 = arith.divf %87, %88 : vector<8x128xf32>
    %90 = vector.extract_strided_slice %72 {offsets = [0, 256], sizes = [8, 128], strides = [1, 1]} : vector<8x384xf32> to vector<8x128xf32>
    %91 = vector.extract_strided_slice %73 {offsets = [0, 256], sizes = [8, 128], strides = [1, 1]} : vector<8x384xf32> to vector<8x128xf32>
    %92 = arith.addf %91, %5 : vector<8x128xf32>
    %93 = arith.mulf %81, %92 : vector<8x128xf32>
    %94 = arith.addf %90, %93 : vector<8x128xf32>
    %95 = math.tanh %94 : vector<8x128xf32>
    %cst_31 = arith.constant 1.000000e+00 : f32
    %96 = vector.broadcast %cst_31 : f32 to vector<8x128xf32>
    %97 = arith.subf %96, %89 : vector<8x128xf32>
    %98 = arith.mulf %97, %95 : vector<8x128xf32>
    %99 = arith.mulf %89, %70 : vector<8x128xf32>
    %100 = arith.addf %98, %99 : vector<8x128xf32>
    %c16_32 = arith.constant 16 : index
    %c0_33 = arith.constant 0 : index
    %101 = vector.load %arg12[%c16_32, %c0_33] : memref<64x128xf32, #tpu.memory_space<vmem>>, vector<8x128xf32>
    tpu.vector_store %arg12[%c16_32, %c0_33], %100 {strides = array<i32>} : memref<64x128xf32, #tpu.memory_space<vmem>>, vector<8x128xf32>,
    %c24 = arith.constant 24 : index
    %c0_34 = arith.constant 0 : index
    %102 = vector.load %arg13[%c24, %c0_34] : memref<64x384xf32, #tpu.memory_space<vmem>>, vector<8x384xf32>
    %cst_35 = arith.constant dense<0.000000e+00> : vector<8x384xf32>
    %103 = tpu.matmul %100, %1, %cst_35 {dimension_numbers = #tpu.dot_dimension_numbers<[1], [0], [0], [1], [0, 0, 1, 1], [], []>} : vector<8x128xf32>, vector<128x384xf32>, vector<8x384xf32> -> vector<8x384xf32>
    %104 = vector.extract_strided_slice %102 {offsets = [0, 0], sizes = [8, 128], strides = [1, 1]} : vector<8x384xf32> to vector<8x128xf32>
    %105 = vector.extract_strided_slice %103 {offsets = [0, 0], sizes = [8, 128], strides = [1, 1]} : vector<8x384xf32> to vector<8x128xf32>
    %106 = arith.addf %104, %105 : vector<8x128xf32>
    %107 = arith.negf %106 : vector<8x128xf32>
    %108 = math.exp %107 : vector<8x128xf32>
    %cst_36 = arith.constant 1.000000e+00 : f32
    %109 = vector.broadcast %cst_36 : f32 to vector<8x128xf32>
    %110 = arith.addf %109, %108 : vector<8x128xf32>
    %111 = arith.divf %109, %110 : vector<8x128xf32>
    %112 = vector.extract_strided_slice %102 {offsets = [0, 128], sizes = [8, 128], strides = [1, 1]} : vector<8x384xf32> to vector<8x128xf32>
    %113 = vector.extract_strided_slice %103 {offsets = [0, 128], sizes = [8, 128], strides = [1, 1]} : vector<8x384xf32> to vector<8x128xf32>
    %114 = arith.addf %112, %113 : vector<8x128xf32>
    %115 = arith.negf %114 : vector<8x128xf32>
    %116 = math.exp %115 : vector<8x128xf32>
    %cst_37 = arith.constant 1.000000e+00 : f32
    %117 = vector.broadcast %cst_37 : f32 to vector<8x128xf32>
    %118 = arith.addf %117, %116 : vector<8x128xf32>
    %119 = arith.divf %117, %118 : vector<8x128xf32>
    %120 = vector.extract_strided_slice %102 {offsets = [0, 256], sizes = [8, 128], strides = [1, 1]} : vector<8x384xf32> to vector<8x128xf32>
    %121 = vector.extract_strided_slice %103 {offsets = [0, 256], sizes = [8, 128], strides = [1, 1]} : vector<8x384xf32> to vector<8x128xf32>
    %122 = arith.addf %121, %5 : vector<8x128xf32>
    %123 = arith.mulf %111, %122 : vector<8x128xf32>
    %124 = arith.addf %120, %123 : vector<8x128xf32>
    %125 = math.tanh %124 : vector<8x128xf32>
    %cst_38 = arith.constant 1.000000e+00 : f32
    %126 = vector.broadcast %cst_38 : f32 to vector<8x128xf32>
    %127 = arith.subf %126, %119 : vector<8x128xf32>
    %128 = arith.mulf %127, %125 : vector<8x128xf32>
    %129 = arith.mulf %119, %100 : vector<8x128xf32>
    %130 = arith.addf %128, %129 : vector<8x128xf32>
    %c24_39 = arith.constant 24 : index
    %c0_40 = arith.constant 0 : index
    %131 = vector.load %arg12[%c24_39, %c0_40] : memref<64x128xf32, #tpu.memory_space<vmem>>, vector<8x128xf32>
    tpu.vector_store %arg12[%c24_39, %c0_40], %130 {strides = array<i32>} : memref<64x128xf32, #tpu.memory_space<vmem>>, vector<8x128xf32>,
    %c32 = arith.constant 32 : index
    %c0_41 = arith.constant 0 : index
    %132 = vector.load %arg13[%c32, %c0_41] : memref<64x384xf32, #tpu.memory_space<vmem>>, vector<8x384xf32>
    %cst_42 = arith.constant dense<0.000000e+00> : vector<8x384xf32>
    %133 = tpu.matmul %130, %1, %cst_42 {dimension_numbers = #tpu.dot_dimension_numbers<[1], [0], [0], [1], [0, 0, 1, 1], [], []>} : vector<8x128xf32>, vector<128x384xf32>, vector<8x384xf32> -> vector<8x384xf32>
    %134 = vector.extract_strided_slice %132 {offsets = [0, 0], sizes = [8, 128], strides = [1, 1]} : vector<8x384xf32> to vector<8x128xf32>
    %135 = vector.extract_strided_slice %133 {offsets = [0, 0], sizes = [8, 128], strides = [1, 1]} : vector<8x384xf32> to vector<8x128xf32>
    %136 = arith.addf %134, %135 : vector<8x128xf32>
    %137 = arith.negf %136 : vector<8x128xf32>
    %138 = math.exp %137 : vector<8x128xf32>
    %cst_43 = arith.constant 1.000000e+00 : f32
    %139 = vector.broadcast %cst_43 : f32 to vector<8x128xf32>
    %140 = arith.addf %139, %138 : vector<8x128xf32>
    %141 = arith.divf %139, %140 : vector<8x128xf32>
    %142 = vector.extract_strided_slice %132 {offsets = [0, 128], sizes = [8, 128], strides = [1, 1]} : vector<8x384xf32> to vector<8x128xf32>
    %143 = vector.extract_strided_slice %133 {offsets = [0, 128], sizes = [8, 128], strides = [1, 1]} : vector<8x384xf32> to vector<8x128xf32>
    %144 = arith.addf %142, %143 : vector<8x128xf32>
    %145 = arith.negf %144 : vector<8x128xf32>
    %146 = math.exp %145 : vector<8x128xf32>
    %cst_44 = arith.constant 1.000000e+00 : f32
    %147 = vector.broadcast %cst_44 : f32 to vector<8x128xf32>
    %148 = arith.addf %147, %146 : vector<8x128xf32>
    %149 = arith.divf %147, %148 : vector<8x128xf32>
    %150 = vector.extract_strided_slice %132 {offsets = [0, 256], sizes = [8, 128], strides = [1, 1]} : vector<8x384xf32> to vector<8x128xf32>
    %151 = vector.extract_strided_slice %133 {offsets = [0, 256], sizes = [8, 128], strides = [1, 1]} : vector<8x384xf32> to vector<8x128xf32>
    %152 = arith.addf %151, %5 : vector<8x128xf32>
    %153 = arith.mulf %141, %152 : vector<8x128xf32>
    %154 = arith.addf %150, %153 : vector<8x128xf32>
    %155 = math.tanh %154 : vector<8x128xf32>
    %cst_45 = arith.constant 1.000000e+00 : f32
    %156 = vector.broadcast %cst_45 : f32 to vector<8x128xf32>
    %157 = arith.subf %156, %149 : vector<8x128xf32>
    %158 = arith.mulf %157, %155 : vector<8x128xf32>
    %159 = arith.mulf %149, %130 : vector<8x128xf32>
    %160 = arith.addf %158, %159 : vector<8x128xf32>
    %c32_46 = arith.constant 32 : index
    %c0_47 = arith.constant 0 : index
    %161 = vector.load %arg12[%c32_46, %c0_47] : memref<64x128xf32, #tpu.memory_space<vmem>>, vector<8x128xf32>
    tpu.vector_store %arg12[%c32_46, %c0_47], %160 {strides = array<i32>} : memref<64x128xf32, #tpu.memory_space<vmem>>, vector<8x128xf32>,
    %c40 = arith.constant 40 : index
    %c0_48 = arith.constant 0 : index
    %162 = vector.load %arg13[%c40, %c0_48] : memref<64x384xf32, #tpu.memory_space<vmem>>, vector<8x384xf32>
    %cst_49 = arith.constant dense<0.000000e+00> : vector<8x384xf32>
    %163 = tpu.matmul %160, %1, %cst_49 {dimension_numbers = #tpu.dot_dimension_numbers<[1], [0], [0], [1], [0, 0, 1, 1], [], []>} : vector<8x128xf32>, vector<128x384xf32>, vector<8x384xf32> -> vector<8x384xf32>
    %164 = vector.extract_strided_slice %162 {offsets = [0, 0], sizes = [8, 128], strides = [1, 1]} : vector<8x384xf32> to vector<8x128xf32>
    %165 = vector.extract_strided_slice %163 {offsets = [0, 0], sizes = [8, 128], strides = [1, 1]} : vector<8x384xf32> to vector<8x128xf32>
    %166 = arith.addf %164, %165 : vector<8x128xf32>
    %167 = arith.negf %166 : vector<8x128xf32>
    %168 = math.exp %167 : vector<8x128xf32>
    %cst_50 = arith.constant 1.000000e+00 : f32
    %169 = vector.broadcast %cst_50 : f32 to vector<8x128xf32>
    %170 = arith.addf %169, %168 : vector<8x128xf32>
    %171 = arith.divf %169, %170 : vector<8x128xf32>
    %172 = vector.extract_strided_slice %162 {offsets = [0, 128], sizes = [8, 128], strides = [1, 1]} : vector<8x384xf32> to vector<8x128xf32>
    %173 = vector.extract_strided_slice %163 {offsets = [0, 128], sizes = [8, 128], strides = [1, 1]} : vector<8x384xf32> to vector<8x128xf32>
    %174 = arith.addf %172, %173 : vector<8x128xf32>
    %175 = arith.negf %174 : vector<8x128xf32>
    %176 = math.exp %175 : vector<8x128xf32>
    %cst_51 = arith.constant 1.000000e+00 : f32
    %177 = vector.broadcast %cst_51 : f32 to vector<8x128xf32>
    %178 = arith.addf %177, %176 : vector<8x128xf32>
    %179 = arith.divf %177, %178 : vector<8x128xf32>
    %180 = vector.extract_strided_slice %162 {offsets = [0, 256], sizes = [8, 128], strides = [1, 1]} : vector<8x384xf32> to vector<8x128xf32>
    %181 = vector.extract_strided_slice %163 {offsets = [0, 256], sizes = [8, 128], strides = [1, 1]} : vector<8x384xf32> to vector<8x128xf32>
    %182 = arith.addf %181, %5 : vector<8x128xf32>
    %183 = arith.mulf %171, %182 : vector<8x128xf32>
    %184 = arith.addf %180, %183 : vector<8x128xf32>
    %185 = math.tanh %184 : vector<8x128xf32>
    %cst_52 = arith.constant 1.000000e+00 : f32
    %186 = vector.broadcast %cst_52 : f32 to vector<8x128xf32>
    %187 = arith.subf %186, %179 : vector<8x128xf32>
    %188 = arith.mulf %187, %185 : vector<8x128xf32>
    %189 = arith.mulf %179, %160 : vector<8x128xf32>
    %190 = arith.addf %188, %189 : vector<8x128xf32>
    %c40_53 = arith.constant 40 : index
    %c0_54 = arith.constant 0 : index
    %191 = vector.load %arg12[%c40_53, %c0_54] : memref<64x128xf32, #tpu.memory_space<vmem>>, vector<8x128xf32>
    tpu.vector_store %arg12[%c40_53, %c0_54], %190 {strides = array<i32>} : memref<64x128xf32, #tpu.memory_space<vmem>>, vector<8x128xf32>,
    %c48 = arith.constant 48 : index
    %c0_55 = arith.constant 0 : index
    %192 = vector.load %arg13[%c48, %c0_55] : memref<64x384xf32, #tpu.memory_space<vmem>>, vector<8x384xf32>
    %cst_56 = arith.constant dense<0.000000e+00> : vector<8x384xf32>
    %193 = tpu.matmul %190, %1, %cst_56 {dimension_numbers = #tpu.dot_dimension_numbers<[1], [0], [0], [1], [0, 0, 1, 1], [], []>} : vector<8x128xf32>, vector<128x384xf32>, vector<8x384xf32> -> vector<8x384xf32>
    %194 = vector.extract_strided_slice %192 {offsets = [0, 0], sizes = [8, 128], strides = [1, 1]} : vector<8x384xf32> to vector<8x128xf32>
    %195 = vector.extract_strided_slice %193 {offsets = [0, 0], sizes = [8, 128], strides = [1, 1]} : vector<8x384xf32> to vector<8x128xf32>
    %196 = arith.addf %194, %195 : vector<8x128xf32>
    %197 = arith.negf %196 : vector<8x128xf32>
    %198 = math.exp %197 : vector<8x128xf32>
    %cst_57 = arith.constant 1.000000e+00 : f32
    %199 = vector.broadcast %cst_57 : f32 to vector<8x128xf32>
    %200 = arith.addf %199, %198 : vector<8x128xf32>
    %201 = arith.divf %199, %200 : vector<8x128xf32>
    %202 = vector.extract_strided_slice %192 {offsets = [0, 128], sizes = [8, 128], strides = [1, 1]} : vector<8x384xf32> to vector<8x128xf32>
    %203 = vector.extract_strided_slice %193 {offsets = [0, 128], sizes = [8, 128], strides = [1, 1]} : vector<8x384xf32> to vector<8x128xf32>
    %204 = arith.addf %202, %203 : vector<8x128xf32>
    %205 = arith.negf %204 : vector<8x128xf32>
    %206 = math.exp %205 : vector<8x128xf32>
    %cst_58 = arith.constant 1.000000e+00 : f32
    %207 = vector.broadcast %cst_58 : f32 to vector<8x128xf32>
    %208 = arith.addf %207, %206 : vector<8x128xf32>
    %209 = arith.divf %207, %208 : vector<8x128xf32>
    %210 = vector.extract_strided_slice %192 {offsets = [0, 256], sizes = [8, 128], strides = [1, 1]} : vector<8x384xf32> to vector<8x128xf32>
    %211 = vector.extract_strided_slice %193 {offsets = [0, 256], sizes = [8, 128], strides = [1, 1]} : vector<8x384xf32> to vector<8x128xf32>
    %212 = arith.addf %211, %5 : vector<8x128xf32>
    %213 = arith.mulf %201, %212 : vector<8x128xf32>
    %214 = arith.addf %210, %213 : vector<8x128xf32>
    %215 = math.tanh %214 : vector<8x128xf32>
    %cst_59 = arith.constant 1.000000e+00 : f32
    %216 = vector.broadcast %cst_59 : f32 to vector<8x128xf32>
    %217 = arith.subf %216, %209 : vector<8x128xf32>
    %218 = arith.mulf %217, %215 : vector<8x128xf32>
    %219 = arith.mulf %209, %190 : vector<8x128xf32>
    %220 = arith.addf %218, %219 : vector<8x128xf32>
    %c48_60 = arith.constant 48 : index
    %c0_61 = arith.constant 0 : index
    %221 = vector.load %arg12[%c48_60, %c0_61] : memref<64x128xf32, #tpu.memory_space<vmem>>, vector<8x128xf32>
    tpu.vector_store %arg12[%c48_60, %c0_61], %220 {strides = array<i32>} : memref<64x128xf32, #tpu.memory_space<vmem>>, vector<8x128xf32>,
    %c56 = arith.constant 56 : index
    %c0_62 = arith.constant 0 : index
    %222 = vector.load %arg13[%c56, %c0_62] : memref<64x384xf32, #tpu.memory_space<vmem>>, vector<8x384xf32>
    %cst_63 = arith.constant dense<0.000000e+00> : vector<8x384xf32>
    %223 = tpu.matmul %220, %1, %cst_63 {dimension_numbers = #tpu.dot_dimension_numbers<[1], [0], [0], [1], [0, 0, 1, 1], [], []>} : vector<8x128xf32>, vector<128x384xf32>, vector<8x384xf32> -> vector<8x384xf32>
    %224 = vector.extract_strided_slice %222 {offsets = [0, 0], sizes = [8, 128], strides = [1, 1]} : vector<8x384xf32> to vector<8x128xf32>
    %225 = vector.extract_strided_slice %223 {offsets = [0, 0], sizes = [8, 128], strides = [1, 1]} : vector<8x384xf32> to vector<8x128xf32>
    %226 = arith.addf %224, %225 : vector<8x128xf32>
    %227 = arith.negf %226 : vector<8x128xf32>
    %228 = math.exp %227 : vector<8x128xf32>
    %cst_64 = arith.constant 1.000000e+00 : f32
    %229 = vector.broadcast %cst_64 : f32 to vector<8x128xf32>
    %230 = arith.addf %229, %228 : vector<8x128xf32>
    %231 = arith.divf %229, %230 : vector<8x128xf32>
    %232 = vector.extract_strided_slice %222 {offsets = [0, 128], sizes = [8, 128], strides = [1, 1]} : vector<8x384xf32> to vector<8x128xf32>
    %233 = vector.extract_strided_slice %223 {offsets = [0, 128], sizes = [8, 128], strides = [1, 1]} : vector<8x384xf32> to vector<8x128xf32>
    %234 = arith.addf %232, %233 : vector<8x128xf32>
    %235 = arith.negf %234 : vector<8x128xf32>
    %236 = math.exp %235 : vector<8x128xf32>
    %cst_65 = arith.constant 1.000000e+00 : f32
    %237 = vector.broadcast %cst_65 : f32 to vector<8x128xf32>
    %238 = arith.addf %237, %236 : vector<8x128xf32>
    %239 = arith.divf %237, %238 : vector<8x128xf32>
    %240 = vector.extract_strided_slice %222 {offsets = [0, 256], sizes = [8, 128], strides = [1, 1]} : vector<8x384xf32> to vector<8x128xf32>
    %241 = vector.extract_strided_slice %223 {offsets = [0, 256], sizes = [8, 128], strides = [1, 1]} : vector<8x384xf32> to vector<8x128xf32>
    %242 = arith.addf %241, %5 : vector<8x128xf32>
    %243 = arith.mulf %231, %242 : vector<8x128xf32>
    %244 = arith.addf %240, %243 : vector<8x128xf32>
    %245 = math.tanh %244 : vector<8x128xf32>
    %cst_66 = arith.constant 1.000000e+00 : f32
    %246 = vector.broadcast %cst_66 : f32 to vector<8x128xf32>
    %247 = arith.subf %246, %239 : vector<8x128xf32>
    %248 = arith.mulf %247, %245 : vector<8x128xf32>
    %249 = arith.mulf %239, %220 : vector<8x128xf32>
    %250 = arith.addf %248, %249 : vector<8x128xf32>
    %c56_67 = arith.constant 56 : index
    %c0_68 = arith.constant 0 : index
    %251 = vector.load %arg12[%c56_67, %c0_68] : memref<64x128xf32, #tpu.memory_space<vmem>>, vector<8x128xf32>
    tpu.vector_store %arg12[%c56_67, %c0_68], %250 {strides = array<i32>} : memref<64x128xf32, #tpu.memory_space<vmem>>, vector<8x128xf32>,
    %c0_69 = arith.constant 0 : index
    %c0_70 = arith.constant 0 : index
    %252 = vector.load %arg5[%c0_69, %c0_70] : memref<128x384xf32, #tpu.memory_space<vmem>>, vector<128x384xf32>
    %c0_71 = arith.constant 0 : index
    %c0_72 = arith.constant 0 : index
    %253 = vector.load %arg6[%c0_71, %c0_72] : memref<128x384xf32, #tpu.memory_space<vmem>>, vector<128x384xf32>
    %c0_73 = arith.constant 0 : index
    %c0_74 = arith.constant 0 : index
    %254 = vector.load %arg7[%c0_73, %c0_74] : memref<1x384xf32, #tpu.memory_space<vmem>>, vector<1x384xf32>
    %c0_75 = arith.constant 0 : index
    %c0_76 = arith.constant 0 : index
    %255 = vector.load %arg8[%c0_75, %c0_76] : memref<1x128xf32, #tpu.memory_space<vmem>>, vector<1x128xf32>
    %256 = vector.shape_cast %255 : vector<1x128xf32> to vector<1x128xf32>
    %257 = vector.broadcast %256 : vector<1x128xf32> to vector<8x128xf32>
    %c0_77 = arith.constant 0 : index
    %c0_78 = arith.constant 0 : index
    %258 = vector.load %arg12[%c0_77, %c0_78] : memref<64x128xf32, #tpu.memory_space<vmem>>, vector<64x128xf32>
    %cst_79 = arith.constant dense<0.000000e+00> : vector<64x384xf32>
    %259 = tpu.matmul %258, %252, %cst_79 {dimension_numbers = #tpu.dot_dimension_numbers<[1], [0], [0], [1], [0, 0, 1, 1], [], []>} : vector<64x128xf32>, vector<128x384xf32>, vector<64x384xf32> -> vector<64x384xf32>
    %260 = vector.broadcast %254 : vector<1x384xf32> to vector<64x384xf32>
    %261 = arith.addf %259, %260 : vector<64x384xf32>
    %c0_80 = arith.constant 0 : index
    %c0_81 = arith.constant 0 : index
    %262 = vector.load %arg13[%c0_80, %c0_81] : memref<64x384xf32, #tpu.memory_space<vmem>>, vector<64x384xf32>
    tpu.vector_store %arg13[%c0_80, %c0_81], %261 {strides = array<i32>} : memref<64x384xf32, #tpu.memory_space<vmem>>, vector<64x384xf32>,
    %cst_82 = arith.constant 0.000000e+00 : f32
    %263 = vector.broadcast %cst_82 : f32 to vector<8x128xf32>
    %c0_83 = arith.constant 0 : index
    %c0_84 = arith.constant 0 : index
    %264 = vector.load %arg13[%c0_83, %c0_84] : memref<64x384xf32, #tpu.memory_space<vmem>>, vector<8x384xf32>
    %cst_85 = arith.constant dense<0.000000e+00> : vector<8x384xf32>
    %265 = tpu.matmul %263, %253, %cst_85 {dimension_numbers = #tpu.dot_dimension_numbers<[1], [0], [0], [1], [0, 0, 1, 1], [], []>} : vector<8x128xf32>, vector<128x384xf32>, vector<8x384xf32> -> vector<8x384xf32>
    %266 = vector.extract_strided_slice %264 {offsets = [0, 0], sizes = [8, 128], strides = [1, 1]} : vector<8x384xf32> to vector<8x128xf32>
    %267 = vector.extract_strided_slice %265 {offsets = [0, 0], sizes = [8, 128], strides = [1, 1]} : vector<8x384xf32> to vector<8x128xf32>
    %268 = arith.addf %266, %267 : vector<8x128xf32>
    %269 = arith.negf %268 : vector<8x128xf32>
    %270 = math.exp %269 : vector<8x128xf32>
    %cst_86 = arith.constant 1.000000e+00 : f32
    %271 = vector.broadcast %cst_86 : f32 to vector<8x128xf32>
    %272 = arith.addf %271, %270 : vector<8x128xf32>
    %273 = arith.divf %271, %272 : vector<8x128xf32>
    %274 = vector.extract_strided_slice %264 {offsets = [0, 128], sizes = [8, 128], strides = [1, 1]} : vector<8x384xf32> to vector<8x128xf32>
    %275 = vector.extract_strided_slice %265 {offsets = [0, 128], sizes = [8, 128], strides = [1, 1]} : vector<8x384xf32> to vector<8x128xf32>
    %276 = arith.addf %274, %275 : vector<8x128xf32>
    %277 = arith.negf %276 : vector<8x128xf32>
    %278 = math.exp %277 : vector<8x128xf32>
    %cst_87 = arith.constant 1.000000e+00 : f32
    %279 = vector.broadcast %cst_87 : f32 to vector<8x128xf32>
    %280 = arith.addf %279, %278 : vector<8x128xf32>
    %281 = arith.divf %279, %280 : vector<8x128xf32>
    %282 = vector.extract_strided_slice %264 {offsets = [0, 256], sizes = [8, 128], strides = [1, 1]} : vector<8x384xf32> to vector<8x128xf32>
    %283 = vector.extract_strided_slice %265 {offsets = [0, 256], sizes = [8, 128], strides = [1, 1]} : vector<8x384xf32> to vector<8x128xf32>
    %284 = arith.addf %283, %257 : vector<8x128xf32>
    %285 = arith.mulf %273, %284 : vector<8x128xf32>
    %286 = arith.addf %282, %285 : vector<8x128xf32>
    %287 = math.tanh %286 : vector<8x128xf32>
    %cst_88 = arith.constant 1.000000e+00 : f32
    %288 = vector.broadcast %cst_88 : f32 to vector<8x128xf32>
    %289 = arith.subf %288, %281 : vector<8x128xf32>
    %290 = arith.mulf %289, %287 : vector<8x128xf32>
    %291 = arith.mulf %281, %263 : vector<8x128xf32>
    %292 = arith.addf %290, %291 : vector<8x128xf32>
    %c8_89 = arith.constant 8 : index
    %c0_90 = arith.constant 0 : index
    %293 = vector.load %arg13[%c8_89, %c0_90] : memref<64x384xf32, #tpu.memory_space<vmem>>, vector<8x384xf32>
    %cst_91 = arith.constant dense<0.000000e+00> : vector<8x384xf32>
    %294 = tpu.matmul %292, %253, %cst_91 {dimension_numbers = #tpu.dot_dimension_numbers<[1], [0], [0], [1], [0, 0, 1, 1], [], []>} : vector<8x128xf32>, vector<128x384xf32>, vector<8x384xf32> -> vector<8x384xf32>
    %295 = vector.extract_strided_slice %293 {offsets = [0, 0], sizes = [8, 128], strides = [1, 1]} : vector<8x384xf32> to vector<8x128xf32>
    %296 = vector.extract_strided_slice %294 {offsets = [0, 0], sizes = [8, 128], strides = [1, 1]} : vector<8x384xf32> to vector<8x128xf32>
    %297 = arith.addf %295, %296 : vector<8x128xf32>
    %298 = arith.negf %297 : vector<8x128xf32>
    %299 = math.exp %298 : vector<8x128xf32>
    %cst_92 = arith.constant 1.000000e+00 : f32
    %300 = vector.broadcast %cst_92 : f32 to vector<8x128xf32>
    %301 = arith.addf %300, %299 : vector<8x128xf32>
    %302 = arith.divf %300, %301 : vector<8x128xf32>
    %303 = vector.extract_strided_slice %293 {offsets = [0, 128], sizes = [8, 128], strides = [1, 1]} : vector<8x384xf32> to vector<8x128xf32>
    %304 = vector.extract_strided_slice %294 {offsets = [0, 128], sizes = [8, 128], strides = [1, 1]} : vector<8x384xf32> to vector<8x128xf32>
    %305 = arith.addf %303, %304 : vector<8x128xf32>
    %306 = arith.negf %305 : vector<8x128xf32>
    %307 = math.exp %306 : vector<8x128xf32>
    %cst_93 = arith.constant 1.000000e+00 : f32
    %308 = vector.broadcast %cst_93 : f32 to vector<8x128xf32>
    %309 = arith.addf %308, %307 : vector<8x128xf32>
    %310 = arith.divf %308, %309 : vector<8x128xf32>
    %311 = vector.extract_strided_slice %293 {offsets = [0, 256], sizes = [8, 128], strides = [1, 1]} : vector<8x384xf32> to vector<8x128xf32>
    %312 = vector.extract_strided_slice %294 {offsets = [0, 256], sizes = [8, 128], strides = [1, 1]} : vector<8x384xf32> to vector<8x128xf32>
    %313 = arith.addf %312, %257 : vector<8x128xf32>
    %314 = arith.mulf %302, %313 : vector<8x128xf32>
    %315 = arith.addf %311, %314 : vector<8x128xf32>
    %316 = math.tanh %315 : vector<8x128xf32>
    %cst_94 = arith.constant 1.000000e+00 : f32
    %317 = vector.broadcast %cst_94 : f32 to vector<8x128xf32>
    %318 = arith.subf %317, %310 : vector<8x128xf32>
    %319 = arith.mulf %318, %316 : vector<8x128xf32>
    %320 = arith.mulf %310, %292 : vector<8x128xf32>
    %321 = arith.addf %319, %320 : vector<8x128xf32>
    %c16_95 = arith.constant 16 : index
    %c0_96 = arith.constant 0 : index
    %322 = vector.load %arg13[%c16_95, %c0_96] : memref<64x384xf32, #tpu.memory_space<vmem>>, vector<8x384xf32>
    %cst_97 = arith.constant dense<0.000000e+00> : vector<8x384xf32>
    %323 = tpu.matmul %321, %253, %cst_97 {dimension_numbers = #tpu.dot_dimension_numbers<[1], [0], [0], [1], [0, 0, 1, 1], [], []>} : vector<8x128xf32>, vector<128x384xf32>, vector<8x384xf32> -> vector<8x384xf32>
    %324 = vector.extract_strided_slice %322 {offsets = [0, 0], sizes = [8, 128], strides = [1, 1]} : vector<8x384xf32> to vector<8x128xf32>
    %325 = vector.extract_strided_slice %323 {offsets = [0, 0], sizes = [8, 128], strides = [1, 1]} : vector<8x384xf32> to vector<8x128xf32>
    %326 = arith.addf %324, %325 : vector<8x128xf32>
    %327 = arith.negf %326 : vector<8x128xf32>
    %328 = math.exp %327 : vector<8x128xf32>
    %cst_98 = arith.constant 1.000000e+00 : f32
    %329 = vector.broadcast %cst_98 : f32 to vector<8x128xf32>
    %330 = arith.addf %329, %328 : vector<8x128xf32>
    %331 = arith.divf %329, %330 : vector<8x128xf32>
    %332 = vector.extract_strided_slice %322 {offsets = [0, 128], sizes = [8, 128], strides = [1, 1]} : vector<8x384xf32> to vector<8x128xf32>
    %333 = vector.extract_strided_slice %323 {offsets = [0, 128], sizes = [8, 128], strides = [1, 1]} : vector<8x384xf32> to vector<8x128xf32>
    %334 = arith.addf %332, %333 : vector<8x128xf32>
    %335 = arith.negf %334 : vector<8x128xf32>
    %336 = math.exp %335 : vector<8x128xf32>
    %cst_99 = arith.constant 1.000000e+00 : f32
    %337 = vector.broadcast %cst_99 : f32 to vector<8x128xf32>
    %338 = arith.addf %337, %336 : vector<8x128xf32>
    %339 = arith.divf %337, %338 : vector<8x128xf32>
    %340 = vector.extract_strided_slice %322 {offsets = [0, 256], sizes = [8, 128], strides = [1, 1]} : vector<8x384xf32> to vector<8x128xf32>
    %341 = vector.extract_strided_slice %323 {offsets = [0, 256], sizes = [8, 128], strides = [1, 1]} : vector<8x384xf32> to vector<8x128xf32>
    %342 = arith.addf %341, %257 : vector<8x128xf32>
    %343 = arith.mulf %331, %342 : vector<8x128xf32>
    %344 = arith.addf %340, %343 : vector<8x128xf32>
    %345 = math.tanh %344 : vector<8x128xf32>
    %cst_100 = arith.constant 1.000000e+00 : f32
    %346 = vector.broadcast %cst_100 : f32 to vector<8x128xf32>
    %347 = arith.subf %346, %339 : vector<8x128xf32>
    %348 = arith.mulf %347, %345 : vector<8x128xf32>
    %349 = arith.mulf %339, %321 : vector<8x128xf32>
    %350 = arith.addf %348, %349 : vector<8x128xf32>
    %c24_101 = arith.constant 24 : index
    %c0_102 = arith.constant 0 : index
    %351 = vector.load %arg13[%c24_101, %c0_102] : memref<64x384xf32, #tpu.memory_space<vmem>>, vector<8x384xf32>
    %cst_103 = arith.constant dense<0.000000e+00> : vector<8x384xf32>
    %352 = tpu.matmul %350, %253, %cst_103 {dimension_numbers = #tpu.dot_dimension_numbers<[1], [0], [0], [1], [0, 0, 1, 1], [], []>} : vector<8x128xf32>, vector<128x384xf32>, vector<8x384xf32> -> vector<8x384xf32>
    %353 = vector.extract_strided_slice %351 {offsets = [0, 0], sizes = [8, 128], strides = [1, 1]} : vector<8x384xf32> to vector<8x128xf32>
    %354 = vector.extract_strided_slice %352 {offsets = [0, 0], sizes = [8, 128], strides = [1, 1]} : vector<8x384xf32> to vector<8x128xf32>
    %355 = arith.addf %353, %354 : vector<8x128xf32>
    %356 = arith.negf %355 : vector<8x128xf32>
    %357 = math.exp %356 : vector<8x128xf32>
    %cst_104 = arith.constant 1.000000e+00 : f32
    %358 = vector.broadcast %cst_104 : f32 to vector<8x128xf32>
    %359 = arith.addf %358, %357 : vector<8x128xf32>
    %360 = arith.divf %358, %359 : vector<8x128xf32>
    %361 = vector.extract_strided_slice %351 {offsets = [0, 128], sizes = [8, 128], strides = [1, 1]} : vector<8x384xf32> to vector<8x128xf32>
    %362 = vector.extract_strided_slice %352 {offsets = [0, 128], sizes = [8, 128], strides = [1, 1]} : vector<8x384xf32> to vector<8x128xf32>
    %363 = arith.addf %361, %362 : vector<8x128xf32>
    %364 = arith.negf %363 : vector<8x128xf32>
    %365 = math.exp %364 : vector<8x128xf32>
    %cst_105 = arith.constant 1.000000e+00 : f32
    %366 = vector.broadcast %cst_105 : f32 to vector<8x128xf32>
    %367 = arith.addf %366, %365 : vector<8x128xf32>
    %368 = arith.divf %366, %367 : vector<8x128xf32>
    %369 = vector.extract_strided_slice %351 {offsets = [0, 256], sizes = [8, 128], strides = [1, 1]} : vector<8x384xf32> to vector<8x128xf32>
    %370 = vector.extract_strided_slice %352 {offsets = [0, 256], sizes = [8, 128], strides = [1, 1]} : vector<8x384xf32> to vector<8x128xf32>
    %371 = arith.addf %370, %257 : vector<8x128xf32>
    %372 = arith.mulf %360, %371 : vector<8x128xf32>
    %373 = arith.addf %369, %372 : vector<8x128xf32>
    %374 = math.tanh %373 : vector<8x128xf32>
    %cst_106 = arith.constant 1.000000e+00 : f32
    %375 = vector.broadcast %cst_106 : f32 to vector<8x128xf32>
    %376 = arith.subf %375, %368 : vector<8x128xf32>
    %377 = arith.mulf %376, %374 : vector<8x128xf32>
    %378 = arith.mulf %368, %350 : vector<8x128xf32>
    %379 = arith.addf %377, %378 : vector<8x128xf32>
    %c32_107 = arith.constant 32 : index
    %c0_108 = arith.constant 0 : index
    %380 = vector.load %arg13[%c32_107, %c0_108] : memref<64x384xf32, #tpu.memory_space<vmem>>, vector<8x384xf32>
    %cst_109 = arith.constant dense<0.000000e+00> : vector<8x384xf32>
    %381 = tpu.matmul %379, %253, %cst_109 {dimension_numbers = #tpu.dot_dimension_numbers<[1], [0], [0], [1], [0, 0, 1, 1], [], []>} : vector<8x128xf32>, vector<128x384xf32>, vector<8x384xf32> -> vector<8x384xf32>
    %382 = vector.extract_strided_slice %380 {offsets = [0, 0], sizes = [8, 128], strides = [1, 1]} : vector<8x384xf32> to vector<8x128xf32>
    %383 = vector.extract_strided_slice %381 {offsets = [0, 0], sizes = [8, 128], strides = [1, 1]} : vector<8x384xf32> to vector<8x128xf32>
    %384 = arith.addf %382, %383 : vector<8x128xf32>
    %385 = arith.negf %384 : vector<8x128xf32>
    %386 = math.exp %385 : vector<8x128xf32>
    %cst_110 = arith.constant 1.000000e+00 : f32
    %387 = vector.broadcast %cst_110 : f32 to vector<8x128xf32>
    %388 = arith.addf %387, %386 : vector<8x128xf32>
    %389 = arith.divf %387, %388 : vector<8x128xf32>
    %390 = vector.extract_strided_slice %380 {offsets = [0, 128], sizes = [8, 128], strides = [1, 1]} : vector<8x384xf32> to vector<8x128xf32>
    %391 = vector.extract_strided_slice %381 {offsets = [0, 128], sizes = [8, 128], strides = [1, 1]} : vector<8x384xf32> to vector<8x128xf32>
    %392 = arith.addf %390, %391 : vector<8x128xf32>
    %393 = arith.negf %392 : vector<8x128xf32>
    %394 = math.exp %393 : vector<8x128xf32>
    %cst_111 = arith.constant 1.000000e+00 : f32
    %395 = vector.broadcast %cst_111 : f32 to vector<8x128xf32>
    %396 = arith.addf %395, %394 : vector<8x128xf32>
    %397 = arith.divf %395, %396 : vector<8x128xf32>
    %398 = vector.extract_strided_slice %380 {offsets = [0, 256], sizes = [8, 128], strides = [1, 1]} : vector<8x384xf32> to vector<8x128xf32>
    %399 = vector.extract_strided_slice %381 {offsets = [0, 256], sizes = [8, 128], strides = [1, 1]} : vector<8x384xf32> to vector<8x128xf32>
    %400 = arith.addf %399, %257 : vector<8x128xf32>
    %401 = arith.mulf %389, %400 : vector<8x128xf32>
    %402 = arith.addf %398, %401 : vector<8x128xf32>
    %403 = math.tanh %402 : vector<8x128xf32>
    %cst_112 = arith.constant 1.000000e+00 : f32
    %404 = vector.broadcast %cst_112 : f32 to vector<8x128xf32>
    %405 = arith.subf %404, %397 : vector<8x128xf32>
    %406 = arith.mulf %405, %403 : vector<8x128xf32>
    %407 = arith.mulf %397, %379 : vector<8x128xf32>
    %408 = arith.addf %406, %407 : vector<8x128xf32>
    %c40_113 = arith.constant 40 : index
    %c0_114 = arith.constant 0 : index
    %409 = vector.load %arg13[%c40_113, %c0_114] : memref<64x384xf32, #tpu.memory_space<vmem>>, vector<8x384xf32>
    %cst_115 = arith.constant dense<0.000000e+00> : vector<8x384xf32>
    %410 = tpu.matmul %408, %253, %cst_115 {dimension_numbers = #tpu.dot_dimension_numbers<[1], [0], [0], [1], [0, 0, 1, 1], [], []>} : vector<8x128xf32>, vector<128x384xf32>, vector<8x384xf32> -> vector<8x384xf32>
    %411 = vector.extract_strided_slice %409 {offsets = [0, 0], sizes = [8, 128], strides = [1, 1]} : vector<8x384xf32> to vector<8x128xf32>
    %412 = vector.extract_strided_slice %410 {offsets = [0, 0], sizes = [8, 128], strides = [1, 1]} : vector<8x384xf32> to vector<8x128xf32>
    %413 = arith.addf %411, %412 : vector<8x128xf32>
    %414 = arith.negf %413 : vector<8x128xf32>
    %415 = math.exp %414 : vector<8x128xf32>
    %cst_116 = arith.constant 1.000000e+00 : f32
    %416 = vector.broadcast %cst_116 : f32 to vector<8x128xf32>
    %417 = arith.addf %416, %415 : vector<8x128xf32>
    %418 = arith.divf %416, %417 : vector<8x128xf32>
    %419 = vector.extract_strided_slice %409 {offsets = [0, 128], sizes = [8, 128], strides = [1, 1]} : vector<8x384xf32> to vector<8x128xf32>
    %420 = vector.extract_strided_slice %410 {offsets = [0, 128], sizes = [8, 128], strides = [1, 1]} : vector<8x384xf32> to vector<8x128xf32>
    %421 = arith.addf %419, %420 : vector<8x128xf32>
    %422 = arith.negf %421 : vector<8x128xf32>
    %423 = math.exp %422 : vector<8x128xf32>
    %cst_117 = arith.constant 1.000000e+00 : f32
    %424 = vector.broadcast %cst_117 : f32 to vector<8x128xf32>
    %425 = arith.addf %424, %423 : vector<8x128xf32>
    %426 = arith.divf %424, %425 : vector<8x128xf32>
    %427 = vector.extract_strided_slice %409 {offsets = [0, 256], sizes = [8, 128], strides = [1, 1]} : vector<8x384xf32> to vector<8x128xf32>
    %428 = vector.extract_strided_slice %410 {offsets = [0, 256], sizes = [8, 128], strides = [1, 1]} : vector<8x384xf32> to vector<8x128xf32>
    %429 = arith.addf %428, %257 : vector<8x128xf32>
    %430 = arith.mulf %418, %429 : vector<8x128xf32>
    %431 = arith.addf %427, %430 : vector<8x128xf32>
    %432 = math.tanh %431 : vector<8x128xf32>
    %cst_118 = arith.constant 1.000000e+00 : f32
    %433 = vector.broadcast %cst_118 : f32 to vector<8x128xf32>
    %434 = arith.subf %433, %426 : vector<8x128xf32>
    %435 = arith.mulf %434, %432 : vector<8x128xf32>
    %436 = arith.mulf %426, %408 : vector<8x128xf32>
    %437 = arith.addf %435, %436 : vector<8x128xf32>
    %c48_119 = arith.constant 48 : index
    %c0_120 = arith.constant 0 : index
    %438 = vector.load %arg13[%c48_119, %c0_120] : memref<64x384xf32, #tpu.memory_space<vmem>>, vector<8x384xf32>
    %cst_121 = arith.constant dense<0.000000e+00> : vector<8x384xf32>
    %439 = tpu.matmul %437, %253, %cst_121 {dimension_numbers = #tpu.dot_dimension_numbers<[1], [0], [0], [1], [0, 0, 1, 1], [], []>} : vector<8x128xf32>, vector<128x384xf32>, vector<8x384xf32> -> vector<8x384xf32>
    %440 = vector.extract_strided_slice %438 {offsets = [0, 0], sizes = [8, 128], strides = [1, 1]} : vector<8x384xf32> to vector<8x128xf32>
    %441 = vector.extract_strided_slice %439 {offsets = [0, 0], sizes = [8, 128], strides = [1, 1]} : vector<8x384xf32> to vector<8x128xf32>
    %442 = arith.addf %440, %441 : vector<8x128xf32>
    %443 = arith.negf %442 : vector<8x128xf32>
    %444 = math.exp %443 : vector<8x128xf32>
    %cst_122 = arith.constant 1.000000e+00 : f32
    %445 = vector.broadcast %cst_122 : f32 to vector<8x128xf32>
    %446 = arith.addf %445, %444 : vector<8x128xf32>
    %447 = arith.divf %445, %446 : vector<8x128xf32>
    %448 = vector.extract_strided_slice %438 {offsets = [0, 128], sizes = [8, 128], strides = [1, 1]} : vector<8x384xf32> to vector<8x128xf32>
    %449 = vector.extract_strided_slice %439 {offsets = [0, 128], sizes = [8, 128], strides = [1, 1]} : vector<8x384xf32> to vector<8x128xf32>
    %450 = arith.addf %448, %449 : vector<8x128xf32>
    %451 = arith.negf %450 : vector<8x128xf32>
    %452 = math.exp %451 : vector<8x128xf32>
    %cst_123 = arith.constant 1.000000e+00 : f32
    %453 = vector.broadcast %cst_123 : f32 to vector<8x128xf32>
    %454 = arith.addf %453, %452 : vector<8x128xf32>
    %455 = arith.divf %453, %454 : vector<8x128xf32>
    %456 = vector.extract_strided_slice %438 {offsets = [0, 256], sizes = [8, 128], strides = [1, 1]} : vector<8x384xf32> to vector<8x128xf32>
    %457 = vector.extract_strided_slice %439 {offsets = [0, 256], sizes = [8, 128], strides = [1, 1]} : vector<8x384xf32> to vector<8x128xf32>
    %458 = arith.addf %457, %257 : vector<8x128xf32>
    %459 = arith.mulf %447, %458 : vector<8x128xf32>
    %460 = arith.addf %456, %459 : vector<8x128xf32>
    %461 = math.tanh %460 : vector<8x128xf32>
    %cst_124 = arith.constant 1.000000e+00 : f32
    %462 = vector.broadcast %cst_124 : f32 to vector<8x128xf32>
    %463 = arith.subf %462, %455 : vector<8x128xf32>
    %464 = arith.mulf %463, %461 : vector<8x128xf32>
    %465 = arith.mulf %455, %437 : vector<8x128xf32>
    %466 = arith.addf %464, %465 : vector<8x128xf32>
    %c56_125 = arith.constant 56 : index
    %c0_126 = arith.constant 0 : index
    %467 = vector.load %arg13[%c56_125, %c0_126] : memref<64x384xf32, #tpu.memory_space<vmem>>, vector<8x384xf32>
    %cst_127 = arith.constant dense<0.000000e+00> : vector<8x384xf32>
    %468 = tpu.matmul %466, %253, %cst_127 {dimension_numbers = #tpu.dot_dimension_numbers<[1], [0], [0], [1], [0, 0, 1, 1], [], []>} : vector<8x128xf32>, vector<128x384xf32>, vector<8x384xf32> -> vector<8x384xf32>
    %469 = vector.extract_strided_slice %467 {offsets = [0, 0], sizes = [8, 128], strides = [1, 1]} : vector<8x384xf32> to vector<8x128xf32>
    %470 = vector.extract_strided_slice %468 {offsets = [0, 0], sizes = [8, 128], strides = [1, 1]} : vector<8x384xf32> to vector<8x128xf32>
    %471 = arith.addf %469, %470 : vector<8x128xf32>
    %472 = arith.negf %471 : vector<8x128xf32>
    %473 = math.exp %472 : vector<8x128xf32>
    %cst_128 = arith.constant 1.000000e+00 : f32
    %474 = vector.broadcast %cst_128 : f32 to vector<8x128xf32>
    %475 = arith.addf %474, %473 : vector<8x128xf32>
    %476 = arith.divf %474, %475 : vector<8x128xf32>
    %477 = vector.extract_strided_slice %467 {offsets = [0, 128], sizes = [8, 128], strides = [1, 1]} : vector<8x384xf32> to vector<8x128xf32>
    %478 = vector.extract_strided_slice %468 {offsets = [0, 128], sizes = [8, 128], strides = [1, 1]} : vector<8x384xf32> to vector<8x128xf32>
    %479 = arith.addf %477, %478 : vector<8x128xf32>
    %480 = arith.negf %479 : vector<8x128xf32>
    %481 = math.exp %480 : vector<8x128xf32>
    %cst_129 = arith.constant 1.000000e+00 : f32
    %482 = vector.broadcast %cst_129 : f32 to vector<8x128xf32>
    %483 = arith.addf %482, %481 : vector<8x128xf32>
    %484 = arith.divf %482, %483 : vector<8x128xf32>
    %485 = vector.extract_strided_slice %467 {offsets = [0, 256], sizes = [8, 128], strides = [1, 1]} : vector<8x384xf32> to vector<8x128xf32>
    %486 = vector.extract_strided_slice %468 {offsets = [0, 256], sizes = [8, 128], strides = [1, 1]} : vector<8x384xf32> to vector<8x128xf32>
    %487 = arith.addf %486, %257 : vector<8x128xf32>
    %488 = arith.mulf %476, %487 : vector<8x128xf32>
    %489 = arith.addf %485, %488 : vector<8x128xf32>
    %490 = math.tanh %489 : vector<8x128xf32>
    %cst_130 = arith.constant 1.000000e+00 : f32
    %491 = vector.broadcast %cst_130 : f32 to vector<8x128xf32>
    %492 = arith.subf %491, %484 : vector<8x128xf32>
    %493 = arith.mulf %492, %490 : vector<8x128xf32>
    %494 = arith.mulf %484, %466 : vector<8x128xf32>
    %495 = arith.addf %493, %494 : vector<8x128xf32>
    %c0_131 = arith.constant 0 : index
    %c0_132 = arith.constant 0 : index
    %496 = vector.load %arg9[%c0_131, %c0_132] : memref<128x128xf32, #tpu.memory_space<vmem>>, vector<128x128xf32>
    %cst_133 = arith.constant dense<0.000000e+00> : vector<8x128xf32>
    %497 = tpu.matmul %495, %496, %cst_133 {dimension_numbers = #tpu.dot_dimension_numbers<[1], [0], [0], [1], [0, 0, 1, 1], [], []>} : vector<8x128xf32>, vector<128x128xf32>, vector<8x128xf32> -> vector<8x128xf32>
    %c0_134 = arith.constant 0 : index
    %c0_135 = arith.constant 0 : index
    %498 = vector.load %arg10[%c0_134, %c0_135] : memref<1x128xf32, #tpu.memory_space<vmem>>, vector<1x128xf32>
    %499 = vector.broadcast %498 : vector<1x128xf32> to vector<8x128xf32>
    %500 = arith.addf %497, %499 : vector<8x128xf32>
    %c0_136 = arith.constant 0 : index
    %c0_137 = arith.constant 0 : index
    %501 = vector.load %arg11[%c0_136, %c0_137] : memref<8x128xf32, #tpu.memory_space<vmem>>, vector<8x128xf32>
    tpu.vector_store %arg11[%c0_136, %c0_137], %500 {strides = array<i32>} : memref<8x128xf32, #tpu.memory_space<vmem>>, vector<8x128xf32>,
    return
  }
}

</mosaic_0001>

<bundles_post_ra>
// kernel: simple_gru_forward.1
= control target key start
LH: loop header
LB: loop body
LE: loop exit
PB: predicated region body
PF: predicated region fallthrough
CT: control target
= control target key end

     0   :  { %16 = vsyncpa [#allocation5], 0  ;;  %s7049_s0 = inlined_call_operand.vmem [shape: f32[64,16], index: 0, kind: input, shape index: {}]   ;;  %s7050_s1 = inlined_call_operand.vmem [shape: f32[16,384], index: 1, kind: input, shape index: {}]   ;;  %s7051_s2 = inlined_call_operand.hbm [shape: f32[128,384], index: 2, kind: input, shape index: {}]   ;;  %s7052_s3 = inlined_call_operand.vmem [shape: f32[1,384], index: 3, kind: input, shape index: {}]   ;;  %s7053_s4 = inlined_call_operand.vmem [shape: f32[1,128], index: 4, kind: input, shape index: {}]   ;;  %s7054_s5 = inlined_call_operand.hbm [shape: f32[128,384], index: 5, kind: input, shape index: {}]   ;;  %s7055_s6 = inlined_call_operand.hbm [shape: f32[128,384], index: 6, kind: input, shape index: {}]   ;;  %s7056_s7 = inlined_call_operand.vmem [shape: f32[1,384], index: 7, kind: input, shape index: {}]   ;;  %s7057_s8 = inlined_call_operand.vmem [shape: f32[1,128], index: 8, kind: input, shape index: {}]   ;;  %s7058_s9 = inlined_call_operand.hbm [shape: f32[128,128], index: 9, kind: input, shape index: {}]   ;;  %s7059_s10 = inlined_call_operand.vmem [shape: f32[1,128], index: 10, kind: input, shape index: {}]   ;;  %s7060_s11 = inlined_call_operand.vmem [shape: f32[8,128], index: 11, kind: output, shape index: {}]  }
   0x1   :  { %17 = vsyncpa [#allocation7], 0 }
   0x2   :  { %18 = vsyncpa [#allocation10], 0  ;;  %s5932_s17 = smov [#allocation6]   ;;  %s5933_s19 = smov [#allocation4]  }
   0x3   :  { %s44_s18 = sshll.u32 %s5932_s17, 4  ;;  %s28_s20 = sshll.u32 %s5933_s19, 4  ;;  %s45_s18 = int_to_ptr.vmem [resolvable:$true] %s44_s18  ;;  %s6003_s20 = int_to_ptr.vmem [resolvable:$true] %s28_s20 }
   0x4   :  { %s5838_s23 = scalar_lea.hbm %s7054_s5, 6144 }
   0x5   :  { %p5839_p0 = scmp.ne.s32.totalorder %s7054_s5, %s5838_s23  ;;  %p5842_p1 = scmp.lt.u32.totalorder %s5838_s23, %s7054_s5 }
   0x7   :  { %p5844_p2 = pnand %p5842_p1, %p5839_p0 }
   0x9   :  { %5847 = shalt.err (!%p5844_p2)
}
   0xa   :  { %s5848_s28 = scalar_lea.vmem %s45_s18, 6144  ;;  %p5853_p4 = scmp.lt.s32.totalorder %s45_s18, %s45_s18 }
   0xb   :  { %p5849_p3 = scmp.ne.s32.totalorder %s45_s18, %s5848_s28  ;;  %p5854_p5 = scmp.lt.s32.totalorder %s5848_s28, %s5848_s28 }
   0xd   :  { %p5855_p6 = por %p5854_p5, %p5853_p4 }
   0xf   :  { %p5856_p7 = pnand %p5855_p6, %p5849_p3 }
  0x11   :  { %5859 = shalt.err (!%p5856_p7)
}
  0x12   :  { %s5934_s29 = smov 384   ;;  %s5935_s30 = smov 24  }
  0x13   :  { %50 = dma.hbm_to_vmem [thread:$0]  %s7054_s5, 6144, %s45_s18, [#allocation7], %s5934_s29, %s5934_s29, %s5935_s30  }
  0x14   :  { %s5860_s16 = scalar_lea.hbm %s7051_s2, 6144 }
  0x15   :  { %p5861_p8 = scmp.ne.s32.totalorder %s7051_s2, %s5860_s16  ;;  %p5864_p9 = scmp.lt.u32.totalorder %s5860_s16, %s7051_s2 }
  0x17   :  { %p5866_p10 = pnand %p5864_p9, %p5861_p8 }
  0x19   :  { %5869 = shalt.err (!%p5866_p10)
}
  0x1a   :  { %s5870_s23 = scalar_lea.vmem %s6003_s20, 6144  ;;  %p5875_p12 = scmp.lt.s32.totalorder %s6003_s20, %s6003_s20 }
  0x1b   :  { %p5871_p11 = scmp.ne.s32.totalorder %s6003_s20, %s5870_s23  ;;  %p5876_p13 = scmp.lt.s32.totalorder %s5870_s23, %s5870_s23 }
  0x1d   :  { %p5877_p0 = por %p5876_p13, %p5875_p12 }
  0x1f   :  { %p5878_p1 = pnand %p5877_p0, %p5871_p11 }
  0x21   :  { %5881 = shalt.err (!%p5878_p1)
}
  0x22   :  { %34 = dma.hbm_to_vmem [thread:$0]  %s7051_s2, 6144, %s6003_s20, [#allocation5], %s5934_s29, %s5934_s29, %s5935_s30  }
  0x23   :  { %s5936_s24 = smov [#allocation8]   ;;  %s5937_s26 = smov [#allocation9]  }
  0x24   :  { %s56_s25 = sshll.u32 %s5936_s24, 4  ;;  %s72_s27 = sshll.u32 %s5937_s26, 4  ;;  %s57_s25 = int_to_ptr.vmem [resolvable:$true] %s56_s25  ;;  %s6040_s27 = int_to_ptr.vmem [resolvable:$true] %s72_s27 }
  0x25   :  { %s5882_s13 = scalar_lea.hbm %s7055_s6, 6144 }
  0x26   :  { %p5883_p2 = scmp.ne.s32.totalorder %s7055_s6, %s5882_s13  ;;  %p5886_p3 = scmp.lt.u32.totalorder %s5882_s13, %s7055_s6 }
  0x28   :  { %p5888_p4 = pnand %p5886_p3, %p5883_p2 }
  0x2a   :  { %5891 = shalt.err (!%p5888_p4)
}
  0x2b   :  { %s5892_s2 = scalar_lea.vmem %s57_s25, 6144  ;;  %p5897_p6 = scmp.lt.s32.totalorder %s57_s25, %s57_s25 }
  0x2c   :  { %p5893_p5 = scmp.ne.s32.totalorder %s57_s25, %s5892_s2  ;;  %p5898_p7 = scmp.lt.s32.totalorder %s5892_s2, %s5892_s2 }
  0x2e   :  { %p5899_p8 = por %p5898_p7, %p5897_p6 }
  0x30   :  { %p5900_p9 = pnand %p5899_p8, %p5893_p5 }
  0x32   :  { %5903 = shalt.err (!%p5900_p9)
}
  0x33   :  { %62 = dma.hbm_to_vmem [thread:$0]  %s7055_s6, 6144, %s57_s25, [#allocation7], %s5934_s29, %s5934_s29, %s5935_s30  }
  0x34   :  { %s5904_s23 = scalar_lea.hbm %s7058_s9, 2048 }
  0x35   :  { %p5905_p10 = scmp.ne.s32.totalorder %s7058_s9, %s5904_s23  ;;  %p5908_p11 = scmp.lt.u32.totalorder %s5904_s23, %s7058_s9 }
  0x37   :  { %p5910_p12 = pnand %p5908_p11, %p5905_p10 }
  0x39   :  { %5913 = shalt.err (!%p5910_p12)
}
  0x3a   :  { %s5914_s28 = scalar_lea.vmem %s6040_s27, 2048  ;;  %p5919_p0 = scmp.lt.s32.totalorder %s6040_s27, %s6040_s27 }
  0x3b   :  { %p5915_p13 = scmp.ne.s32.totalorder %s6040_s27, %s5914_s28  ;;  %p5920_p1 = scmp.lt.s32.totalorder %s5914_s28, %s5914_s28 }
  0x3d   :  { %p5921_p2 = por %p5920_p1, %p5919_p0 }
  0x3f   :  { %p5922_p3 = pnand %p5921_p2, %p5915_p13 }
  0x41   :  { %5925 = shalt.err (!%p5922_p3)
}
  0x42   :  { %s5938_s6 = smov 128   ;;  %s5939_s29 = smov 8  }
  0x43   :  { %78 = dma.hbm_to_vmem [thread:$0]  %s7058_s9, 2048, %s6040_s27, [#allocation10], %s5938_s6, %s5938_s6, %s5939_s29  }
  0x44   :  { %5926 = dma.done.wait [#allocation5], 6144  }
  0x45   :  { %5927 = vsyncadd [#allocation5], 4294961152 }
  0x46   :  { %5928 = dma.done.wait [#allocation7], 12288  }
  0x47   :  { %5929 = vsyncadd [#allocation7], 4294955008 }
  0x48   :  { %5930 = dma.done.wait [#allocation10], 2048  }
  0x49   :  { %5931 = vsyncadd [#allocation10], 4294965248  ;;  %v5940_v0 = vmov 0.0   ;;  %v94_v1 = vld [vmem:[%s7050_s1 + $0x8] sm:$0xff]  ;;  %v97_v2 = vld [vmem:[%s7050_s1 + $0x20] sm:$0xff]  ;;  %vm179_vm0 = vcmask 130048  }
  0x4a   :  { %268 = vmatprep.mubr.f32.mxu0 %v5940_v0  ;;  %v93_v3 = vld [vmem:[%s7050_s1] sm:$0xff]  ;;  %v4610_v4 = vpack.c.bf16 %v97_v2, %v94_v1  ;;  %v96_v5 = vld [vmem:[%s7050_s1 + $0x18] sm:$0xff]  ;;  %v100_v7 = vld [vmem:[#allocation4 + $0x8] sm:$0xff]  ;;  %v5941_v48 = vmov 0.0|0.0   ;;  %vm5942_vm1 = vmmov 0  }
  0x4b   :  { %v155_v6 = vld [vmem:[%s7049_s0] sm:$0xff]  ;;  %v4612_v8 = vpack.c.bf16 %v96_v5, %v93_v3  ;;  %v102_v11 = vld [vmem:[#allocation4 + $0x18] sm:$0xff]  ;;  %v109_v14 = vld [vmem:[#allocation4 + $0x50] sm:$0xff] }
  0x4c   :  { %v103_v9 = vld [vmem:[#allocation4 + $0x20] sm:$0xff]  ;;  %3959 = vmatprep.mubr.msk.f32.mxu1 %vm179_vm0, %v155_v6  ;;  %4611 = vmatprep.subr.bf16.mxu0 %v4610_v4  ;;  %v106_v13 = vld [vmem:[#allocation4 + $0x38] sm:$0xff]  ;;  %v105_v17 = vld [vmem:[#allocation4 + $0x30] sm:$0xff] }
  0x4d   :  { %v99_v10 = vld [vmem:[#allocation4] sm:$0xff]  ;;  %v6091_v12 = vpack.c.bf16 %v103_v9, %v100_v7  ;;  %4613 = vmatpush1.bf16.msra.mxu0 %v4612_v8  ;;  %v6096_v16 = vpack.c.bf16 %v109_v14, %v106_v13  ;;  %v108_v18 = vld [vmem:[#allocation4 + $0x48] sm:$0xff]  ;;  %v114_v25 = vld [vmem:[#allocation4 + $0x78] sm:$0xff] }
  0x4e   :  { %v6093_v15 = vpack.c.bf16 %v102_v11, %v99_v10  ;;  %v112_v19 = vld [vmem:[#allocation4 + $0x68] sm:$0xff]  ;;  %v115_v20 = vld [vmem:[#allocation4 + $0x80] sm:$0xff]  ;;  %v6104_v22 = vpack.c.bf16 %v108_v18, %v105_v17  ;;  %v118_v26 = vld [vmem:[#allocation4 + $0x98] sm:$0xff] }
  0x4f   :  { %4619 = vmatprep.subr.bf16.mxu0 %v6091_v12  ;;  %v156_v21 = vld [vmem:[%s7049_s0 + $0x8] sm:$0xff]  ;;  %v6107_v23 = vpack.c.bf16 %v115_v20, %v112_v19  ;;  %v111_v24 = vld [vmem:[#allocation4 + $0x60] sm:$0xff]  ;;  %v121_v27 = vld [vmem:[#allocation4 + $0xb0] sm:$0xff] }
  0x50   :  { %3582 = vmatmul.mubr.msk.f32.vlgmr.msra.gmra.mrb[0].mxu0 %vm179_vm0, %v155_v6  ;;  %v95_v28 = vld [vmem:[%s7050_s1 + $0x10] sm:$0xff]  ;;  %v98_v29 = vld [vmem:[%s7050_s1 + $0x28] sm:$0xff]  ;;  %v6121_v31 = vpack.c.bf16 %v114_v25, %v111_v24  ;;  %v6124_v33 = vpack.c.bf16 %v121_v27, %v118_v26  ;;  %v127_v38 = vld [vmem:[#allocation4 + $0xe0] sm:$0xff] }
  0x51   :  { %4621 = vmatpush1.bf16.msra.mxu0 %v6093_v15  ;;  %274 = vmatprep.mubr.f32.mxu0 %v5940_v0  ;;  %v157_v30 = vld [vmem:[%s7049_s0 + $0x10] sm:$0xff]  ;;  %v4614_v32 = vpack.c.bf16 %v98_v29, %v95_v28  ;;  %v120_v35 = vld [vmem:[#allocation4 + $0xa8] sm:$0xff]  ;;  %v158_v41 = vld [vmem:[%s7049_s0 + $0x18] sm:$0xff] }
  0x52   :  { %4623 = vmatprep.subr.bf16.mxu0 %v6096_v16  ;;  %v117_v34 = vld [vmem:[#allocation4 + $0x90] sm:$0xff]  ;;  %v124_v37 = vld [vmem:[#allocation4 + $0xc8] sm:$0xff]  ;;  %v107_v43 = vld [vmem:[#allocation4 + $0x40] sm:$0xff] }
  0x53   :  { %v101_v36 = vld [vmem:[#allocation4 + $0x10] sm:$0xff]  ;;  %4615 = vmatprep.subr.bf16.mxu1 %v4614_v32  ;;  %v104_v39 = vld [vmem:[#allocation4 + $0x28] sm:$0xff]  ;;  %v6134_v42 = vpack.c.bf16 %v120_v35, %v117_v34  ;;  %v110_v44 = vld [vmem:[#allocation4 + $0x58] sm:$0xff]  ;;  %v6137_v45 = vpack.c.bf16 %v127_v38, %v124_v37  ;;  %v164_v35 = vlaneseq }
  0x54   :  { %3583 = vmatmul.mubr.msk.f32.gmra.mrb[2].mxu0 %vm179_vm0, %v156_v21  ;;  %4617 = vmatpush3.bf16.msra.mxu1 %v4614_v32  ;;  %v6127_v40 = vpack.c.bf16 %v104_v39, %v101_v36  ;;  %v123_v46 = vld [vmem:[#allocation4 + $0xc0] sm:$0xff]  ;;  %v126_v47 = vld [vmem:[#allocation4 + $0xd8] sm:$0xff]  ;;  %v133_v50 = vld [vmem:[#allocation4 + $0x110] sm:$0xff]  ;;  %v6143_v51 = vpack.c.bf16 %v110_v44, %v107_v43 }
  0x55   :  { %4625 = vmatpush1.bf16.msra.mxu0 %v6104_v22  ;;  %280 = vmatprep.mubr.f32.mxu0 %v5940_v0  ;;  %v130_v49 = vld [vmem:[#allocation4 + $0xf8] sm:$0xff]  ;;  %v159_v52 = vld [vmem:[%s7049_s0 + $0x20] sm:$0xff]  ;;  %v6150_v53 = vpack.c.bf16 %v126_v47, %v123_v46  ;;  %v113_v54 = vld [vmem:[#allocation4 + $0x70] sm:$0xff]  ;;  %v6262_v36 = vshrl.u32 %v164_v35, 7 }
  0x56   :  { %4627 = vmatprep.subr.bf16.mxu0 %v6107_v23  ;;  %4650 = vmatprep.subr.bf16.mxu1 %v5941_v48  ;;  %v116_v55 = vld [vmem:[#allocation4 + $0x88] sm:$0xff]  ;;  %v6153_v56 = vpack.c.bf16 %v133_v50, %v130_v49  ;;  %v129_v57 = vld [vmem:[#allocation4 + $0xf0] sm:$0xff]  ;;  %v139_v60 = vld [vmem:[#allocation4 + $0x140] sm:$0xff] }
  0x57   :  { %3960 = vmatmul.mubr.msk.f32.vlgmr.msra.gmra.mrb[0].mxu1 %vm179_vm0, %v156_v21  ;;  %v132_v58 = vld [vmem:[#allocation4 + $0x108] sm:$0xff]  ;;  %v6159_v61 = vpack.c.bf16 %v116_v55, %v113_v54  ;;  %v119_v1 = vld [vmem:[#allocation4 + $0xa0] sm:$0xff]  ;;  %v122_v2 = vld [vmem:[#allocation4 + $0xb8] sm:$0xff]  ;;  %v174_v37 = vsub.s32 2, %v6262_v36  ;;  %v170_v55 = vsub.s32 1, %v6262_v36 }
  0x58   :  { %3584 = vmatmul.mubr.msk.f32.gmra.mrb[4].mxu0 %vm179_vm0, %v157_v30  ;;  %4652 = vmatpush3.bf16.msra.mxu1 %v6127_v40  ;;  %v136_v59 = vld [vmem:[#allocation4 + $0x128] sm:$0xff]  ;;  %v6166_v63 = vpack.c.bf16 %v132_v58, %v129_v57  ;;  %v135_v4 = vld [vmem:[#allocation4 + $0x120] sm:$0xff]  ;;  %v138_v5 = vld [vmem:[#allocation4 + $0x138] sm:$0xff]  ;;  %v6175_v8 = vpack.c.bf16 %v122_v2, %v119_v1 }
  0x59   :  { %4629 = vmatpush1.bf16.msra.mxu0 %v6121_v31  ;;  %286 = vmatprep.mubr.f32.mxu0 %v5940_v0  ;;  %v160_v62 = vld [vmem:[%s7049_s0 + $0x28] sm:$0xff]  ;;  %v6169_v3 = vpack.c.bf16 %v139_v60, %v136_v59  ;;  %v142_v6 = vld [vmem:[#allocation4 + $0x158] sm:$0xff]  ;;  %v145_v7 = vld [vmem:[#allocation4 + $0x170] sm:$0xff]  ;;  %v6182_v10 = vpack.c.bf16 %v138_v5, %v135_v4 }
  0x5a   :  { %4631 = vmatprep.subr.bf16.mxu0 %v6124_v33  ;;  %4653 = vmatprep.subr.bf16.mxu1 %v5941_v48  ;;  %v161_v9 = vld [vmem:[%s7049_s0 + $0x30] sm:$0xff]  ;;  %v128_v13 = vld [vmem:[#allocation4 + $0xe8] sm:$0xff]  ;;  %v6185_v14 = vpack.c.bf16 %v145_v7, %v142_v6  ;;  %v162_v20 = vld [vmem:[%s7049_s0 + $0x38] sm:$0xff] }
  0x5b   :  { %3962 = vmatprep.mubr.msk.f32.mxu1 %vm179_vm0, %v157_v30  ;;  %v125_v11 = vld [vmem:[#allocation4 + $0xd0] sm:$0xff]  ;;  %v144_v18 = vld [vmem:[#allocation4 + $0x168] sm:$0xff]  ;;  %v131_v24 = vld [vmem:[#allocation4 + $0x100] sm:$0xff] }
  0x5c   :  { %3585 = vmatmul.mubr.msk.f32.gmra.mrb[6].mxu0 %vm179_vm0, %v158_v41  ;;  %4655 = vmatpush3.bf16.msra.mxu1 %v6143_v51  ;;  %v141_v17 = vld [vmem:[#allocation4 + $0x150] sm:$0xff]  ;;  %v6191_v19 = vpack.c.bf16 %v128_v13, %v125_v11  ;;  %v134_v25 = vld [vmem:[#allocation4 + $0x118] sm:$0xff]  ;;  %v140_v28 = vld [vmem:[#allocation4 + $0x148] sm:$0xff] }
  0x5d   :  { %4633 = vmatpush1.bf16.msra.mxu0 %v6134_v42  ;;  %292 = vmatprep.mubr.f32.mxu0 %v5940_v0  ;;  %v6198_v21 = vpack.c.bf16 %v144_v18, %v141_v17  ;;  %v6205_v26 = vpack.c.bf16 %v134_v25, %v131_v24  ;;  %v137_v27 = vld [vmem:[#allocation4 + $0x130] sm:$0xff]  ;;  %v143_v30 = vld [vmem:[#allocation4 + $0x160] sm:$0xff]  ;;  %v146_v32 = vld [vmem:[#allocation4 + $0x178] sm:$0xff] }
  0x5e   :  { %4635 = vmatprep.subr.bf16.mxu0 %v6137_v45  ;;  %4656 = vmatprep.subr.bf16.mxu1 %v5941_v48  ;;  %v6215_v29 = vpack.c.bf16 %v140_v28, %v137_v27  ;;  %v6224_v34 = vpack.c.bf16 %v146_v32, %v143_v30  ;;  %v147_v38 = vld [vmem:[%s7052_s3] sm:$0x7] }
  0x5f   :  { %3963 = vmatmul.mubr.msk.f32.gmra.mrb[2].mxu1 %vm179_vm0, %v158_v41  ;;  %v175_v39 = vrot.slane %v147_v38, %v174_v37  ;;  %v6288_v2 = vrot.slane %v147_v38, %v170_v55  ;;  %v6299_v28 = vld [vmem:[%s7053_s4] ss:$0 sm:$0xff] }
  0x60   :  { %3586 = vmatmul.mubr.msk.f32.gmra.mrb[8].mxu0 %vm179_vm0, %v159_v52  ;;  %4658 = vmatpush3.bf16.msra.mxu1 %v6159_v61 }
  0x61   :  { %4637 = vmatpush1.bf16.msra.mxu0 %v6150_v53  ;;  %298 = vmatprep.mubr.f32.mxu0 %v5940_v0 }
  0x62   :  { %4639 = vmatprep.subr.bf16.mxu0 %v6153_v56  ;;  %4659 = vmatprep.subr.bf16.mxu1 %v5941_v48 }
  0x63   :  { %3965 = vmatprep.mubr.msk.f32.mxu1 %vm179_vm0, %v159_v52  ;;  %v166_v52 = vsub.s32 0, %v6262_v36 }
  0x64   :  { %3587 = vmatmul.mubr.msk.f32.gmra.mrb[10].mxu0 %vm179_vm0, %v160_v62  ;;  %4661 = vmatpush3.bf16.msra.mxu1 %v6175_v8 }
  0x65   :  { %4641 = vmatpush1.bf16.msra.mxu0 %v6166_v63  ;;  %304 = vmatprep.mubr.f32.mxu0 %v5940_v0  ;;  %v6282_v59 = vrot.slane %v147_v38, %v166_v52 }
  0x66   :  { %4643 = vmatprep.subr.bf16.mxu0 %v6169_v3  ;;  %4662 = vmatprep.subr.bf16.mxu1 %v5941_v48 }
  0x67   :  { %3966 = vmatmul.mubr.msk.f32.gmra.mrb[4].mxu1 %vm179_vm0, %v160_v62 }
  0x68   :  { %3588 = vmatmul.mubr.msk.f32.gmra.mrb[12].mxu0 %vm179_vm0, %v161_v9  ;;  %4664 = vmatpush3.bf16.msra.mxu1 %v6191_v19 }
  0x69   :  { %4645 = vmatpush1.bf16.msra.mxu0 %v6182_v10  ;;  %310 = vmatprep.mubr.f32.mxu0 %v5940_v0 }
  0x6a   :  { %4647 = vmatprep.subr.bf16.mxu0 %v6185_v14  ;;  %4665 = vmatprep.subr.bf16.mxu1 %v5941_v48 }
  0x6b   :  { %3968 = vmatprep.mubr.msk.f32.mxu1 %vm179_vm0, %v161_v9 }
  0x6c   :  { %3589 = vmatmul.mubr.msk.f32.gmra.mrb[14].mxu0 %vm179_vm0, %v162_v20  ;;  %3969 = vmatmul.mubr.msk.f32.gmra.mrb[6].mxu1 %vm179_vm0, %v162_v20 }
  0x6d   :  { %4649 = vmatpush1.bf16.msra.mxu0 %v6198_v21  ;;  %513 = vmatprep.mubr.f32.mxu0 %v5940_v0 }
  0x6e   :  { %4675 = vmatprep.subr.bf16.mxu0 %v6091_v12  ;;  %4667 = vmatpush3.bf16.msra.mxu1 %v6205_v26 }
  0x6f   :  { %4668 = vmatprep.subr.bf16.mxu1 %v5941_v48  ;;  %4003 = vmatprep.mubr.msk.f32.mxu1 %vm5942_vm1, %v5940_v0 }
  0x70   :  { %514 = vmatmul.mubr.f32.vlgmr.msra.gmra.mrb[0].mxu0 %v5940_v0 }
  0x71   :  { %4677 = vmatpush1.bf16.msra.mxu0 %v6093_v15  ;;  %680 = vmatprep.mubr.f32.mxu0 %v5940_v0 }
  0x72   :  { %4679 = vmatprep.subr.bf16.mxu0 %v6096_v16  ;;  %4670 = vmatpush3.bf16.msra.mxu1 %v6215_v29 }
  0x73   :  { %4671 = vmatprep.subr.bf16.mxu1 %v5941_v48 }
  0x75   :  { %4681 = vmatpush1.bf16.msra.mxu0 %v6104_v22 }
  0x76   :  { %4683 = vmatprep.subr.bf16.mxu0 %v6107_v23  ;;  %4673 = vmatpush3.bf16.msra.mxu1 %v6224_v34 }
  0x77   :  { %4706 = vmatprep.subr.bf16.mxu1 %v5941_v48 }
  0x79   :  { %4685 = vmatpush1.bf16.msra.mxu0 %v6121_v31  ;;  %4004 = vmatmul.mubr.f32.vlgmr.msra.gmra.mrb[8].mxu1 %v5940_v0 }
  0x7a   :  { %4687 = vmatprep.subr.bf16.mxu0 %v6124_v33  ;;  %4708 = vmatpush3.bf16.msra.mxu1 %v6127_v40 }
  0x7b   :  { %4038 = vmatprep.mubr.msk.f32.mxu1 %vm5942_vm1, %v5940_v0  ;;  %4709 = vmatprep.subr.bf16.mxu1 %v5941_v48 }
  0x7d   :  { %4689 = vmatpush1.bf16.msra.mxu0 %v6134_v42 }
  0x7e   :  { %4691 = vmatprep.subr.bf16.mxu0 %v6137_v45  ;;  %4711 = vmatpush3.bf16.msra.mxu1 %v6143_v51 }
  0x7f   :  { %4712 = vmatprep.subr.bf16.mxu1 %v5941_v48 }
  0x81   :  { %4693 = vmatpush1.bf16.msra.mxu0 %v6150_v53 }
  0x82   :  { %4695 = vmatprep.subr.bf16.mxu0 %v6153_v56  ;;  %4714 = vmatpush3.bf16.msra.mxu1 %v6159_v61 }
  0x83   :  { %4715 = vmatprep.subr.bf16.mxu1 %v5941_v48 }
  0x85   :  { %4697 = vmatpush1.bf16.msra.mxu0 %v6166_v63 }
  0x86   :  { %4699 = vmatprep.subr.bf16.mxu0 %v6169_v3  ;;  %4717 = vmatpush3.bf16.msra.mxu1 %v6175_v8 }
  0x87   :  { %4718 = vmatprep.subr.bf16.mxu1 %v5941_v48 }
  0x89   :  { %4701 = vmatpush1.bf16.msra.mxu0 %v6182_v10 }
  0x8a   :  { %4703 = vmatprep.subr.bf16.mxu0 %v6185_v14  ;;  %4720 = vmatpush3.bf16.msra.mxu1 %v6191_v19 }
  0x8b   :  { %4721 = vmatprep.subr.bf16.mxu1 %v5941_v48 }
  0x8d   :  { %4705 = vmatpush1.bf16.msra.mxu0 %v6198_v21 }
  0x8e   :  { %4731 = vmatprep.subr.bf16.mxu0 %v6091_v12  ;;  %4723 = vmatpush3.bf16.msra.mxu1 %v6205_v26 }
  0x8f   :  { %4724 = vmatprep.subr.bf16.mxu1 %v5941_v48 }
  0x92   :  { %4726 = vmatpush3.bf16.msra.mxu1 %v6215_v29 }
  0x93   :  { %4727 = vmatprep.subr.bf16.mxu1 %v5941_v48 }
  0x96   :  { %4729 = vmatpush3.bf16.msra.mxu1 %v6224_v34 }
  0x97   :  { %4762 = vmatprep.subr.bf16.mxu1 %v5941_v48 }
 0x12a   :  { %v3961_v41 = vpop.f32.mrb[0].mxu1 }
 0x12b   :  { %v6270_v43 = vadd.f32 %v3961_v41, %v175_v39  ;;  %v383_v44 = vpop.f32.mrb[1].mxu1 }
 0x12c   :  { %v384_v38 = vadd.f32 %v383_v44, %v175_v39 }
 0x132   :  { %v3964_v46 = vpop.f32.mrb[2].mxu1 }
 0x133   :  { %v6272_v47 = vadd.f32 %v3964_v46, %v175_v39  ;;  %v393_v49 = vpop.f32.mrb[3].mxu1 }
 0x134   :  { %v6274_v50 = vadd.f32 %v393_v49, %v175_v39 }
 0x13a   :  { %v3967_v54 = vpop.f32.mrb[4].mxu1 }
 0x13b   :  { %v6278_v57 = vadd.f32 %v3967_v54, %v175_v39  ;;  %v403_v58 = vpop.f32.mrb[5].mxu1 }
 0x13c   :  { %v6284_v60 = vadd.f32 %v403_v58, %v175_v39 }
 0x13f   :  { %v3970_v62 = vpop.f32.mrb[6].mxu1 }
 0x140   :  { %v6290_v4 = vadd.f32 %v3970_v62, %v175_v39  ;;  %v413_v5 = vpop.f32.mrb[7].mxu1 }
 0x141   :  { %v6293_v9 = vadd.f32 %v413_v5, %v175_v39 }
 0x143   :  { %v515_v1 = vpop.f32.mrb[0].mxu0 }
 0x144   :  { %v5602_v6 = vadd.f32 %v515_v1, %v6282_v59  ;;  %v517_v7 = vpop.f32.mrb[1].mxu0 }
 0x145   :  { %v5603_v13 = vadd.f32 %v517_v7, %v6288_v2 }
 0x146   :  { %v3598_v11 = vmul.f32 -1.442695, %v5602_v6 }
 0x147   :  { %v3599_v17 = vmul.f32 -1.442695, %v5603_v13 }
 0x148   :  { %5677 = vpow2.f32 %v3598_v11 }
 0x149   :  { %5679 = vpow2.f32 %v3599_v17 }
 0x14c   :  { %v586_v18 = vpop.f32.mrb[8].mxu1 }
 0x14d   :  { %v4005_v20 = vpop.f32.mrb[9].mxu1  ;;  %v604_v32 = vadd.f32 %v6299_v28, %v586_v18 }
 0x152   :  { %v5678_v24 = vpop.eup %5677 }
 0x153   :  { %v594_v25 = vadd.f32 1.0, %v5678_v24  ;;  %v5680_v27 = vpop.eup %5679 }
 0x154   :  { %v601_v30 = vadd.f32 1.0, %v5680_v27 }
 0x155   :  { %5681 = vrcp.f32 %v594_v25 }
 0x156   :  { %5683 = vrcp.f32 %v601_v30 }
 0x15f   :  { %v5682_v35 = vpop.eup %5681 }
 0x160   :  { %v605_v41 = vmul.f32 %v5682_v35, %v604_v32  ;;  %v5684_v49 = vpop.eup %5683 }
 0x161   :  { %v608_v54 = vsub.f32 1.0, %v5684_v49  ;;  %v610_v1 = vmul.f32 0.0, %v5684_v49 }
 0x162   :  { %v606_v46 = vadd.f32 %v605_v41, %v384_v38 }
 0x164   :  { %5685 = vtanh.f32 %v606_v46 }
 0x16e   :  { %v5686_v58 = vpop.eup %5685 }
 0x16f   :  { %v609_v62 = vmul.f32 %v5686_v58, %v608_v54 }
 0x171   :  { %v6302_v5 = vadd.f32 %v610_v1, %v609_v62 }
 0x173   :  { %681 = vmatmul.mubr.f32.vlgmr.msra.gmra.mrb[2].mxu0 %v6302_v5  ;;  %4039 = vmatmul.mubr.f32.vlgmr.msra.gmra.mrb[10].mxu1 %v6302_v5 }
 0x174   :  { %4733 = vmatpush1.bf16.msra.mxu0 %v6093_v15  ;;  %4764 = vmatpush3.bf16.msra.mxu1 %v6127_v40 }
 0x175   :  { %4735 = vmatprep.subr.bf16.mxu0 %v6096_v16  ;;  %4765 = vmatprep.subr.bf16.mxu1 %v5941_v48 }
 0x176   :  { %847 = vmatprep.mubr.f32.mxu0 %v5940_v0  ;;  %4073 = vmatprep.mubr.msk.f32.mxu1 %vm5942_vm1, %v5940_v0 }
 0x178   :  { %4737 = vmatpush1.bf16.msra.mxu0 %v6104_v22  ;;  %4767 = vmatpush3.bf16.msra.mxu1 %v6143_v51 }
 0x179   :  { %4739 = vmatprep.subr.bf16.mxu0 %v6107_v23  ;;  %4768 = vmatprep.subr.bf16.mxu1 %v5941_v48 }
 0x17c   :  { %4741 = vmatpush1.bf16.msra.mxu0 %v6121_v31  ;;  %4770 = vmatpush3.bf16.msra.mxu1 %v6159_v61 }
 0x17d   :  { %4743 = vmatprep.subr.bf16.mxu0 %v6124_v33  ;;  %4771 = vmatprep.subr.bf16.mxu1 %v5941_v48 }
 0x180   :  { %4745 = vmatpush1.bf16.msra.mxu0 %v6134_v42  ;;  %4773 = vmatpush3.bf16.msra.mxu1 %v6175_v8 }
 0x181   :  { %4747 = vmatprep.subr.bf16.mxu0 %v6137_v45  ;;  %4774 = vmatprep.subr.bf16.mxu1 %v5941_v48 }
 0x184   :  { %4749 = vmatpush1.bf16.msra.mxu0 %v6150_v53  ;;  %4776 = vmatpush3.bf16.msra.mxu1 %v6191_v19 }
 0x185   :  { %4751 = vmatprep.subr.bf16.mxu0 %v6153_v56  ;;  %4777 = vmatprep.subr.bf16.mxu1 %v5941_v48 }
 0x188   :  { %4753 = vmatpush1.bf16.msra.mxu0 %v6166_v63  ;;  %4779 = vmatpush3.bf16.msra.mxu1 %v6205_v26 }
 0x189   :  { %4755 = vmatprep.subr.bf16.mxu0 %v6169_v3  ;;  %4780 = vmatprep.subr.bf16.mxu1 %v5941_v48 }
 0x18c   :  { %4757 = vmatpush1.bf16.msra.mxu0 %v6182_v10  ;;  %4782 = vmatpush3.bf16.msra.mxu1 %v6215_v29 }
 0x18d   :  { %4759 = vmatprep.subr.bf16.mxu0 %v6185_v14  ;;  %4783 = vmatprep.subr.bf16.mxu1 %v5941_v48 }
 0x190   :  { %4761 = vmatpush1.bf16.msra.mxu0 %v6198_v21  ;;  %4785 = vmatpush3.bf16.msra.mxu1 %v6224_v34 }
 0x191   :  { %4787 = vmatprep.subr.bf16.mxu0 %v6091_v12  ;;  %4818 = vmatprep.subr.bf16.mxu1 %v5941_v48 }
 0x246   :  { %v682_v39 = vpop.f32.mrb[2].mxu0  ;;  %v753_v44 = vpop.f32.mrb[10].mxu1 }
 0x247   :  { %v5604_v6 = vadd.f32 %v682_v39, %v6282_v59  ;;  %v684_v7 = vpop.f32.mrb[3].mxu0  ;;  %v4040_v11 = vpop.f32.mrb[11].mxu1  ;;  %v771_v30 = vadd.f32 %v6299_v28, %v753_v44 }
 0x248   :  { %v5605_v17 = vadd.f32 %v684_v7, %v6288_v2 }
 0x249   :  { %v3600_v13 = vmul.f32 -1.442695, %v5604_v6 }
 0x24a   :  { %v3601_v18 = vmul.f32 -1.442695, %v5605_v17 }
 0x24b   :  { %5687 = vpow2.f32 %v3600_v13 }
 0x24c   :  { %5689 = vpow2.f32 %v3601_v18 }
 0x255   :  { %v5688_v20 = vpop.eup %5687 }
 0x256   :  { %v761_v24 = vadd.f32 1.0, %v5688_v20  ;;  %v5690_v25 = vpop.eup %5689 }
 0x257   :  { %v768_v27 = vadd.f32 1.0, %v5690_v25 }
 0x258   :  { %5691 = vrcp.f32 %v761_v24 }
 0x259   :  { %5693 = vrcp.f32 %v768_v27 }
 0x262   :  { %v5692_v32 = vpop.eup %5691 }
 0x263   :  { %v772_v35 = vmul.f32 %v5692_v32, %v771_v30  ;;  %v5694_v41 = vpop.eup %5693 }
 0x264   :  { %v775_v46 = vsub.f32 1.0, %v5694_v41  ;;  %v777_v58 = vmul.f32 %v5694_v41, %v6302_v5 }
 0x265   :  { %v773_v38 = vadd.f32 %v772_v35, %v6270_v43 }
 0x267   :  { %5695 = vtanh.f32 %v773_v38 }
 0x271   :  { %v5696_v49 = vpop.eup %5695 }
 0x272   :  { %v776_v54 = vmul.f32 %v5696_v49, %v775_v46 }
 0x274   :  { %v6346_v62 = vadd.f32 %v777_v58, %v776_v54 }
 0x276   :  { %848 = vmatmul.mubr.f32.vlgmr.msra.gmra.mrb[4].mxu0 %v6346_v62  ;;  %4074 = vmatmul.mubr.f32.vlgmr.msra.gmra.mrb[12].mxu1 %v6346_v62 }
 0x277   :  { %4789 = vmatpush1.bf16.msra.mxu0 %v6093_v15  ;;  %4820 = vmatpush3.bf16.msra.mxu1 %v6127_v40 }
 0x278   :  { %4791 = vmatprep.subr.bf16.mxu0 %v6096_v16  ;;  %4821 = vmatprep.subr.bf16.mxu1 %v5941_v48 }
 0x279   :  { %1014 = vmatprep.mubr.f32.mxu0 %v5940_v0  ;;  %4108 = vmatprep.mubr.msk.f32.mxu1 %vm5942_vm1, %v5940_v0 }
 0x27b   :  { %4793 = vmatpush1.bf16.msra.mxu0 %v6104_v22  ;;  %4823 = vmatpush3.bf16.msra.mxu1 %v6143_v51 }
 0x27c   :  { %4795 = vmatprep.subr.bf16.mxu0 %v6107_v23  ;;  %4824 = vmatprep.subr.bf16.mxu1 %v5941_v48 }
 0x27f   :  { %4797 = vmatpush1.bf16.msra.mxu0 %v6121_v31  ;;  %4826 = vmatpush3.bf16.msra.mxu1 %v6159_v61 }
 0x280   :  { %4799 = vmatprep.subr.bf16.mxu0 %v6124_v33  ;;  %4827 = vmatprep.subr.bf16.mxu1 %v5941_v48 }
 0x283   :  { %4801 = vmatpush1.bf16.msra.mxu0 %v6134_v42  ;;  %4829 = vmatpush3.bf16.msra.mxu1 %v6175_v8 }
 0x284   :  { %4803 = vmatprep.subr.bf16.mxu0 %v6137_v45  ;;  %4830 = vmatprep.subr.bf16.mxu1 %v5941_v48 }
 0x287   :  { %4805 = vmatpush1.bf16.msra.mxu0 %v6150_v53  ;;  %4832 = vmatpush3.bf16.msra.mxu1 %v6191_v19 }
 0x288   :  { %4807 = vmatprep.subr.bf16.mxu0 %v6153_v56  ;;  %4833 = vmatprep.subr.bf16.mxu1 %v5941_v48 }
 0x28b   :  { %4809 = vmatpush1.bf16.msra.mxu0 %v6166_v63  ;;  %4835 = vmatpush3.bf16.msra.mxu1 %v6205_v26 }
 0x28c   :  { %4811 = vmatprep.subr.bf16.mxu0 %v6169_v3  ;;  %4836 = vmatprep.subr.bf16.mxu1 %v5941_v48 }
 0x28f   :  { %4813 = vmatpush1.bf16.msra.mxu0 %v6182_v10  ;;  %4838 = vmatpush3.bf16.msra.mxu1 %v6215_v29 }
 0x290   :  { %4815 = vmatprep.subr.bf16.mxu0 %v6185_v14  ;;  %4839 = vmatprep.subr.bf16.mxu1 %v5941_v48 }
 0x293   :  { %4817 = vmatpush1.bf16.msra.mxu0 %v6198_v21  ;;  %4841 = vmatpush3.bf16.msra.mxu1 %v6224_v34 }
 0x294   :  { %4843 = vmatprep.subr.bf16.mxu0 %v6091_v12  ;;  %4874 = vmatprep.subr.bf16.mxu1 %v5941_v48 }
 0x349   :  { %v849_v43 = vpop.f32.mrb[4].mxu0  ;;  %v920_v1 = vpop.f32.mrb[12].mxu1 }
 0x34a   :  { %v5606_v39 = vadd.f32 %v849_v43, %v6282_v59  ;;  %v851_v44 = vpop.f32.mrb[5].mxu0  ;;  %v4075_v6 = vpop.f32.mrb[13].mxu1  ;;  %v938_v25 = vadd.f32 %v6299_v28, %v920_v1 }
 0x34b   :  { %v5607_v11 = vadd.f32 %v851_v44, %v6288_v2 }
 0x34c   :  { %v3602_v7 = vmul.f32 -1.442695, %v5606_v39 }
 0x34d   :  { %v3603_v13 = vmul.f32 -1.442695, %v5607_v11 }
 0x34e   :  { %5697 = vpow2.f32 %v3602_v7 }
 0x34f   :  { %5699 = vpow2.f32 %v3603_v13 }
 0x358   :  { %v5698_v17 = vpop.eup %5697 }
 0x359   :  { %v928_v18 = vadd.f32 1.0, %v5698_v17  ;;  %v5700_v20 = vpop.eup %5699 }
 0x35a   :  { %v935_v24 = vadd.f32 1.0, %v5700_v20 }
 0x35b   :  { %5701 = vrcp.f32 %v928_v18 }
 0x35c   :  { %5703 = vrcp.f32 %v935_v24 }
 0x365   :  { %v5702_v27 = vpop.eup %5701 }
 0x366   :  { %v939_v30 = vmul.f32 %v5702_v27, %v938_v25  ;;  %v5704_v35 = vpop.eup %5703 }
 0x367   :  { %v942_v38 = vsub.f32 1.0, %v5704_v35  ;;  %v944_v49 = vmul.f32 %v5704_v35, %v6346_v62 }
 0x368   :  { %v940_v32 = vadd.f32 %v939_v30, %v6274_v50 }
 0x36a   :  { %5705 = vtanh.f32 %v940_v32 }
 0x374   :  { %v5706_v41 = vpop.eup %5705 }
 0x375   :  { %v943_v46 = vmul.f32 %v5706_v41, %v942_v38 }
 0x377   :  { %v6390_v54 = vadd.f32 %v944_v49, %v943_v46 }
 0x379   :  { %1015 = vmatmul.mubr.f32.vlgmr.msra.gmra.mrb[6].mxu0 %v6390_v54  ;;  %4109 = vmatmul.mubr.f32.vlgmr.msra.gmra.mrb[14].mxu1 %v6390_v54 }
 0x37a   :  { %4845 = vmatpush1.bf16.msra.mxu0 %v6093_v15  ;;  %4876 = vmatpush3.bf16.msra.mxu1 %v6127_v40 }
 0x37b   :  { %4847 = vmatprep.subr.bf16.mxu0 %v6096_v16  ;;  %4877 = vmatprep.subr.bf16.mxu1 %v5941_v48 }
 0x37c   :  { %1181 = vmatprep.mubr.f32.mxu0 %v5940_v0  ;;  %4143 = vmatprep.mubr.msk.f32.mxu1 %vm5942_vm1, %v5940_v0 }
 0x37e   :  { %4849 = vmatpush1.bf16.msra.mxu0 %v6104_v22  ;;  %4879 = vmatpush3.bf16.msra.mxu1 %v6143_v51 }
 0x37f   :  { %4851 = vmatprep.subr.bf16.mxu0 %v6107_v23  ;;  %4880 = vmatprep.subr.bf16.mxu1 %v5941_v48 }
 0x382   :  { %4853 = vmatpush1.bf16.msra.mxu0 %v6121_v31  ;;  %4882 = vmatpush3.bf16.msra.mxu1 %v6159_v61 }
 0x383   :  { %4855 = vmatprep.subr.bf16.mxu0 %v6124_v33  ;;  %4883 = vmatprep.subr.bf16.mxu1 %v5941_v48 }
 0x386   :  { %4857 = vmatpush1.bf16.msra.mxu0 %v6134_v42  ;;  %4885 = vmatpush3.bf16.msra.mxu1 %v6175_v8 }
 0x387   :  { %4859 = vmatprep.subr.bf16.mxu0 %v6137_v45  ;;  %4886 = vmatprep.subr.bf16.mxu1 %v5941_v48 }
 0x38a   :  { %4861 = vmatpush1.bf16.msra.mxu0 %v6150_v53  ;;  %4888 = vmatpush3.bf16.msra.mxu1 %v6191_v19 }
 0x38b   :  { %4863 = vmatprep.subr.bf16.mxu0 %v6153_v56  ;;  %4889 = vmatprep.subr.bf16.mxu1 %v5941_v48 }
 0x38e   :  { %4865 = vmatpush1.bf16.msra.mxu0 %v6166_v63  ;;  %4891 = vmatpush3.bf16.msra.mxu1 %v6205_v26 }
 0x38f   :  { %4867 = vmatprep.subr.bf16.mxu0 %v6169_v3  ;;  %4892 = vmatprep.subr.bf16.mxu1 %v5941_v48 }
 0x392   :  { %4869 = vmatpush1.bf16.msra.mxu0 %v6182_v10  ;;  %4894 = vmatpush3.bf16.msra.mxu1 %v6215_v29 }
 0x393   :  { %4871 = vmatprep.subr.bf16.mxu0 %v6185_v14  ;;  %4895 = vmatprep.subr.bf16.mxu1 %v5941_v48 }
 0x396   :  { %4873 = vmatpush1.bf16.msra.mxu0 %v6198_v21  ;;  %4897 = vmatpush3.bf16.msra.mxu1 %v6224_v34 }
 0x397   :  { %4899 = vmatprep.subr.bf16.mxu0 %v6091_v12  ;;  %4930 = vmatprep.subr.bf16.mxu1 %v5941_v48 }
 0x44c   :  { %v1016_v50 = vpop.f32.mrb[6].mxu0  ;;  %v1087_v58 = vpop.f32.mrb[14].mxu1 }
 0x44d   :  { %v5608_v43 = vadd.f32 %v1016_v50, %v6282_v59  ;;  %v1018_v1 = vpop.f32.mrb[7].mxu0  ;;  %v4110_v39 = vpop.f32.mrb[15].mxu1  ;;  %v1105_v20 = vadd.f32 %v6299_v28, %v1087_v58 }
 0x44e   :  { %v5609_v6 = vadd.f32 %v1018_v1, %v6288_v2 }
 0x44f   :  { %v3604_v44 = vmul.f32 -1.442695, %v5608_v43 }
 0x450   :  { %v3605_v7 = vmul.f32 -1.442695, %v5609_v6 }
 0x451   :  { %5707 = vpow2.f32 %v3604_v44 }
 0x452   :  { %5709 = vpow2.f32 %v3605_v7 }
 0x45b   :  { %v5708_v11 = vpop.eup %5707 }
 0x45c   :  { %v1095_v13 = vadd.f32 1.0, %v5708_v11  ;;  %v5710_v17 = vpop.eup %5709 }
 0x45d   :  { %v1102_v18 = vadd.f32 1.0, %v5710_v17 }
 0x45e   :  { %5711 = vrcp.f32 %v1095_v13 }
 0x45f   :  { %5713 = vrcp.f32 %v1102_v18 }
 0x468   :  { %v5712_v24 = vpop.eup %5711 }
 0x469   :  { %v1106_v25 = vmul.f32 %v5712_v24, %v1105_v20  ;;  %v5714_v30 = vpop.eup %5713 }
 0x46a   :  { %v1109_v32 = vsub.f32 1.0, %v5714_v30  ;;  %v1111_v41 = vmul.f32 %v5714_v30, %v6390_v54 }
 0x46b   :  { %v1107_v27 = vadd.f32 %v1106_v25, %v6272_v47 }
 0x46d   :  { %5715 = vtanh.f32 %v1107_v27 }
 0x477   :  { %v5716_v35 = vpop.eup %5715 }
 0x478   :  { %v1110_v38 = vmul.f32 %v5716_v35, %v1109_v32 }
 0x47a   :  { %v6434_v46 = vadd.f32 %v1111_v41, %v1110_v38 }
 0x47c   :  { %1182 = vmatmul.mubr.f32.vlgmr.msra.gmra.mrb[8].mxu0 %v6434_v46  ;;  %4144 = vmatmul.mubr.f32.vlgmr.msra.gmra.mrb[16].mxu1 %v6434_v46 }
 0x47d   :  { %4901 = vmatpush1.bf16.msra.mxu0 %v6093_v15  ;;  %4932 = vmatpush3.bf16.msra.mxu1 %v6127_v40 }
 0x47e   :  { %4903 = vmatprep.subr.bf16.mxu0 %v6096_v16  ;;  %4933 = vmatprep.subr.bf16.mxu1 %v5941_v48 }
 0x47f   :  { %1348 = vmatprep.mubr.f32.mxu0 %v5940_v0  ;;  %4178 = vmatprep.mubr.msk.f32.mxu1 %vm5942_vm1, %v5940_v0 }
 0x481   :  { %4905 = vmatpush1.bf16.msra.mxu0 %v6104_v22  ;;  %4935 = vmatpush3.bf16.msra.mxu1 %v6143_v51 }
 0x482   :  { %4907 = vmatprep.subr.bf16.mxu0 %v6107_v23  ;;  %4936 = vmatprep.subr.bf16.mxu1 %v5941_v48 }
 0x485   :  { %4909 = vmatpush1.bf16.msra.mxu0 %v6121_v31  ;;  %4938 = vmatpush3.bf16.msra.mxu1 %v6159_v61 }
 0x486   :  { %4911 = vmatprep.subr.bf16.mxu0 %v6124_v33  ;;  %4939 = vmatprep.subr.bf16.mxu1 %v5941_v48 }
 0x489   :  { %4913 = vmatpush1.bf16.msra.mxu0 %v6134_v42  ;;  %4941 = vmatpush3.bf16.msra.mxu1 %v6175_v8 }
 0x48a   :  { %4915 = vmatprep.subr.bf16.mxu0 %v6137_v45  ;;  %4942 = vmatprep.subr.bf16.mxu1 %v5941_v48 }
 0x48d   :  { %4917 = vmatpush1.bf16.msra.mxu0 %v6150_v53  ;;  %4944 = vmatpush3.bf16.msra.mxu1 %v6191_v19 }
 0x48e   :  { %4919 = vmatprep.subr.bf16.mxu0 %v6153_v56  ;;  %4945 = vmatprep.subr.bf16.mxu1 %v5941_v48 }
 0x491   :  { %4921 = vmatpush1.bf16.msra.mxu0 %v6166_v63  ;;  %4947 = vmatpush3.bf16.msra.mxu1 %v6205_v26 }
 0x492   :  { %4923 = vmatprep.subr.bf16.mxu0 %v6169_v3  ;;  %4948 = vmatprep.subr.bf16.mxu1 %v5941_v48 }
 0x495   :  { %4925 = vmatpush1.bf16.msra.mxu0 %v6182_v10  ;;  %4950 = vmatpush3.bf16.msra.mxu1 %v6215_v29 }
 0x496   :  { %4927 = vmatprep.subr.bf16.mxu0 %v6185_v14  ;;  %4951 = vmatprep.subr.bf16.mxu1 %v5941_v48 }
 0x499   :  { %4929 = vmatpush1.bf16.msra.mxu0 %v6198_v21  ;;  %4953 = vmatpush3.bf16.msra.mxu1 %v6224_v34 }
 0x49a   :  { %4955 = vmatprep.subr.bf16.mxu0 %v6091_v12  ;;  %4986 = vmatprep.subr.bf16.mxu1 %v5941_v48 }
 0x54f   :  { %v1183_v47 = vpop.f32.mrb[8].mxu0  ;;  %v1254_v49 = vpop.f32.mrb[16].mxu1 }
 0x550   :  { %v5610_v50 = vadd.f32 %v1183_v47, %v6282_v59  ;;  %v1185_v58 = vpop.f32.mrb[9].mxu0  ;;  %v4145_v43 = vpop.f32.mrb[17].mxu1  ;;  %v1272_v17 = vadd.f32 %v6299_v28, %v1254_v49 }
 0x551   :  { %v5611_v39 = vadd.f32 %v1185_v58, %v6288_v2 }
 0x552   :  { %v3606_v1 = vmul.f32 -1.442695, %v5610_v50 }
 0x553   :  { %v3607_v44 = vmul.f32 -1.442695, %v5611_v39 }
 0x554   :  { %5717 = vpow2.f32 %v3606_v1 }
 0x555   :  { %5719 = vpow2.f32 %v3607_v44 }
 0x55e   :  { %v5718_v6 = vpop.eup %5717 }
 0x55f   :  { %v1262_v7 = vadd.f32 1.0, %v5718_v6  ;;  %v5720_v11 = vpop.eup %5719 }
 0x560   :  { %v1269_v13 = vadd.f32 1.0, %v5720_v11 }
 0x561   :  { %5721 = vrcp.f32 %v1262_v7 }
 0x562   :  { %5723 = vrcp.f32 %v1269_v13 }
 0x56b   :  { %v5722_v18 = vpop.eup %5721 }
 0x56c   :  { %v1273_v20 = vmul.f32 %v5722_v18, %v1272_v17  ;;  %v5724_v25 = vpop.eup %5723 }
 0x56d   :  { %v1276_v27 = vsub.f32 1.0, %v5724_v25  ;;  %v1278_v35 = vmul.f32 %v5724_v25, %v6434_v46 }
 0x56e   :  { %v1274_v24 = vadd.f32 %v1273_v20, %v6284_v60 }
 0x570   :  { %5725 = vtanh.f32 %v1274_v24 }
 0x57a   :  { %v5726_v30 = vpop.eup %5725 }
 0x57b   :  { %v1277_v32 = vmul.f32 %v5726_v30, %v1276_v27 }
 0x57d   :  { %v6478_v38 = vadd.f32 %v1278_v35, %v1277_v32  ;;  %v1782_v32 = vld [vmem:[#allocation6] sm:$0xff]  ;;  %v1785_v35 = vld [vmem:[#allocation6 + $0x18] sm:$0xff] }
 0x57f   :  { %1349 = vmatmul.mubr.f32.vlgmr.msra.gmra.mrb[10].mxu0 %v6478_v38  ;;  %4179 = vmatmul.mubr.f32.vlgmr.msra.gmra.mrb[18].mxu1 %v6478_v38 }
 0x580   :  { %4957 = vmatpush1.bf16.msra.mxu0 %v6093_v15  ;;  %4988 = vmatpush3.bf16.msra.mxu1 %v6127_v40 }
 0x581   :  { %4959 = vmatprep.subr.bf16.mxu0 %v6096_v16  ;;  %4989 = vmatprep.subr.bf16.mxu1 %v5941_v48 }
 0x582   :  { %1515 = vmatprep.mubr.f32.mxu0 %v5940_v0  ;;  %4213 = vmatprep.mubr.msk.f32.mxu1 %vm5942_vm1, %v5940_v0 }
 0x584   :  { %4961 = vmatpush1.bf16.msra.mxu0 %v6104_v22  ;;  %4991 = vmatpush3.bf16.msra.mxu1 %v6143_v51 }
 0x585   :  { %4963 = vmatprep.subr.bf16.mxu0 %v6107_v23  ;;  %4992 = vmatprep.subr.bf16.mxu1 %v5941_v48 }
 0x588   :  { %4965 = vmatpush1.bf16.msra.mxu0 %v6121_v31  ;;  %4994 = vmatpush3.bf16.msra.mxu1 %v6159_v61 }
 0x589   :  { %4967 = vmatprep.subr.bf16.mxu0 %v6124_v33  ;;  %4995 = vmatprep.subr.bf16.mxu1 %v5941_v48 }
 0x58c   :  { %4969 = vmatpush1.bf16.msra.mxu0 %v6134_v42  ;;  %4997 = vmatpush3.bf16.msra.mxu1 %v6175_v8 }
 0x58d   :  { %4971 = vmatprep.subr.bf16.mxu0 %v6137_v45  ;;  %4998 = vmatprep.subr.bf16.mxu1 %v5941_v48 }
 0x590   :  { %4973 = vmatpush1.bf16.msra.mxu0 %v6150_v53  ;;  %5000 = vmatpush3.bf16.msra.mxu1 %v6191_v19 }
 0x591   :  { %4975 = vmatprep.subr.bf16.mxu0 %v6153_v56  ;;  %5001 = vmatprep.subr.bf16.mxu1 %v5941_v48 }
 0x594   :  { %4977 = vmatpush1.bf16.msra.mxu0 %v6166_v63  ;;  %5003 = vmatpush3.bf16.msra.mxu1 %v6205_v26 }
 0x595   :  { %4979 = vmatprep.subr.bf16.mxu0 %v6169_v3  ;;  %5004 = vmatprep.subr.bf16.mxu1 %v5941_v48 }
 0x598   :  { %4981 = vmatpush1.bf16.msra.mxu0 %v6182_v10  ;;  %5006 = vmatpush3.bf16.msra.mxu1 %v6215_v29 }
 0x599   :  { %4983 = vmatprep.subr.bf16.mxu0 %v6185_v14  ;;  %5007 = vmatprep.subr.bf16.mxu1 %v5941_v48 }
 0x59c   :  { %4985 = vmatpush1.bf16.msra.mxu0 %v6198_v21  ;;  %5009 = vmatpush3.bf16.msra.mxu1 %v6224_v34 }
 0x59d   :  { %5011 = vmatprep.subr.bf16.mxu0 %v6091_v12  ;;  %5042 = vmatprep.subr.bf16.mxu1 %v5941_v48 }
 0x652   :  { %v1350_v60 = vpop.f32.mrb[10].mxu0  ;;  %v1421_v41 = vpop.f32.mrb[18].mxu1 }
 0x653   :  { %v5612_v47 = vadd.f32 %v1350_v60, %v6282_v59  ;;  %v1352_v49 = vpop.f32.mrb[11].mxu0  ;;  %v4180_v50 = vpop.f32.mrb[19].mxu1  ;;  %v1439_v12 = vadd.f32 %v6299_v28, %v1421_v41  ;;  %v1789_v41 = vld [vmem:[#allocation6 + $0x38] sm:$0xff] }
 0x654   :  { %v5613_v43 = vadd.f32 %v1352_v49, %v6288_v2 }
 0x655   :  { %v3608_v58 = vmul.f32 -1.442695, %v5612_v47  ;;  %v1792_v47 = vld [vmem:[#allocation6 + $0x50] sm:$0xff] }
 0x656   :  { %v3609_v1 = vmul.f32 -1.442695, %v5613_v43  ;;  %v1793_v43 = vld [vmem:[#allocation6 + $0x58] sm:$0xff] }
 0x657   :  { %5727 = vpow2.f32 %v3608_v58  ;;  %v1790_v58 = vld [vmem:[#allocation6 + $0x40] sm:$0xff] }
 0x658   :  { %5729 = vpow2.f32 %v3609_v1  ;;  %v5068_v1 = vpack.c.bf16 %v1785_v35, %v1782_v32  ;;  %v1812_v32 = vld [vmem:[#allocation6 + $0xf0] sm:$0xff]  ;;  %v1815_v35 = vld [vmem:[#allocation6 + $0x108] sm:$0xff] }
 0x661   :  { %v5728_v39 = vpop.eup %5727 }
 0x662   :  { %v1429_v44 = vadd.f32 1.0, %v5728_v39  ;;  %v5730_v6 = vpop.eup %5729  ;;  %v5070_v39 = vpack.c.bf16 %v1792_v47, %v1789_v41  ;;  %v1822_v41 = vld [vmem:[#allocation6 + $0x140] sm:$0xff]  ;;  %v1820_v47 = vld [vmem:[#allocation6 + $0x130] sm:$0xff] }
 0x663   :  { %v1436_v7 = vadd.f32 1.0, %v5730_v6  ;;  %v1791_v6 = vld [vmem:[#allocation6 + $0x48] sm:$0xff] }
 0x664   :  { %5731 = vrcp.f32 %v1429_v44  ;;  %v1788_v44 = vld [vmem:[#allocation6 + $0x30] sm:$0xff] }
 0x665   :  { %5733 = vrcp.f32 %v1436_v7  ;;  %v5102_v7 = vpack.c.bf16 %v1793_v43, %v1790_v58 }
 0x66e   :  { %v5732_v11 = vpop.eup %5731 }
 0x66f   :  { %v1440_v13 = vmul.f32 %v5732_v11, %v1439_v12  ;;  %v5734_v18 = vpop.eup %5733  ;;  %v1798_v12 = vld [vmem:[#allocation6 + $0x80] sm:$0xff]  ;;  %v1796_v11 = vld [vmem:[#allocation6 + $0x70] sm:$0xff] }
 0x670   :  { %v1443_v20 = vsub.f32 1.0, %v5734_v18  ;;  %v1445_v27 = vmul.f32 %v5734_v18, %v6478_v38 }
 0x671   :  { %v1441_v17 = vadd.f32 %v1440_v13, %v6278_v57  ;;  %v1799_v13 = vld [vmem:[#allocation6 + $0x88] sm:$0xff] }
 0x673   :  { %5735 = vtanh.f32 %v1441_v17  ;;  %v5072_v17 = vpack.c.bf16 %v1791_v6, %v1788_v44  ;;  %v1825_v44 = vld [vmem:[#allocation6 + $0x158] sm:$0xff]  ;;  %v1828_v6 = vld [vmem:[#allocation6 + $0x170] sm:$0xff] }
 0x67d   :  { %v5736_v24 = vpop.eup %5735 }
 0x67e   :  { %v1444_v25 = vmul.f32 %v5736_v24, %v1443_v20  ;;  %v5106_v20 = vpack.c.bf16 %v1799_v13, %v1796_v11  ;;  %v1794_v24 = vld [vmem:[#allocation6 + $0x60] sm:$0xff]  ;;  %v5094_v11 = vpack.c.bf16 %v1828_v6, %v1825_v44  ;;  %v1873_v6 = vld [vmem:[#allocation8 + $0x158] sm:$0xff] }
 0x680   :  { %v6522_v30 = vadd.f32 %v1445_v27, %v1444_v25  ;;  %v1797_v25 = vld [vmem:[#allocation6 + $0x78] sm:$0xff] }
 0x681   :  { %v1801_v27 = vld [vmem:[#allocation6 + $0x98] sm:$0xff] }
 0x682   :  { %1516 = vmatmul.mubr.f32.vlgmr.msra.gmra.mrb[12].mxu0 %v6522_v30  ;;  %4214 = vmatmul.mubr.f32.vlgmr.msra.gmra.mrb[20].mxu1 %v6522_v30 }
 0x683   :  { %5013 = vmatpush1.bf16.msra.mxu0 %v6093_v15  ;;  %5044 = vmatpush3.bf16.msra.mxu1 %v6127_v40  ;;  %v1783_v15 = vld [vmem:[#allocation6 + $0x8] sm:$0xff] }
 0x684   :  { %5015 = vmatprep.subr.bf16.mxu0 %v6096_v16  ;;  %5045 = vmatprep.subr.bf16.mxu1 %v5941_v48  ;;  %v1786_v16 = vld [vmem:[#allocation6 + $0x20] sm:$0xff] }
 0x685   :  { %1682 = vmatprep.mubr.f32.mxu0 %v5940_v0  ;;  %4248 = vmatprep.mubr.msk.f32.mxu1 %vm5942_vm1, %v5940_v0 }
 0x687   :  { %5017 = vmatpush1.bf16.msra.mxu0 %v6104_v22  ;;  %5047 = vmatpush3.bf16.msra.mxu1 %v6143_v51  ;;  %v1784_v22 = vld [vmem:[#allocation6 + $0x10] sm:$0xff] }
 0x688   :  { %5019 = vmatprep.subr.bf16.mxu0 %v6107_v23  ;;  %5048 = vmatprep.subr.bf16.mxu1 %v5941_v48  ;;  %v5066_v23 = vpack.c.bf16 %v1786_v16, %v1783_v15  ;;  %v1804_v15 = vld [vmem:[#allocation6 + $0xb0] sm:$0xff]  ;;  %v1802_v16 = vld [vmem:[#allocation6 + $0xa0] sm:$0xff] }
 0x68b   :  { %5021 = vmatpush1.bf16.msra.mxu0 %v6121_v31  ;;  %5050 = vmatpush3.bf16.msra.mxu1 %v6159_v61  ;;  %v1787_v31 = vld [vmem:[#allocation6 + $0x28] sm:$0xff] }
 0x68c   :  { %5023 = vmatprep.subr.bf16.mxu0 %v6124_v33  ;;  %5051 = vmatprep.subr.bf16.mxu1 %v5941_v48  ;;  %v5098_v33 = vpack.c.bf16 %v1787_v31, %v1784_v22  ;;  %v1805_v22 = vld [vmem:[#allocation6 + $0xb8] sm:$0xff]  ;;  %v5078_v31 = vpack.c.bf16 %v1804_v15, %v1801_v27  ;;  %v1836_v15 = vld [vmem:[#allocation8 + $0x30] sm:$0xff] }
 0x68f   :  { %5025 = vmatpush1.bf16.msra.mxu0 %v6134_v42  ;;  %5053 = vmatpush3.bf16.msra.mxu1 %v6175_v8 }
 0x690   :  { %5027 = vmatprep.subr.bf16.mxu0 %v6137_v45  ;;  %5054 = vmatprep.subr.bf16.mxu1 %v5941_v48 }
 0x693   :  { %5029 = vmatpush1.bf16.msra.mxu0 %v6150_v53  ;;  %5056 = vmatpush3.bf16.msra.mxu1 %v6191_v19 }
 0x694   :  { %5031 = vmatprep.subr.bf16.mxu0 %v6153_v56  ;;  %5057 = vmatprep.subr.bf16.mxu1 %v5941_v48 }
 0x697   :  { %5033 = vmatpush1.bf16.msra.mxu0 %v6166_v63  ;;  %5059 = vmatpush3.bf16.msra.mxu1 %v6205_v26 }
 0x698   :  { %5035 = vmatprep.subr.bf16.mxu0 %v6169_v3  ;;  %5060 = vmatprep.subr.bf16.mxu1 %v5941_v48 }
 0x69b   :  { %5037 = vmatpush1.bf16.msra.mxu0 %v6182_v10  ;;  %5062 = vmatpush3.bf16.msra.mxu1 %v6215_v29 }
 0x69c   :  { %5039 = vmatprep.subr.bf16.mxu0 %v6185_v14  ;;  %5063 = vmatprep.subr.bf16.mxu1 %v5941_v48 }
 0x69f   :  { %5041 = vmatpush1.bf16.msra.mxu0 %v6198_v21  ;;  %5065 = vmatpush3.bf16.msra.mxu1 %v6224_v34 }
 0x6a0   :  { %5067 = vmatprep.subr.bf16.mxu0 %v5066_v23  ;;  %5099 = vmatprep.subr.bf16.mxu1 %v5098_v33  ;;  %v5076_v23 = vpack.c.bf16 %v1797_v25, %v1794_v24  ;;  %v1830_v24 = vld [vmem:[#allocation8] sm:$0xff] }
 0x755   :  { %v1517_v40 = vpop.f32.mrb[12].mxu0  ;;  %v1588_v42 = vpop.f32.mrb[20].mxu1 }
 0x756   :  { %v5614_v45 = vadd.f32 %v1517_v40, %v6282_v59  ;;  %v1519_v51 = vpop.f32.mrb[13].mxu0  ;;  %v4215_v53 = vpop.f32.mrb[21].mxu1  ;;  %v1606_v19 = vadd.f32 %v6299_v28, %v1588_v42  ;;  %v1800_v40 = vld [vmem:[#allocation6 + $0x90] sm:$0xff]  ;;  %v1803_v42 = vld [vmem:[#allocation6 + $0xa8] sm:$0xff] }
 0x757   :  { %v5615_v61 = vadd.f32 %v1519_v51, %v6288_v2  ;;  %v1810_v51 = vld [vmem:[#allocation6 + $0xe0] sm:$0xff]  ;;  %v1808_v53 = vld [vmem:[#allocation6 + $0xd0] sm:$0xff] }
 0x758   :  { %v3610_v56 = vmul.f32 -1.442695, %v5614_v45  ;;  %v1807_v45 = vld [vmem:[#allocation6 + $0xc8] sm:$0xff] }
 0x759   :  { %v3611_v63 = vmul.f32 -1.442695, %v5615_v61  ;;  %v5080_v61 = vpack.c.bf16 %v1803_v42, %v1800_v40  ;;  %v1842_v40 = vld [vmem:[#allocation8 + $0x60] sm:$0xff]  ;;  %v1845_v42 = vld [vmem:[#allocation8 + $0x78] sm:$0xff] }
 0x75a   :  { %5737 = vpow2.f32 %v3610_v56  ;;  %v1811_v56 = vld [vmem:[#allocation6 + $0xe8] sm:$0xff] }
 0x75b   :  { %5739 = vpow2.f32 %v3611_v63  ;;  %v5082_v63 = vpack.c.bf16 %v1810_v51, %v1807_v45  ;;  %v6605_v45 = vpack.c.bf16 %v1845_v42, %v1842_v40  ;;  %v1849_v51 = vld [vmem:[#allocation8 + $0x98] sm:$0xff] }
 0x75c   :  { %v1865_v40 = vld [vmem:[#allocation8 + $0x118] sm:$0xff] }
 0x764   :  { %v5738_v3 = vpop.eup %5737 }
 0x765   :  { %v1596_v8 = vadd.f32 1.0, %v5738_v3  ;;  %v5740_v10 = vpop.eup %5739  ;;  %v5114_v3 = vpack.c.bf16 %v1811_v56, %v1808_v53  ;;  %v1852_v53 = vld [vmem:[#allocation8 + $0xb0] sm:$0xff] }
 0x766   :  { %v1603_v14 = vadd.f32 1.0, %v5740_v10  ;;  %v1809_v10 = vld [vmem:[#allocation6 + $0xd8] sm:$0xff]  ;;  %v6609_v56 = vpack.c.bf16 %v1852_v53, %v1849_v51  ;;  %v1868_v51 = vld [vmem:[#allocation8 + $0x130] sm:$0xff]  ;;  %v1871_v53 = vld [vmem:[#allocation8 + $0x148] sm:$0xff] }
 0x767   :  { %5741 = vrcp.f32 %v1596_v8  ;;  %v1806_v8 = vld [vmem:[#allocation6 + $0xc0] sm:$0xff] }
 0x768   :  { %5743 = vrcp.f32 %v1603_v14  ;;  %v1813_v14 = vld [vmem:[#allocation6 + $0xf8] sm:$0xff] }
 0x771   :  { %v5742_v21 = vpop.eup %5741 }
 0x772   :  { %v1607_v26 = vmul.f32 %v5742_v21, %v1606_v19  ;;  %v5744_v34 = vpop.eup %5743  ;;  %v1816_v19 = vld [vmem:[#allocation6 + $0x110] sm:$0xff]  ;;  %v1814_v21 = vld [vmem:[#allocation6 + $0x100] sm:$0xff] }
 0x773   :  { %v1610_v57 = vsub.f32 1.0, %v5744_v34  ;;  %v1612_v50 = vmul.f32 %v5744_v34, %v6522_v30  ;;  %v5086_v34 = vpack.c.bf16 %v1816_v19, %v1813_v14  ;;  %v1854_v19 = vld [vmem:[#allocation8 + $0xc0] sm:$0xff] }
 0x774   :  { %v1608_v29 = vadd.f32 %v1607_v26, %v6293_v9  ;;  %v1795_v9 = vld [vmem:[#allocation6 + $0x68] sm:$0xff]  ;;  %v1817_v26 = vld [vmem:[#allocation6 + $0x118] sm:$0xff] }
 0x775   :  { %v5074_v18 = vpack.c.bf16 %v1798_v12, %v1795_v9  ;;  %v1826_v9 = vld [vmem:[#allocation6 + $0x160] sm:$0xff] }
 0x776   :  { %5745 = vtanh.f32 %v1608_v29  ;;  %v5084_v29 = vpack.c.bf16 %v1809_v10, %v1806_v8  ;;  %v1855_v8 = vld [vmem:[#allocation8 + $0xc8] sm:$0xff]  ;;  %v1858_v10 = vld [vmem:[#allocation8 + $0xe0] sm:$0xff] }
 0x777   :  { %v6615_v14 = vpack.c.bf16 %v1858_v10, %v1855_v8  ;;  %v1877_v8 = vld [vmem:[#allocation8 + $0x178] sm:$0xff] }
 0x780   :  { %v5746_v60 = vpop.eup %5745 }
 0x781   :  { %v1611_v49 = vmul.f32 %v5746_v60, %v1610_v57  ;;  %v5118_v57 = vpack.c.bf16 %v1817_v26, %v1814_v21  ;;  %v1819_v60 = vld [vmem:[#allocation6 + $0x128] sm:$0xff]  ;;  %v1857_v21 = vld [vmem:[#allocation8 + $0xd8] sm:$0xff] }
 0x782   :  { %v5090_v58 = vpack.c.bf16 %v1822_v41, %v1819_v60  ;;  %v6617_v26 = vpack.c.bf16 %v1857_v21, %v1854_v19  ;;  %v1867_v41 = vld [vmem:[#allocation8 + $0x128] sm:$0xff] }
 0x783   :  { %v6564_v28 = vadd.f32 %v1612_v50, %v1611_v49  ;;  %v1823_v49 = vld [vmem:[#allocation6 + $0x148] sm:$0xff]  ;;  %v5088_v50 = vpack.c.bf16 %v1815_v35, %v1812_v32  ;;  %v1860_v32 = vld [vmem:[#allocation8 + $0xf0] sm:$0xff] }
 0x784   :  { %v5122_v43 = vpack.c.bf16 %v1823_v49, %v1820_v47  ;;  %v1863_v35 = vld [vmem:[#allocation8 + $0x108] sm:$0xff]  ;;  %v1870_v47 = vld [vmem:[#allocation8 + $0x140] sm:$0xff] }
 0x785   :  { %1683 = vmatmul.mubr.f32.vlgmr.msra.gmra.mrb[14].mxu0 %v6564_v28  ;;  %4249 = vmatmul.mubr.f32.vlgmr.msra.gmra.mrb[22].mxu1 %v6564_v28  ;;  %v6623_v60 = vpack.c.bf16 %v1863_v35, %v1860_v32  ;;  %v1866_v49 = vld [vmem:[#allocation8 + $0x120] sm:$0xff] }
 0x786   :  { %5069 = vmatpush1.bf16.msra.mxu0 %v5068_v1  ;;  %5101 = vmatpush3.bf16.msra.mxu1 %v5098_v33  ;;  %v5110_v33 = vpack.c.bf16 %v1805_v22, %v1802_v16  ;;  %v1818_v1 = vld [vmem:[#allocation6 + $0x120] sm:$0xff]  ;;  %v1839_v16 = vld [vmem:[#allocation8 + $0x48] sm:$0xff] }
 0x787   :  { %4283 = vmatprep.mubr.f32.mxu1 %v6302_v5  ;;  %5071 = vmatprep.subr.bf16.mxu0 %v5070_v39  ;;  %v1821_v39 = vld [vmem:[#allocation6 + $0x138] sm:$0xff]  ;;  %v6599_v22 = vpack.c.bf16 %v1839_v16, %v1836_v15  ;;  %v1856_v15 = vld [vmem:[#allocation8 + $0xd0] sm:$0xff]  ;;  %v1859_v16 = vld [vmem:[#allocation8 + $0xe8] sm:$0xff] }
 0x788   :  { %5103 = vmatprep.subr.bf16.mxu1 %v5102_v7  ;;  %1974 = vmatprep.mubr.f32.mxu0 %v5940_v0  ;;  %v5092_v12 = vpack.c.bf16 %v1821_v39, %v1818_v1  ;;  %v1835_v1 = vld [vmem:[#allocation8 + $0x28] sm:$0xff] }
 0x78a   :  { %5073 = vmatpush1.bf16.msra.mxu0 %v5072_v17  ;;  %5105 = vmatpush3.bf16.msra.mxu1 %v5102_v7  ;;  %v1829_v7 = vld [vmem:[#allocation6 + $0x178] sm:$0xff]  ;;  %v1824_v17 = vld [vmem:[#allocation6 + $0x150] sm:$0xff] }
 0x78b   :  { %5075 = vmatprep.subr.bf16.mxu0 %v5074_v18  ;;  %5107 = vmatprep.subr.bf16.mxu1 %v5106_v20  ;;  %v5126_v13 = vpack.c.bf16 %v1829_v7, %v1826_v9  ;;  %v1827_v18 = vld [vmem:[#allocation6 + $0x168] sm:$0xff]  ;;  %v1876_v9 = vld [vmem:[#allocation8 + $0x170] sm:$0xff] }
 0x78c   :  { %v6636_v7 = vpack.c.bf16 %v1876_v9, %v1873_v6  ;;  %v5837_v6 = vld [vmem:[%s7053_s4] ss:$0 sm:$0xff] }
 0x78e   :  { %5077 = vmatpush1.bf16.msra.mxu0 %v5076_v23  ;;  %5109 = vmatpush3.bf16.msra.mxu1 %v5106_v20  ;;  %v5096_v20 = vpack.c.bf16 %v1827_v18, %v1824_v17  ;;  %v1843_v23 = vld [vmem:[#allocation8 + $0x68] sm:$0xff]  ;;  %v1838_v17 = vld [vmem:[#allocation8 + $0x40] sm:$0xff]  ;;  %v1841_v18 = vld [vmem:[#allocation8 + $0x58] sm:$0xff] }
 0x78f   :  { %5079 = vmatprep.subr.bf16.mxu0 %v5078_v31  ;;  %5111 = vmatprep.subr.bf16.mxu1 %v5110_v33  ;;  %v1846_v31 = vld [vmem:[#allocation8 + $0x80] sm:$0xff] }
 0x792   :  { %5081 = vmatpush1.bf16.msra.mxu0 %v5080_v61  ;;  %5113 = vmatpush3.bf16.msra.mxu1 %v5110_v33  ;;  %v6603_v33 = vpack.c.bf16 %v1846_v31, %v1843_v23  ;;  %v1848_v61 = vld [vmem:[#allocation8 + $0x90] sm:$0xff]  ;;  %v6655_v23 = vpack.c.bf16 %v1859_v16, %v1856_v15  ;;  %v1862_v31 = vld [vmem:[#allocation8 + $0x100] sm:$0xff] }
 0x793   :  { %5083 = vmatprep.subr.bf16.mxu0 %v5082_v63  ;;  %5115 = vmatprep.subr.bf16.mxu1 %v5114_v3  ;;  %v1851_v63 = vld [vmem:[#allocation8 + $0xa8] sm:$0xff]  ;;  %v6659_v42 = vpack.c.bf16 %v1865_v40, %v1862_v31 }
 0x796   :  { %5085 = vmatpush1.bf16.msra.mxu0 %v5084_v29  ;;  %5117 = vmatpush3.bf16.msra.mxu1 %v5114_v3  ;;  %v6611_v3 = vpack.c.bf16 %v1851_v63, %v1848_v61  ;;  %v1861_v29 = vld [vmem:[#allocation8 + $0xf8] sm:$0xff]  ;;  %v6663_v61 = vpack.c.bf16 %v1871_v53, %v1868_v51  ;;  %v1874_v63 = vld [vmem:[#allocation8 + $0x160] sm:$0xff] }
 0x797   :  { %5087 = vmatprep.subr.bf16.mxu0 %v5086_v34  ;;  %5119 = vmatprep.subr.bf16.mxu1 %v5118_v57  ;;  %v1864_v34 = vld [vmem:[#allocation8 + $0x110] sm:$0xff]  ;;  %v6667_v10 = vpack.c.bf16 %v1877_v8, %v1874_v63 }
 0x79a   :  { %5089 = vmatpush1.bf16.msra.mxu0 %v5088_v50  ;;  %5121 = vmatpush3.bf16.msra.mxu1 %v5118_v57  ;;  %v6621_v57 = vpack.c.bf16 %v1864_v34, %v1861_v29  ;;  %v6627_v50 = vpack.c.bf16 %v1870_v47, %v1867_v41 }
 0x79b   :  { %5091 = vmatprep.subr.bf16.mxu0 %v5090_v58  ;;  %5123 = vmatprep.subr.bf16.mxu1 %v5122_v43  ;;  %v1869_v58 = vld [vmem:[#allocation8 + $0x138] sm:$0xff] }
 0x79c   :  { %v6629_v39 = vpack.c.bf16 %v1869_v58, %v1866_v49 }
 0x79e   :  { %5093 = vmatpush1.bf16.msra.mxu0 %v5092_v12  ;;  %5125 = vmatpush3.bf16.msra.mxu1 %v5122_v43  ;;  %v1832_v43 = vld [vmem:[#allocation8 + $0x10] sm:$0xff] }
 0x79f   :  { %5095 = vmatprep.subr.bf16.mxu0 %v5094_v11  ;;  %5127 = vmatprep.subr.bf16.mxu1 %v5126_v13  ;;  %v6631_v44 = vpack.c.bf16 %v1835_v1, %v1832_v43  ;;  %v1872_v12 = vld [vmem:[#allocation8 + $0x150] sm:$0xff]  ;;  %v1875_v11 = vld [vmem:[#allocation8 + $0x168] sm:$0xff] }
 0x7a2   :  { %5097 = vmatpush1.bf16.msra.mxu0 %v5096_v20  ;;  %5129 = vmatpush3.bf16.msra.mxu1 %v5126_v13  ;;  %v6639_v13 = vpack.c.bf16 %v1875_v11, %v1872_v12  ;;  %v6642_v20 = vpack.c.bf16 %v1841_v18, %v1838_v17 }
 0x7a3   :  { %5162 = vmatprep.subr.bf16.mxu1 %v5941_v48 }
 0x7a5   :  { %1975 = vmatmul.mubr.f32.vlgmr.msra.gmra.mrb[16].mxu0 %v6302_v5  ;;  %4284 = vmatmul.mubr.f32.vlgmr.msra.gmra.mrb[24].mxu1 %v6346_v62  ;;  %v1831_v5 = vld [vmem:[#allocation8 + $0x8] sm:$0xff] }
 0x7a6   :  { %4286 = vmatprep.mubr.f32.mxu1 %v6390_v54  ;;  %1980 = vmatprep.mubr.f32.mxu0 %v5940_v0 }
 0x7a7   :  { %5164 = vmatpush3.bf16.msra.mxu1 %v6631_v44 }
 0x7a8   :  { %5165 = vmatprep.subr.bf16.mxu1 %v5941_v48 }
 0x7a9   :  { %1981 = vmatmul.mubr.f32.gmra.mrb[18].mxu0 %v6346_v62  ;;  %4287 = vmatmul.mubr.f32.gmra.mrb[26].mxu1 %v6434_v46  ;;  %v1834_v62 = vld [vmem:[#allocation8 + $0x20] sm:$0xff] }
 0x7aa   :  { %4289 = vmatprep.mubr.f32.mxu1 %v6478_v38  ;;  %1986 = vmatprep.mubr.f32.mxu0 %v5940_v0 }
 0x7ab   :  { %5167 = vmatpush3.bf16.msra.mxu1 %v6642_v20 }
 0x7ac   :  { %5168 = vmatprep.subr.bf16.mxu1 %v5941_v48 }
 0x7ad   :  { %1987 = vmatmul.mubr.f32.gmra.mrb[20].mxu0 %v6390_v54  ;;  %4290 = vmatmul.mubr.f32.gmra.mrb[28].mxu1 %v6522_v30  ;;  %v6591_v54 = vpack.c.bf16 %v1834_v62, %v1831_v5  ;;  %v1844_v5 = vld [vmem:[#allocation8 + $0x70] sm:$0xff]  ;;  %v1847_v62 = vld [vmem:[#allocation8 + $0x88] sm:$0xff] }
 0x7ae   :  { %4292 = vmatprep.mubr.f32.mxu1 %v6564_v28  ;;  %1992 = vmatprep.mubr.f32.mxu0 %v5940_v0 }
 0x7af   :  { %5131 = vmatprep.subr.bf16.mxu0 %v6591_v54 }
 0x7b1   :  { %1993 = vmatmul.mubr.f32.gmra.mrb[22].mxu0 %v6434_v46  ;;  %v1833_v46 = vld [vmem:[#allocation8 + $0x18] sm:$0xff] }
 0x7b2   :  { %1998 = vmatprep.mubr.f32.mxu0 %v5940_v0  ;;  %v6593_v25 = vpack.c.bf16 %v1833_v46, %v1830_v24  ;;  %v1850_v24 = vld [vmem:[#allocation8 + $0xa0] sm:$0xff]  ;;  %v6648_v46 = vpack.c.bf16 %v1847_v62, %v1844_v5 }
 0x7b4   :  { %5133 = vmatpush1.bf16.msra.mxu0 %v6593_v25  ;;  %5170 = vmatpush3.bf16.msra.mxu1 %v6648_v46 }
 0x7b5   :  { %1999 = vmatmul.mubr.f32.gmra.mrb[24].mxu0 %v6478_v38  ;;  %v1837_v38 = vld [vmem:[#allocation8 + $0x38] sm:$0xff]  ;;  %5171 = vmatprep.subr.bf16.mxu1 %v5941_v48 }
 0x7b6   :  { %2004 = vmatprep.mubr.f32.mxu0 %v5940_v0 }
 0x7b9   :  { %2005 = vmatmul.mubr.f32.gmra.mrb[26].mxu0 %v6522_v30  ;;  %v1840_v30 = vld [vmem:[#allocation8 + $0x50] sm:$0xff] }
 0x7ba   :  { %2010 = vmatprep.mubr.f32.mxu0 %v5940_v0  ;;  %v6597_v27 = vpack.c.bf16 %v1840_v30, %v1837_v38  ;;  %v1853_v38 = vld [vmem:[#allocation8 + $0xb8] sm:$0xff] }
 0x7bb   :  { %v6651_v30 = vpack.c.bf16 %v1853_v38, %v1850_v24 }
 0x7bc   :  { %5135 = vmatprep.subr.bf16.mxu0 %v6597_v27 }
 0x7bd   :  { %2011 = vmatmul.mubr.f32.gmra.mrb[28].mxu0 %v6564_v28  ;;  %5173 = vmatpush3.bf16.msra.mxu1 %v6651_v30 }
 0x7be   :  { %2016 = vmatprep.mubr.f32.mxu0 %v5940_v0  ;;  %5137 = vmatpush1.bf16.msra.mxu0 %v6599_v22 }
 0x7bf   :  { %5139 = vmatprep.subr.bf16.mxu0 %v6603_v33  ;;  %5174 = vmatprep.subr.bf16.mxu1 %v5941_v48 }
 0x7c1   :  { %5176 = vmatpush3.bf16.msra.mxu1 %v6655_v23 }
 0x7c2   :  { %5141 = vmatpush1.bf16.msra.mxu0 %v6605_v45  ;;  %5177 = vmatprep.subr.bf16.mxu1 %v5941_v48 }
 0x7c3   :  { %5143 = vmatprep.subr.bf16.mxu0 %v6609_v56 }
 0x7c5   :  { %5179 = vmatpush3.bf16.msra.mxu1 %v6659_v42 }
 0x7c6   :  { %5145 = vmatpush1.bf16.msra.mxu0 %v6611_v3  ;;  %5180 = vmatprep.subr.bf16.mxu1 %v5941_v48 }
 0x7c7   :  { %5147 = vmatprep.subr.bf16.mxu0 %v6615_v14 }
 0x7c9   :  { %5182 = vmatpush3.bf16.msra.mxu1 %v6663_v61 }
 0x7ca   :  { %5149 = vmatpush1.bf16.msra.mxu0 %v6617_v26  ;;  %5183 = vmatprep.subr.bf16.mxu1 %v5941_v48 }
 0x7cb   :  { %5151 = vmatprep.subr.bf16.mxu0 %v6621_v57 }
 0x7cd   :  { %5185 = vmatpush3.bf16.msra.mxu1 %v6667_v10 }
 0x7ce   :  { %5153 = vmatpush1.bf16.msra.mxu0 %v6623_v60  ;;  %5218 = vmatprep.subr.bf16.mxu1 %v5941_v48 }
 0x7cf   :  { %5155 = vmatprep.subr.bf16.mxu0 %v6627_v50 }
 0x7d2   :  { %5157 = vmatpush1.bf16.msra.mxu0 %v6629_v39 }
 0x7d3   :  { %5159 = vmatprep.subr.bf16.mxu0 %v6636_v7 }
 0x7d6   :  { %5161 = vmatpush1.bf16.msra.mxu0 %v6639_v13 }
 0x7d7   :  { %5187 = vmatprep.subr.bf16.mxu0 %v6591_v54 }
 0x858   :  { %v1684_v19 = vpop.f32.mrb[14].mxu0  ;;  %v1755_v21 = vpop.f32.mrb[22].mxu1 }
 0x859   :  { %v5616_v29 = vadd.f32 %v1684_v19, %v6282_v59  ;;  %v1686_v34 = vpop.f32.mrb[15].mxu0  ;;  %v4250_v32 = vpop.f32.mrb[23].mxu1  ;;  %v1773_v9 = vadd.f32 %v5837_v6, %v1755_v21 }
 0x85a   :  { %v5617_v41 = vadd.f32 %v1686_v34, %v6288_v2 }
 0x85b   :  { %v3612_v35 = vmul.f32 -1.442695, %v5616_v29 }
 0x85c   :  { %v3613_v47 = vmul.f32 -1.442695, %v5617_v41 }
 0x85d   :  { %5747 = vpow2.f32 %v3612_v35 }
 0x85e   :  { %5749 = vpow2.f32 %v3613_v47 }
 0x867   :  { %v5748_v49 = vpop.eup %5747 }
 0x868   :  { %v1763_v58 = vadd.f32 1.0, %v5748_v49  ;;  %v5750_v43 = vpop.eup %5749 }
 0x869   :  { %v1770_v1 = vadd.f32 1.0, %v5750_v43 }
 0x86a   :  { %5751 = vrcp.f32 %v1763_v58 }
 0x86b   :  { %5753 = vrcp.f32 %v1770_v1 }
 0x874   :  { %v5752_v12 = vpop.eup %5751 }
 0x875   :  { %v1774_v59 = vmul.f32 %v5752_v12, %v1773_v9  ;;  %v5754_v62 = vpop.eup %5753 }
 0x876   :  { %v1777_v15 = vsub.f32 1.0, %v5754_v62  ;;  %v1779_v40 = vmul.f32 %v5754_v62, %v6564_v28  ;;  %v1878_v28 = vld [vmem:[%s7056_s7] sm:$0x7] }
 0x877   :  { %v1775_v11 = vadd.f32 %v1774_v59, %v6290_v4  ;;  %v6740_v63 = vrot.slane %v1878_v28, %v166_v52  ;;  %v6744_v19 = vrot.slane %v1878_v28, %v170_v55  ;;  %v6751_v55 = vld [vmem:[%s7057_s8] ss:$0 sm:$0xff]  ;;  %v6755_v43 = vrot.slane %v1878_v28, %v174_v37 }
 0x878   :  { %v6678_v17 = vpop.f32.mrb[24].mxu1 }
 0x879   :  { %5755 = vtanh.f32 %v1775_v11  ;;  %v6680_v2 = vpop.f32.mrb[25].mxu1 }
 0x87a   :  { %v2090_v12 = vadd.f32 %v6680_v2, %v6755_v43 }
 0x87c   :  { %v6682_v18 = vpop.f32.mrb[26].mxu1 }
 0x87d   :  { %v6684_v5 = vpop.f32.mrb[27].mxu1 }
 0x880   :  { %v6686_v24 = vpop.f32.mrb[28].mxu1 }
 0x881   :  { %v6688_v38 = vpop.f32.mrb[29].mxu1 }
 0x883   :  { %v5756_v16 = vpop.eup %5755 }
 0x884   :  { %v1778_v31 = vmul.f32 %v5756_v16, %v1777_v15 }
 0x886   :  { %v1780_v4 = vadd.f32 %v1779_v40, %v1778_v31 }
 0x888   :  { %2017 = vmatmul.mubr.f32.gmra.mrb[30].mxu0 %v1780_v4  ;;  %4293 = vmatmul.mubr.f32.gmra.mrb[30].mxu1 %v1780_v4 }
 0x889   :  { %2219 = vmatprep.mubr.f32.mxu0 %v5940_v0  ;;  %4327 = vmatprep.mubr.msk.f32.mxu1 %vm5942_vm1, %v5940_v0 }
 0x88c   :  { %2220 = vmatmul.mubr.f32.vlgmr.msra.gmra.mrb[16].mxu0 %v5940_v0  ;;  %4328 = vmatmul.mubr.f32.vlgmr.msra.gmra.mrb[32].mxu1 %v5940_v0 }
 0x88d   :  { %5189 = vmatpush1.bf16.msra.mxu0 %v6593_v25  ;;  %5220 = vmatpush3.bf16.msra.mxu1 %v6631_v44 }
 0x88e   :  { %5191 = vmatprep.subr.bf16.mxu0 %v6597_v27  ;;  %5221 = vmatprep.subr.bf16.mxu1 %v5941_v48 }
 0x88f   :  { %2385 = vmatprep.mubr.f32.mxu0 %v5940_v0  ;;  %4362 = vmatprep.mubr.msk.f32.mxu1 %vm5942_vm1, %v5940_v0 }
 0x891   :  { %5193 = vmatpush1.bf16.msra.mxu0 %v6599_v22  ;;  %5223 = vmatpush3.bf16.msra.mxu1 %v6642_v20 }
 0x892   :  { %5195 = vmatprep.subr.bf16.mxu0 %v6603_v33  ;;  %5224 = vmatprep.subr.bf16.mxu1 %v5941_v48 }
 0x895   :  { %5197 = vmatpush1.bf16.msra.mxu0 %v6605_v45  ;;  %5226 = vmatpush3.bf16.msra.mxu1 %v6648_v46 }
 0x896   :  { %5199 = vmatprep.subr.bf16.mxu0 %v6609_v56  ;;  %5227 = vmatprep.subr.bf16.mxu1 %v5941_v48 }
 0x899   :  { %5201 = vmatpush1.bf16.msra.mxu0 %v6611_v3  ;;  %5229 = vmatpush3.bf16.msra.mxu1 %v6651_v30 }
 0x89a   :  { %5203 = vmatprep.subr.bf16.mxu0 %v6615_v14  ;;  %5230 = vmatprep.subr.bf16.mxu1 %v5941_v48 }
 0x89d   :  { %5205 = vmatpush1.bf16.msra.mxu0 %v6617_v26  ;;  %5232 = vmatpush3.bf16.msra.mxu1 %v6655_v23 }
 0x89e   :  { %5207 = vmatprep.subr.bf16.mxu0 %v6621_v57  ;;  %5233 = vmatprep.subr.bf16.mxu1 %v5941_v48 }
 0x8a1   :  { %5209 = vmatpush1.bf16.msra.mxu0 %v6623_v60  ;;  %5235 = vmatpush3.bf16.msra.mxu1 %v6659_v42 }
 0x8a2   :  { %5211 = vmatprep.subr.bf16.mxu0 %v6627_v50  ;;  %5236 = vmatprep.subr.bf16.mxu1 %v5941_v48 }
 0x8a5   :  { %5213 = vmatpush1.bf16.msra.mxu0 %v6629_v39  ;;  %5238 = vmatpush3.bf16.msra.mxu1 %v6663_v61 }
 0x8a6   :  { %5215 = vmatprep.subr.bf16.mxu0 %v6636_v7  ;;  %5239 = vmatprep.subr.bf16.mxu1 %v5941_v48 }
 0x8a9   :  { %5217 = vmatpush1.bf16.msra.mxu0 %v6639_v13  ;;  %5241 = vmatpush3.bf16.msra.mxu1 %v6667_v10 }
 0x8aa   :  { %5243 = vmatprep.subr.bf16.mxu0 %v6591_v54  ;;  %5274 = vmatprep.subr.bf16.mxu1 %v5941_v48 }
 0x95b   :  { %v6734_v51 = vpop.f32.mrb[30].mxu1 }
 0x95c   :  { %v6736_v53 = vpop.f32.mrb[31].mxu1 }
 0x95f   :  { %v2221_v8 = vpop.f32.mrb[16].mxu0  ;;  %v2292_v21 = vpop.f32.mrb[32].mxu1 }
 0x960   :  { %v5618_v29 = vadd.f32 %v2221_v8, %v6740_v63  ;;  %v2223_v34 = vpop.f32.mrb[17].mxu0  ;;  %v4329_v32 = vpop.f32.mrb[33].mxu1  ;;  %v2310_v6 = vadd.f32 %v6751_v55, %v2292_v21 }
 0x961   :  { %v5619_v41 = vadd.f32 %v2223_v34, %v6744_v19 }
 0x962   :  { %v3615_v35 = vmul.f32 -1.442695, %v5618_v29 }
 0x963   :  { %v3616_v47 = vmul.f32 -1.442695, %v5619_v41 }
 0x964   :  { %5757 = vpow2.f32 %v3615_v35 }
 0x965   :  { %5759 = vpow2.f32 %v3616_v47 }
 0x96e   :  { %v5758_v49 = vpop.eup %5757 }
 0x96f   :  { %v2300_v58 = vadd.f32 1.0, %v5758_v49  ;;  %v5760_v52 = vpop.eup %5759 }
 0x970   :  { %v2307_v1 = vadd.f32 1.0, %v5760_v52  ;;  %v2095_v52 = vadd.f32 %v6678_v17, %v6755_v43 }
 0x971   :  { %5761 = vrcp.f32 %v2300_v58 }
 0x972   :  { %5763 = vrcp.f32 %v2307_v1 }
 0x97b   :  { %v5762_v9 = vpop.eup %5761 }
 0x97c   :  { %v2311_v59 = vmul.f32 %v5762_v9, %v2310_v6  ;;  %v5764_v62 = vpop.eup %5763 }
 0x97d   :  { %v2314_v15 = vsub.f32 1.0, %v5764_v62  ;;  %v2316_v40 = vmul.f32 0.0, %v5764_v62 }
 0x97e   :  { %v2312_v11 = vadd.f32 %v2311_v59, %v2090_v12 }
 0x980   :  { %5765 = vtanh.f32 %v2312_v11 }
 0x98a   :  { %v5766_v16 = vpop.eup %5765 }
 0x98b   :  { %v2315_v31 = vmul.f32 %v5766_v16, %v2314_v15 }
 0x98d   :  { %v6760_v4 = vadd.f32 %v2316_v40, %v2315_v31 }
 0x98f   :  { %2386 = vmatmul.mubr.f32.vlgmr.msra.gmra.mrb[18].mxu0 %v6760_v4  ;;  %4363 = vmatmul.mubr.f32.vlgmr.msra.gmra.mrb[34].mxu1 %v6760_v4 }
 0x990   :  { %5245 = vmatpush1.bf16.msra.mxu0 %v6593_v25  ;;  %5276 = vmatpush3.bf16.msra.mxu1 %v6631_v44 }
 0x991   :  { %5247 = vmatprep.subr.bf16.mxu0 %v6597_v27  ;;  %5277 = vmatprep.subr.bf16.mxu1 %v5941_v48 }
 0x992   :  { %2551 = vmatprep.mubr.f32.mxu0 %v5940_v0  ;;  %4397 = vmatprep.mubr.msk.f32.mxu1 %vm5942_vm1, %v5940_v0 }
 0x994   :  { %5249 = vmatpush1.bf16.msra.mxu0 %v6599_v22  ;;  %5279 = vmatpush3.bf16.msra.mxu1 %v6642_v20 }
 0x995   :  { %5251 = vmatprep.subr.bf16.mxu0 %v6603_v33  ;;  %5280 = vmatprep.subr.bf16.mxu1 %v5941_v48 }
 0x998   :  { %5253 = vmatpush1.bf16.msra.mxu0 %v6605_v45  ;;  %5282 = vmatpush3.bf16.msra.mxu1 %v6648_v46 }
 0x999   :  { %5255 = vmatprep.subr.bf16.mxu0 %v6609_v56  ;;  %5283 = vmatprep.subr.bf16.mxu1 %v5941_v48 }
 0x99c   :  { %5257 = vmatpush1.bf16.msra.mxu0 %v6611_v3  ;;  %5285 = vmatpush3.bf16.msra.mxu1 %v6651_v30 }
 0x99d   :  { %5259 = vmatprep.subr.bf16.mxu0 %v6615_v14  ;;  %5286 = vmatprep.subr.bf16.mxu1 %v5941_v48 }
 0x9a0   :  { %5261 = vmatpush1.bf16.msra.mxu0 %v6617_v26  ;;  %5288 = vmatpush3.bf16.msra.mxu1 %v6655_v23 }
 0x9a1   :  { %5263 = vmatprep.subr.bf16.mxu0 %v6621_v57  ;;  %5289 = vmatprep.subr.bf16.mxu1 %v5941_v48 }
 0x9a4   :  { %5265 = vmatpush1.bf16.msra.mxu0 %v6623_v60  ;;  %5291 = vmatpush3.bf16.msra.mxu1 %v6659_v42 }
 0x9a5   :  { %5267 = vmatprep.subr.bf16.mxu0 %v6627_v50  ;;  %5292 = vmatprep.subr.bf16.mxu1 %v5941_v48 }
 0x9a8   :  { %5269 = vmatpush1.bf16.msra.mxu0 %v6629_v39  ;;  %5294 = vmatpush3.bf16.msra.mxu1 %v6663_v61 }
 0x9a9   :  { %5271 = vmatprep.subr.bf16.mxu0 %v6636_v7  ;;  %5295 = vmatprep.subr.bf16.mxu1 %v5941_v48 }
 0x9ac   :  { %5273 = vmatpush1.bf16.msra.mxu0 %v6639_v13  ;;  %5297 = vmatpush3.bf16.msra.mxu1 %v6667_v10 }
 0x9ad   :  { %5299 = vmatprep.subr.bf16.mxu0 %v6591_v54  ;;  %5330 = vmatprep.subr.bf16.mxu1 %v5941_v48 }
 0xa62   :  { %v2387_v36 = vpop.f32.mrb[18].mxu0  ;;  %v2458_v37 = vpop.f32.mrb[34].mxu1 }
 0xa63   :  { %v5620_v2 = vadd.f32 %v2387_v36, %v6740_v63  ;;  %v2389_v28 = vpop.f32.mrb[19].mxu0  ;;  %v4364_v8 = vpop.f32.mrb[35].mxu1  ;;  %v2476_v49 = vadd.f32 %v6751_v55, %v2458_v37 }
 0xa64   :  { %v5621_v29 = vadd.f32 %v2389_v28, %v6744_v19 }
 0xa65   :  { %v3617_v21 = vmul.f32 -1.442695, %v5620_v2 }
 0xa66   :  { %v3618_v34 = vmul.f32 -1.442695, %v5621_v29 }
 0xa67   :  { %5767 = vpow2.f32 %v3617_v21 }
 0xa68   :  { %5769 = vpow2.f32 %v3618_v34 }
 0xa71   :  { %v5768_v32 = vpop.eup %5767 }
 0xa72   :  { %v2466_v35 = vadd.f32 1.0, %v5768_v32  ;;  %v5770_v41 = vpop.eup %5769 }
 0xa73   :  { %v2473_v47 = vadd.f32 1.0, %v5770_v41 }
 0xa74   :  { %5771 = vrcp.f32 %v2466_v35  ;;  %v2100_v35 = vadd.f32 %v6684_v5, %v6755_v43 }
 0xa75   :  { %5773 = vrcp.f32 %v2473_v47 }
 0xa7e   :  { %v5772_v58 = vpop.eup %5771 }
 0xa7f   :  { %v2477_v1 = vmul.f32 %v5772_v58, %v2476_v49  ;;  %v5774_v9 = vpop.eup %5773 }
 0xa80   :  { %v2480_v12 = vsub.f32 1.0, %v5774_v9  ;;  %v2482_v62 = vmul.f32 %v5774_v9, %v6760_v4 }
 0xa81   :  { %v2478_v6 = vadd.f32 %v2477_v1, %v2095_v52 }
 0xa83   :  { %5775 = vtanh.f32 %v2478_v6 }
 0xa8d   :  { %v5776_v59 = vpop.eup %5775 }
 0xa8e   :  { %v2481_v11 = vmul.f32 %v5776_v59, %v2480_v12 }
 0xa90   :  { %v6805_v15 = vadd.f32 %v2482_v62, %v2481_v11 }
 0xa92   :  { %2552 = vmatmul.mubr.f32.vlgmr.msra.gmra.mrb[20].mxu0 %v6805_v15  ;;  %4398 = vmatmul.mubr.f32.vlgmr.msra.gmra.mrb[36].mxu1 %v6805_v15 }
 0xa93   :  { %5301 = vmatpush1.bf16.msra.mxu0 %v6593_v25  ;;  %5332 = vmatpush3.bf16.msra.mxu1 %v6631_v44 }
 0xa94   :  { %5303 = vmatprep.subr.bf16.mxu0 %v6597_v27  ;;  %5333 = vmatprep.subr.bf16.mxu1 %v5941_v48 }
 0xa95   :  { %2717 = vmatprep.mubr.f32.mxu0 %v5940_v0  ;;  %4432 = vmatprep.mubr.msk.f32.mxu1 %vm5942_vm1, %v5940_v0 }
 0xa97   :  { %5305 = vmatpush1.bf16.msra.mxu0 %v6599_v22  ;;  %5335 = vmatpush3.bf16.msra.mxu1 %v6642_v20 }
 0xa98   :  { %5307 = vmatprep.subr.bf16.mxu0 %v6603_v33  ;;  %5336 = vmatprep.subr.bf16.mxu1 %v5941_v48 }
 0xa9b   :  { %5309 = vmatpush1.bf16.msra.mxu0 %v6605_v45  ;;  %5338 = vmatpush3.bf16.msra.mxu1 %v6648_v46 }
 0xa9c   :  { %5311 = vmatprep.subr.bf16.mxu0 %v6609_v56  ;;  %5339 = vmatprep.subr.bf16.mxu1 %v5941_v48 }
 0xa9f   :  { %5313 = vmatpush1.bf16.msra.mxu0 %v6611_v3  ;;  %5341 = vmatpush3.bf16.msra.mxu1 %v6651_v30 }
 0xaa0   :  { %5315 = vmatprep.subr.bf16.mxu0 %v6615_v14  ;;  %5342 = vmatprep.subr.bf16.mxu1 %v5941_v48 }
 0xaa3   :  { %5317 = vmatpush1.bf16.msra.mxu0 %v6617_v26  ;;  %5344 = vmatpush3.bf16.msra.mxu1 %v6655_v23 }
 0xaa4   :  { %5319 = vmatprep.subr.bf16.mxu0 %v6621_v57  ;;  %5345 = vmatprep.subr.bf16.mxu1 %v5941_v48 }
 0xaa7   :  { %5321 = vmatpush1.bf16.msra.mxu0 %v6623_v60  ;;  %5347 = vmatpush3.bf16.msra.mxu1 %v6659_v42 }
 0xaa8   :  { %5323 = vmatprep.subr.bf16.mxu0 %v6627_v50  ;;  %5348 = vmatprep.subr.bf16.mxu1 %v5941_v48 }
 0xaab   :  { %5325 = vmatpush1.bf16.msra.mxu0 %v6629_v39  ;;  %5350 = vmatpush3.bf16.msra.mxu1 %v6663_v61 }
 0xaac   :  { %5327 = vmatprep.subr.bf16.mxu0 %v6636_v7  ;;  %5351 = vmatprep.subr.bf16.mxu1 %v5941_v48 }
 0xaaf   :  { %5329 = vmatpush1.bf16.msra.mxu0 %v6639_v13  ;;  %5353 = vmatpush3.bf16.msra.mxu1 %v6667_v10 }
 0xab0   :  { %5355 = vmatprep.subr.bf16.mxu0 %v6591_v54  ;;  %5386 = vmatprep.subr.bf16.mxu1 %v5941_v48 }
 0xb65   :  { %v2553_v17 = vpop.f32.mrb[20].mxu0  ;;  %v2624_v16 = vpop.f32.mrb[36].mxu1 }
 0xb66   :  { %v5622_v31 = vadd.f32 %v2553_v17, %v6740_v63  ;;  %v2555_v40 = vpop.f32.mrb[21].mxu0  ;;  %v4399_v4 = vpop.f32.mrb[37].mxu1  ;;  %v2642_v34 = vadd.f32 %v6751_v55, %v2624_v16 }
 0xb67   :  { %v5623_v37 = vadd.f32 %v2555_v40, %v6744_v19 }
 0xb68   :  { %v3619_v36 = vmul.f32 -1.442695, %v5622_v31 }
 0xb69   :  { %v3620_v2 = vmul.f32 -1.442695, %v5623_v37 }
 0xb6a   :  { %5777 = vpow2.f32 %v3619_v36 }
 0xb6b   :  { %5779 = vpow2.f32 %v3620_v2 }
 0xb74   :  { %v5778_v28 = vpop.eup %5777 }
 0xb75   :  { %v2632_v8 = vadd.f32 1.0, %v5778_v28  ;;  %v5780_v21 = vpop.eup %5779  ;;  %v2105_v28 = vadd.f32 %v6682_v18, %v6755_v43 }
 0xb76   :  { %v2639_v29 = vadd.f32 1.0, %v5780_v21 }
 0xb77   :  { %5781 = vrcp.f32 %v2632_v8 }
 0xb78   :  { %5783 = vrcp.f32 %v2639_v29 }
 0xb81   :  { %v5782_v32 = vpop.eup %5781 }
 0xb82   :  { %v2643_v41 = vmul.f32 %v5782_v32, %v2642_v34  ;;  %v5784_v49 = vpop.eup %5783 }
 0xb83   :  { %v2646_v58 = vsub.f32 1.0, %v5784_v49  ;;  %v2648_v6 = vmul.f32 %v5784_v49, %v6805_v15 }
 0xb84   :  { %v2644_v47 = vadd.f32 %v2643_v41, %v2100_v35 }
 0xb86   :  { %5785 = vtanh.f32 %v2644_v47 }
 0xb90   :  { %v5786_v52 = vpop.eup %5785 }
 0xb91   :  { %v2647_v1 = vmul.f32 %v5786_v52, %v2646_v58 }
 0xb93   :  { %v6850_v9 = vadd.f32 %v2648_v6, %v2647_v1 }
 0xb95   :  { %2718 = vmatmul.mubr.f32.vlgmr.msra.gmra.mrb[22].mxu0 %v6850_v9  ;;  %4433 = vmatmul.mubr.f32.vlgmr.msra.gmra.mrb[38].mxu1 %v6850_v9 }
 0xb96   :  { %5357 = vmatpush1.bf16.msra.mxu0 %v6593_v25  ;;  %5388 = vmatpush3.bf16.msra.mxu1 %v6631_v44 }
 0xb97   :  { %5359 = vmatprep.subr.bf16.mxu0 %v6597_v27  ;;  %5389 = vmatprep.subr.bf16.mxu1 %v5941_v48 }
 0xb98   :  { %2883 = vmatprep.mubr.f32.mxu0 %v5940_v0  ;;  %4467 = vmatprep.mubr.msk.f32.mxu1 %vm5942_vm1, %v5940_v0 }
 0xb9a   :  { %5361 = vmatpush1.bf16.msra.mxu0 %v6599_v22  ;;  %5391 = vmatpush3.bf16.msra.mxu1 %v6642_v20 }
 0xb9b   :  { %5363 = vmatprep.subr.bf16.mxu0 %v6603_v33  ;;  %5392 = vmatprep.subr.bf16.mxu1 %v5941_v48 }
 0xb9e   :  { %5365 = vmatpush1.bf16.msra.mxu0 %v6605_v45  ;;  %5394 = vmatpush3.bf16.msra.mxu1 %v6648_v46 }
 0xb9f   :  { %5367 = vmatprep.subr.bf16.mxu0 %v6609_v56  ;;  %5395 = vmatprep.subr.bf16.mxu1 %v5941_v48 }
 0xba2   :  { %5369 = vmatpush1.bf16.msra.mxu0 %v6611_v3  ;;  %5397 = vmatpush3.bf16.msra.mxu1 %v6651_v30 }
 0xba3   :  { %5371 = vmatprep.subr.bf16.mxu0 %v6615_v14  ;;  %5398 = vmatprep.subr.bf16.mxu1 %v5941_v48 }
 0xba6   :  { %5373 = vmatpush1.bf16.msra.mxu0 %v6617_v26  ;;  %5400 = vmatpush3.bf16.msra.mxu1 %v6655_v23 }
 0xba7   :  { %5375 = vmatprep.subr.bf16.mxu0 %v6621_v57  ;;  %5401 = vmatprep.subr.bf16.mxu1 %v5941_v48 }
 0xbaa   :  { %5377 = vmatpush1.bf16.msra.mxu0 %v6623_v60  ;;  %5403 = vmatpush3.bf16.msra.mxu1 %v6659_v42 }
 0xbab   :  { %5379 = vmatprep.subr.bf16.mxu0 %v6627_v50  ;;  %5404 = vmatprep.subr.bf16.mxu1 %v5941_v48 }
 0xbae   :  { %5381 = vmatpush1.bf16.msra.mxu0 %v6629_v39  ;;  %5406 = vmatpush3.bf16.msra.mxu1 %v6663_v61 }
 0xbaf   :  { %5383 = vmatprep.subr.bf16.mxu0 %v6636_v7  ;;  %5407 = vmatprep.subr.bf16.mxu1 %v5941_v48 }
 0xbb2   :  { %5385 = vmatpush1.bf16.msra.mxu0 %v6639_v13  ;;  %5409 = vmatpush3.bf16.msra.mxu1 %v6667_v10 }
 0xbb3   :  { %5411 = vmatprep.subr.bf16.mxu0 %v6591_v54  ;;  %5442 = vmatprep.subr.bf16.mxu1 %v5941_v48 }
 0xc68   :  { %v2719_v5 = vpop.f32.mrb[22].mxu0  ;;  %v2790_v12 = vpop.f32.mrb[38].mxu1 }
 0xc69   :  { %v5624_v59 = vadd.f32 %v2719_v5, %v6740_v63  ;;  %v2721_v11 = vpop.f32.mrb[23].mxu0  ;;  %v4434_v62 = vpop.f32.mrb[39].mxu1  ;;  %v2808_v37 = vadd.f32 %v6751_v55, %v2790_v12 }
 0xc6a   :  { %v5625_v17 = vadd.f32 %v2721_v11, %v6744_v19 }
 0xc6b   :  { %v3621_v15 = vmul.f32 -1.442695, %v5624_v59 }
 0xc6c   :  { %v3622_v16 = vmul.f32 -1.442695, %v5625_v17 }
 0xc6d   :  { %5787 = vpow2.f32 %v3621_v15 }
 0xc6e   :  { %5789 = vpow2.f32 %v3622_v16  ;;  %v2110_v16 = vadd.f32 %v6688_v38, %v6755_v43 }
 0xc77   :  { %v5788_v31 = vpop.eup %5787 }
 0xc78   :  { %v2798_v40 = vadd.f32 1.0, %v5788_v31  ;;  %v5790_v4 = vpop.eup %5789 }
 0xc79   :  { %v2805_v36 = vadd.f32 1.0, %v5790_v4 }
 0xc7a   :  { %5791 = vrcp.f32 %v2798_v40 }
 0xc7b   :  { %5793 = vrcp.f32 %v2805_v36 }
 0xc84   :  { %v5792_v2 = vpop.eup %5791 }
 0xc85   :  { %v2809_v8 = vmul.f32 %v5792_v2, %v2808_v37  ;;  %v5794_v29 = vpop.eup %5793 }
 0xc86   :  { %v2812_v34 = vsub.f32 1.0, %v5794_v29  ;;  %v2814_v41 = vmul.f32 %v5794_v29, %v6850_v9 }
 0xc87   :  { %v2810_v21 = vadd.f32 %v2809_v8, %v2105_v28 }
 0xc89   :  { %5795 = vtanh.f32 %v2810_v21 }
 0xc93   :  { %v5796_v32 = vpop.eup %5795 }
 0xc94   :  { %v2813_v35 = vmul.f32 %v5796_v32, %v2812_v34 }
 0xc96   :  { %v6895_v47 = vadd.f32 %v2814_v41, %v2813_v35 }
 0xc98   :  { %2884 = vmatmul.mubr.f32.vlgmr.msra.gmra.mrb[24].mxu0 %v6895_v47  ;;  %4468 = vmatmul.mubr.f32.vlgmr.msra.gmra.mrb[40].mxu1 %v6895_v47 }
 0xc99   :  { %5413 = vmatpush1.bf16.msra.mxu0 %v6593_v25  ;;  %5444 = vmatpush3.bf16.msra.mxu1 %v6631_v44 }
 0xc9a   :  { %5415 = vmatprep.subr.bf16.mxu0 %v6597_v27  ;;  %5445 = vmatprep.subr.bf16.mxu1 %v5941_v48 }
 0xc9b   :  { %3049 = vmatprep.mubr.f32.mxu0 %v5940_v0  ;;  %4502 = vmatprep.mubr.msk.f32.mxu1 %vm5942_vm1, %v5940_v0 }
 0xc9d   :  { %5417 = vmatpush1.bf16.msra.mxu0 %v6599_v22  ;;  %5447 = vmatpush3.bf16.msra.mxu1 %v6642_v20 }
 0xc9e   :  { %5419 = vmatprep.subr.bf16.mxu0 %v6603_v33  ;;  %5448 = vmatprep.subr.bf16.mxu1 %v5941_v48 }
 0xca1   :  { %5421 = vmatpush1.bf16.msra.mxu0 %v6605_v45  ;;  %5450 = vmatpush3.bf16.msra.mxu1 %v6648_v46 }
 0xca2   :  { %5423 = vmatprep.subr.bf16.mxu0 %v6609_v56  ;;  %5451 = vmatprep.subr.bf16.mxu1 %v5941_v48 }
 0xca5   :  { %5425 = vmatpush1.bf16.msra.mxu0 %v6611_v3  ;;  %5453 = vmatpush3.bf16.msra.mxu1 %v6651_v30 }
 0xca6   :  { %5427 = vmatprep.subr.bf16.mxu0 %v6615_v14  ;;  %5454 = vmatprep.subr.bf16.mxu1 %v5941_v48 }
 0xca9   :  { %5429 = vmatpush1.bf16.msra.mxu0 %v6617_v26  ;;  %5456 = vmatpush3.bf16.msra.mxu1 %v6655_v23 }
 0xcaa   :  { %5431 = vmatprep.subr.bf16.mxu0 %v6621_v57  ;;  %5457 = vmatprep.subr.bf16.mxu1 %v5941_v48 }
 0xcad   :  { %5433 = vmatpush1.bf16.msra.mxu0 %v6623_v60  ;;  %5459 = vmatpush3.bf16.msra.mxu1 %v6659_v42 }
 0xcae   :  { %5435 = vmatprep.subr.bf16.mxu0 %v6627_v50  ;;  %5460 = vmatprep.subr.bf16.mxu1 %v5941_v48 }
 0xcb1   :  { %5437 = vmatpush1.bf16.msra.mxu0 %v6629_v39  ;;  %5462 = vmatpush3.bf16.msra.mxu1 %v6663_v61 }
 0xcb2   :  { %5439 = vmatprep.subr.bf16.mxu0 %v6636_v7  ;;  %5463 = vmatprep.subr.bf16.mxu1 %v5941_v48 }
 0xcb5   :  { %5441 = vmatpush1.bf16.msra.mxu0 %v6639_v13  ;;  %5465 = vmatpush3.bf16.msra.mxu1 %v6667_v10 }
 0xcb6   :  { %5467 = vmatprep.subr.bf16.mxu0 %v6591_v54  ;;  %5498 = vmatprep.subr.bf16.mxu1 %v5941_v48 }
 0xd6b   :  { %v2885_v18 = vpop.f32.mrb[24].mxu0  ;;  %v2956_v49 = vpop.f32.mrb[40].mxu1 }
 0xd6c   :  { %v5626_v58 = vadd.f32 %v2885_v18, %v6740_v63  ;;  %v2887_v52 = vpop.f32.mrb[25].mxu0  ;;  %v4469_v1 = vpop.f32.mrb[41].mxu1  ;;  %v2974_v15 = vadd.f32 %v6751_v55, %v2956_v49 }
 0xd6d   :  { %v5627_v9 = vadd.f32 %v2887_v52, %v6744_v19 }
 0xd6e   :  { %v3623_v6 = vmul.f32 -1.442695, %v5626_v58 }
 0xd6f   :  { %v3624_v5 = vmul.f32 -1.442695, %v5627_v9 }
 0xd70   :  { %5797 = vpow2.f32 %v3623_v6  ;;  %v2115_v6 = vadd.f32 %v6686_v24, %v6755_v43  ;;  %v3480_v24 = vld [vmem:[#allocation9] sm:$0xff] }
 0xd71   :  { %5799 = vpow2.f32 %v3624_v5 }
 0xd7a   :  { %v5798_v12 = vpop.eup %5797 }
 0xd7b   :  { %v2964_v59 = vadd.f32 1.0, %v5798_v12  ;;  %v5800_v11 = vpop.eup %5799 }
 0xd7c   :  { %v2971_v62 = vadd.f32 1.0, %v5800_v11 }
 0xd7d   :  { %5801 = vrcp.f32 %v2964_v59 }
 0xd7e   :  { %5803 = vrcp.f32 %v2971_v62 }
 0xd87   :  { %v5802_v17 = vpop.eup %5801 }
 0xd88   :  { %v2975_v31 = vmul.f32 %v5802_v17, %v2974_v15  ;;  %v5804_v4 = vpop.eup %5803 }
 0xd89   :  { %v2978_v36 = vsub.f32 1.0, %v5804_v4  ;;  %v2980_v28 = vmul.f32 %v5804_v4, %v6895_v47 }
 0xd8a   :  { %v2976_v40 = vadd.f32 %v2975_v31, %v2110_v16  ;;  %v3482_v31 = vld [vmem:[#allocation9 + $0x10] sm:$0xff] }
 0xd8c   :  { %5805 = vtanh.f32 %v2976_v40  ;;  %v3483_v40 = vld [vmem:[#allocation9 + $0x18] sm:$0xff] }
 0xd8d   :  { %v5582_v4 = vpack.c.bf16 %v3483_v40, %v3482_v31 }
 0xd96   :  { %v5806_v37 = vpop.eup %5805 }
 0xd97   :  { %v2979_v2 = vmul.f32 %v5806_v37, %v2978_v36  ;;  %v3484_v36 = vld [vmem:[#allocation9 + $0x20] sm:$0xff]  ;;  %v3485_v37 = vld [vmem:[#allocation9 + $0x28] sm:$0xff] }
 0xd99   :  { %v6940_v8 = vadd.f32 %v2980_v28, %v2979_v2  ;;  %v5585_v2 = vpack.c.bf16 %v3485_v37, %v3484_v36  ;;  %v3486_v28 = vld [vmem:[#allocation9 + $0x30] sm:$0xff] }
 0xd9b   :  { %3050 = vmatmul.mubr.f32.vlgmr.msra.gmra.mrb[26].mxu0 %v6940_v8  ;;  %4503 = vmatmul.mubr.f32.vlgmr.msra.gmra.mrb[42].mxu1 %v6940_v8 }
 0xd9c   :  { %5469 = vmatpush1.bf16.msra.mxu0 %v6593_v25  ;;  %5500 = vmatpush3.bf16.msra.mxu1 %v6631_v44 }
 0xd9d   :  { %5471 = vmatprep.subr.bf16.mxu0 %v6597_v27  ;;  %5501 = vmatprep.subr.bf16.mxu1 %v5941_v48 }
 0xd9e   :  { %3215 = vmatprep.mubr.f32.mxu0 %v5940_v0  ;;  %4537 = vmatprep.mubr.msk.f32.mxu1 %vm5942_vm1, %v5940_v0 }
 0xda0   :  { %5473 = vmatpush1.bf16.msra.mxu0 %v6599_v22  ;;  %5503 = vmatpush3.bf16.msra.mxu1 %v6642_v20 }
 0xda1   :  { %5475 = vmatprep.subr.bf16.mxu0 %v6603_v33  ;;  %5504 = vmatprep.subr.bf16.mxu1 %v5941_v48 }
 0xda4   :  { %5477 = vmatpush1.bf16.msra.mxu0 %v6605_v45  ;;  %5506 = vmatpush3.bf16.msra.mxu1 %v6648_v46 }
 0xda5   :  { %5479 = vmatprep.subr.bf16.mxu0 %v6609_v56  ;;  %5507 = vmatprep.subr.bf16.mxu1 %v5941_v48 }
 0xda8   :  { %5481 = vmatpush1.bf16.msra.mxu0 %v6611_v3  ;;  %5509 = vmatpush3.bf16.msra.mxu1 %v6651_v30 }
 0xda9   :  { %5483 = vmatprep.subr.bf16.mxu0 %v6615_v14  ;;  %5510 = vmatprep.subr.bf16.mxu1 %v5941_v48 }
 0xdac   :  { %5485 = vmatpush1.bf16.msra.mxu0 %v6617_v26  ;;  %5512 = vmatpush3.bf16.msra.mxu1 %v6655_v23 }
 0xdad   :  { %5487 = vmatprep.subr.bf16.mxu0 %v6621_v57  ;;  %5513 = vmatprep.subr.bf16.mxu1 %v5941_v48 }
 0xdb0   :  { %5489 = vmatpush1.bf16.msra.mxu0 %v6623_v60  ;;  %5515 = vmatpush3.bf16.msra.mxu1 %v6659_v42 }
 0xdb1   :  { %5491 = vmatprep.subr.bf16.mxu0 %v6627_v50  ;;  %5516 = vmatprep.subr.bf16.mxu1 %v5941_v48 }
 0xdb4   :  { %5493 = vmatpush1.bf16.msra.mxu0 %v6629_v39  ;;  %5518 = vmatpush3.bf16.msra.mxu1 %v6663_v61 }
 0xdb5   :  { %5495 = vmatprep.subr.bf16.mxu0 %v6636_v7  ;;  %5519 = vmatprep.subr.bf16.mxu1 %v5941_v48 }
 0xdb8   :  { %5497 = vmatpush1.bf16.msra.mxu0 %v6639_v13  ;;  %5521 = vmatpush3.bf16.msra.mxu1 %v6667_v10 }
 0xdb9   :  { %5523 = vmatprep.subr.bf16.mxu0 %v6591_v54  ;;  %5554 = vmatprep.subr.bf16.mxu1 %v5941_v48 }
 0xe6e   :  { %v3051_v38 = vpop.f32.mrb[26].mxu0  ;;  %v3122_v21 = vpop.f32.mrb[42].mxu1 }
 0xe6f   :  { %v5628_v29 = vadd.f32 %v3051_v38, %v6740_v63  ;;  %v3053_v34 = vpop.f32.mrb[27].mxu0  ;;  %v4504_v32 = vpop.f32.mrb[43].mxu1  ;;  %v3140_v54 = vadd.f32 %v6751_v55, %v3122_v21  ;;  %v3488_v38 = vld [vmem:[#allocation9 + $0x40] sm:$0xff]  ;;  %v3489_v21 = vld [vmem:[#allocation9 + $0x48] sm:$0xff] }
 0xe70   :  { %v5629_v41 = vadd.f32 %v3053_v34, %v6744_v19  ;;  %v3490_v34 = vld [vmem:[#allocation9 + $0x50] sm:$0xff]  ;;  %v3491_v32 = vld [vmem:[#allocation9 + $0x58] sm:$0xff] }
 0xe71   :  { %v3625_v35 = vmul.f32 -1.442695, %v5628_v29  ;;  %v5591_v29 = vpack.c.bf16 %v3489_v21, %v3488_v38 }
 0xe72   :  { %v3626_v47 = vmul.f32 -1.442695, %v5629_v41  ;;  %v3492_v41 = vld [vmem:[#allocation9 + $0x60] sm:$0xff] }
 0xe73   :  { %5807 = vpow2.f32 %v3625_v35  ;;  %v5594_v35 = vpack.c.bf16 %v3491_v32, %v3490_v34 }
 0xe74   :  { %5809 = vpow2.f32 %v3626_v47  ;;  %v3493_v47 = vld [vmem:[#allocation9 + $0x68] sm:$0xff] }
 0xe7d   :  { %v5808_v18 = vpop.eup %5807 }
 0xe7e   :  { %v3130_v49 = vadd.f32 1.0, %v5808_v18  ;;  %v5810_v58 = vpop.eup %5809  ;;  %v5597_v18 = vpack.c.bf16 %v3493_v47, %v3492_v41 }
 0xe7f   :  { %v3137_v52 = vadd.f32 1.0, %v5810_v58  ;;  %v3495_v58 = vld [vmem:[#allocation9 + $0x78] sm:$0xff] }
 0xe80   :  { %5811 = vrcp.f32 %v3130_v49  ;;  %v3494_v49 = vld [vmem:[#allocation9 + $0x70] sm:$0xff] }
 0xe81   :  { %5813 = vrcp.f32 %v3137_v52  ;;  %v5600_v52 = vpack.c.bf16 %v3495_v58, %v3494_v49 }
 0xe8a   :  { %v5812_v1 = vpop.eup %5811 }
 0xe8b   :  { %v3141_v9 = vmul.f32 %v5812_v1, %v3140_v54  ;;  %v5814_v12 = vpop.eup %5813 }
 0xe8c   :  { %v3144_v59 = vsub.f32 1.0, %v5814_v12  ;;  %v3146_v15 = vmul.f32 %v5814_v12, %v6940_v8 }
 0xe8d   :  { %v3142_v5 = vadd.f32 %v3141_v9, %v2115_v6 }
 0xe8f   :  { %5815 = vtanh.f32 %v3142_v5 }
 0xe99   :  { %v5816_v11 = vpop.eup %5815 }
 0xe9a   :  { %v3145_v62 = vmul.f32 %v5816_v11, %v3144_v59 }
 0xe9c   :  { %v3147_v17 = vadd.f32 %v3146_v15, %v3145_v62 }
 0xe9e   :  { %3216 = vmatmul.mubr.f32.vlgmr.msra.gmra.mrb[28].mxu0 %v3147_v17  ;;  %4538 = vmatmul.mubr.f32.vlgmr.msra.gmra.mrb[44].mxu1 %v3147_v17 }
 0xe9f   :  { %5525 = vmatpush1.bf16.msra.mxu0 %v6593_v25  ;;  %5556 = vmatpush3.bf16.msra.mxu1 %v6631_v44 }
 0xea0   :  { %5527 = vmatprep.subr.bf16.mxu0 %v6597_v27  ;;  %5557 = vmatprep.subr.bf16.mxu1 %v5941_v48 }
 0xea1   :  { %3381 = vmatprep.mubr.f32.mxu0 %v5940_v0  ;;  %4572 = vmatprep.mubr.msk.f32.mxu1 %vm5942_vm1, %v5940_v0 }
 0xea3   :  { %5529 = vmatpush1.bf16.msra.mxu0 %v6599_v22  ;;  %5559 = vmatpush3.bf16.msra.mxu1 %v6642_v20 }
 0xea4   :  { %5531 = vmatprep.subr.bf16.mxu0 %v6603_v33  ;;  %5560 = vmatprep.subr.bf16.mxu1 %v5941_v48 }
 0xea7   :  { %5533 = vmatpush1.bf16.msra.mxu0 %v6605_v45  ;;  %5562 = vmatpush3.bf16.msra.mxu1 %v6648_v46 }
 0xea8   :  { %5535 = vmatprep.subr.bf16.mxu0 %v6609_v56  ;;  %5563 = vmatprep.subr.bf16.mxu1 %v5941_v48 }
 0xeab   :  { %5537 = vmatpush1.bf16.msra.mxu0 %v6611_v3  ;;  %5565 = vmatpush3.bf16.msra.mxu1 %v6651_v30 }
 0xeac   :  { %5539 = vmatprep.subr.bf16.mxu0 %v6615_v14  ;;  %5566 = vmatprep.subr.bf16.mxu1 %v5941_v48 }
 0xeaf   :  { %5541 = vmatpush1.bf16.msra.mxu0 %v6617_v26  ;;  %5568 = vmatpush3.bf16.msra.mxu1 %v6655_v23 }
 0xeb0   :  { %5543 = vmatprep.subr.bf16.mxu0 %v6621_v57  ;;  %5569 = vmatprep.subr.bf16.mxu1 %v5941_v48 }
 0xeb3   :  { %5545 = vmatpush1.bf16.msra.mxu0 %v6623_v60  ;;  %5571 = vmatpush3.bf16.msra.mxu1 %v6659_v42 }
 0xeb4   :  { %5547 = vmatprep.subr.bf16.mxu0 %v6627_v50  ;;  %5572 = vmatprep.subr.bf16.mxu1 %v5941_v48 }
 0xeb7   :  { %5549 = vmatpush1.bf16.msra.mxu0 %v6629_v39  ;;  %5574 = vmatpush3.bf16.msra.mxu1 %v6663_v61 }
 0xeb8   :  { %5551 = vmatprep.subr.bf16.mxu0 %v6636_v7  ;;  %5575 = vmatprep.subr.bf16.mxu1 %v5941_v48  ;;  %v2120_v7 = vadd.f32 %v6736_v53, %v6755_v43  ;;  %v3481_v53 = vld [vmem:[#allocation9 + $0x8] sm:$0xff] }
 0xeb9   :  { %v5579_v16 = vpack.c.bf16 %v3481_v53, %v3480_v24 }
 0xebb   :  { %5553 = vmatpush1.bf16.msra.mxu0 %v6639_v13  ;;  %5577 = vmatpush3.bf16.msra.mxu1 %v6667_v10 }
 0xebc   :  { %5578 = vmatprep.subr.bf16.mxu0 %v5941_v48 }
 0xf71   :  { %v3217_v25 = vpop.f32.mrb[28].mxu0  ;;  %v3288_v27 = vpop.f32.mrb[44].mxu1 }
 0xf72   :  { %v5630_v22 = vadd.f32 %v3217_v25, %v6740_v63  ;;  %v3219_v33 = vpop.f32.mrb[29].mxu0  ;;  %v4539_v45 = vpop.f32.mrb[45].mxu1  ;;  %v3306_v39 = vadd.f32 %v6751_v55, %v3288_v27 }
 0xf73   :  { %v5631_v3 = vadd.f32 %v3219_v33, %v6744_v19 }
 0xf74   :  { %v3627_v56 = vmul.f32 -1.442695, %v5630_v22  ;;  %v2125_v22 = vadd.f32 %v6734_v51, %v6755_v43 }
 0xf75   :  { %v3628_v14 = vmul.f32 -1.442695, %v5631_v3 }
 0xf76   :  { %5817 = vpow2.f32 %v3627_v56 }
 0xf77   :  { %5819 = vpow2.f32 %v3628_v14 }
 0xf80   :  { %v5818_v26 = vpop.eup %5817 }
 0xf81   :  { %v3296_v57 = vadd.f32 1.0, %v5818_v26  ;;  %v5820_v60 = vpop.eup %5819 }
 0xf82   :  { %v3303_v50 = vadd.f32 1.0, %v5820_v60 }
 0xf83   :  { %5821 = vrcp.f32 %v3296_v57 }
 0xf84   :  { %5823 = vrcp.f32 %v3303_v50 }
 0xf8d   :  { %v5822_v44 = vpop.eup %5821 }
 0xf8e   :  { %v3307_v13 = vmul.f32 %v5822_v44, %v3306_v39  ;;  %v5824_v46 = vpop.eup %5823 }
 0xf8f   :  { %v3310_v30 = vsub.f32 1.0, %v5824_v46  ;;  %v3312_v61 = vmul.f32 %v5824_v46, %v3147_v17 }
 0xf90   :  { %v3308_v20 = vadd.f32 %v3307_v13, %v2120_v7 }
 0xf92   :  { %5825 = vtanh.f32 %v3308_v20 }
 0xf9c   :  { %v5826_v23 = vpop.eup %5825 }
 0xf9d   :  { %v3311_v42 = vmul.f32 %v5826_v23, %v3310_v30 }
 0xf9f   :  { %v7024_v10 = vadd.f32 %v3312_v61, %v3311_v42 }
 0xfa1   :  { %3382 = vmatmul.mubr.f32.vlgmr.msra.gmra.mrb[30].mxu0 %v7024_v10  ;;  %4573 = vmatmul.mubr.f32.vlgmr.msra.gmra.mrb[46].mxu1 %v7024_v10 }
 0xfa2   :  { %4607 = vmatprep.mubr.msk.f32.mxu0 %vm5942_vm1, %v5940_v0  ;;  %5580 = vmatpush3.bf16.msra.mxu0 %v5579_v16  ;;  %v3487_v0 = vld [vmem:[#allocation9 + $0x38] sm:$0xff] }
 0xfa3   :  { %5581 = vmatprep.subr.bf16.mxu0 %v5941_v48  ;;  %v5588_v8 = vpack.c.bf16 %v3487_v0, %v3486_v28 }
 0xfa6   :  { %5583 = vmatpush3.bf16.msra.mxu0 %v5582_v4 }
 0xfa7   :  { %5584 = vmatprep.subr.bf16.mxu0 %v5941_v48 }
 0xfaa   :  { %5586 = vmatpush3.bf16.msra.mxu0 %v5585_v2 }
 0xfab   :  { %5587 = vmatprep.subr.bf16.mxu0 %v5941_v48 }
 0xfae   :  { %5589 = vmatpush3.bf16.msra.mxu0 %v5588_v8 }
 0xfaf   :  { %5590 = vmatprep.subr.bf16.mxu0 %v5941_v48 }
 0xfb2   :  { %5592 = vmatpush3.bf16.msra.mxu0 %v5591_v29 }
 0xfb3   :  { %5593 = vmatprep.subr.bf16.mxu0 %v5941_v48 }
 0xfb6   :  { %5595 = vmatpush3.bf16.msra.mxu0 %v5594_v35 }
 0xfb7   :  { %5596 = vmatprep.subr.bf16.mxu0 %v5941_v48 }
 0xfba   :  { %5598 = vmatpush3.bf16.msra.mxu0 %v5597_v18 }
 0xfbb   :  { %5599 = vmatprep.subr.bf16.mxu0 %v5941_v48 }
 0xfbe   :  { %5601 = vmatpush3.bf16.msra.mxu0 %v5600_v52 }
0x1074   :  { %v3383_v54 = vpop.f32.mrb[30].mxu0  ;;  %v3454_v1 = vpop.f32.mrb[46].mxu1 }
0x1075   :  { %v5632_v6 = vadd.f32 %v3383_v54, %v6740_v63  ;;  %v3385_v9 = vpop.f32.mrb[31].mxu0  ;;  %v4574_v5 = vpop.f32.mrb[47].mxu1  ;;  %v3472_v48 = vadd.f32 %v6751_v55, %v3454_v1  ;;  %v3631_v55 = vld [vmem:[%s7059_s10] ss:$0 sm:$0xff] }
0x1076   :  { %v5633_v59 = vadd.f32 %v3385_v9, %v6744_v19 }
0x1077   :  { %v3629_v12 = vmul.f32 -1.442695, %v5632_v6 }
0x1078   :  { %v3630_v11 = vmul.f32 -1.442695, %v5633_v59 }
0x1079   :  { %5827 = vpow2.f32 %v3629_v12 }
0x107a   :  { %5829 = vpow2.f32 %v3630_v11 }
0x1083   :  { %v5828_v62 = vpop.eup %5827 }
0x1084   :  { %v3462_v15 = vadd.f32 1.0, %v5828_v62  ;;  %v5830_v17 = vpop.eup %5829 }
0x1085   :  { %v3469_v25 = vadd.f32 1.0, %v5830_v17 }
0x1086   :  { %5831 = vrcp.f32 %v3462_v15 }
0x1087   :  { %5833 = vrcp.f32 %v3469_v25 }
0x1090   :  { %v5832_v27 = vpop.eup %5831 }
0x1091   :  { %v3473_v63 = vmul.f32 %v5832_v27, %v3472_v48  ;;  %v5834_v45 = vpop.eup %5833 }
0x1092   :  { %v3476_v19 = vsub.f32 1.0, %v5834_v45  ;;  %v3478_v14 = vmul.f32 %v5834_v45, %v7024_v10 }
0x1093   :  { %v3474_v33 = vadd.f32 %v3473_v63, %v2125_v22 }
0x1095   :  { %5835 = vtanh.f32 %v3474_v33 }
0x109f   :  { %v5836_v56 = vpop.eup %5835 }
0x10a0   :  { %v3477_v3 = vmul.f32 %v5836_v56, %v3476_v19 }
0x10a2   :  { %v3479_v26 = vadd.f32 %v3478_v14, %v3477_v3 }
0x10a4   :  { %4608 = vmatmul.mubr.f32.vlgmr.msra.gmra.mrb[32].mxu0 %v3479_v26 }
0x1177   :  { %v3569_v57 = vpop.f32.mrb[32].mxu0 }
0x1178   :  { %v3570_v60 = vadd.f32 %v3631_v55, %v3569_v57  ;;  %v4609_v50 = vpop.f32.mrb[33].mxu0 }
0x117a   :  { %3573 = vst [vmem:[%s7060_s11] sm:$0xff] %v3570_v60 }
0x117b   :  { %3578 = vsyncpa [#allocation5], 1 }
0x117c   :  { %3579 = vsyncpa [#allocation7], 1 }
0x117d   :  { %3580 = vsyncpa [#allocation10], 1 }

</bundles_post_ra>
